<compile_context>
chip_gen: v5e
topology: v5e:2x2
jax: 0.10.0
libtpu: 0.0.40
codegen_flags: <defaults>
</compile_context>

<pallas_src>
import functools

import jax
import jax.numpy as jnp
from jax import lax
from jax.experimental import pallas as pl
from jax.experimental.pallas import tpu as pltpu


def deep_lstm_fused_kernel(
    x_ref,                                   # [T*B, I]  whole sequence, flattened
    h1_ref, c1_ref, h2_ref, c2_ref,          # [B, H]    initial states
    wih1_ref,                                # [I, 4H1]  (i/f/o cols pre-scaled 0.5)
    b1_ref,                                  # [1, 4H1]
    w1cat_ref,                               # [H1, 4H1+4H2+O] = [Whh1'|Wih2'|Wo1]
    b2_ref,                                  # [1, 4H2]
    w2cat_ref,                               # [H2, 4H2+O]     = [Whh2'|Wo2]
    bo_ref,                                  # [1]  SMEM scalar
    out_ref,                                 # [T, B, O]
    h1o_ref, c1o_ref, h2o_ref, c2o_ref,      # [B, H]    final states (aliased)
    gx_ref,                                  # [T*B, 4H1] VMEM scratch
    *, T, B, H1, H2, O,
):
    f32 = jnp.float32

    # Hoisted input projection for every time step: one big MXU call (M = T*B).
    gx_ref[...] = (
        jnp.dot(x_ref[...], wih1_ref[...], preferred_element_type=f32)
        + b1_ref[...]
    )

    bo = bo_ref[0]          # SMEM scalar, read once
    b2 = b2_ref[...]        # [1, 4H2], broadcasts over batch

    h1_0 = h1_ref[...]
    c1_0 = c1_ref[...]
    h2_0 = h2_ref[...]
    c2_0 = c2_ref[...]

    # Initial recurrent projections (gate biases already live in gx / b2).
    g1h_0 = jnp.dot(h1_0, w1cat_ref[:, : 4 * H1], preferred_element_type=f32)
    g2h_0 = jnp.dot(h2_0, w2cat_ref[:, : 4 * H2], preferred_element_type=f32)

    def step(t, carry):
        # h1/h2 are threaded only so the final values can be written after the loop.
        h1, c1, h2, c2, g1h, g2h = carry

        row = pl.multiple_of(t * B, B)

        # ---- cell 1: pre-activations (i/f/o columns pre-scaled by 0.5) ----
        z1 = gx_ref[pl.ds(row, B), :] + g1h
        y1 = jnp.tanh(z1)                  # one EUP pass over the full [B,4H1] tile
        s1 = 0.5 * y1 + 0.5                # sigmoid recovered on i/f/o lanes (VPU)
        c1n = s1[:, H1:2 * H1] * c1 + s1[:, :H1] * y1[:, 2 * H1:3 * H1]
        h1n = s1[:, 3 * H1:] * jnp.tanh(c1n)

        # Fused consumers of h1n: next-step Whh1', this-step Wih2', readout Wo1.
        p1 = jnp.dot(h1n, w1cat_ref[...], preferred_element_type=f32)

        # ---- cell 2 ----
        z2 = p1[:, 4 * H1:4 * (H1 + H2)] + g2h + b2
        y2 = jnp.tanh(z2)
        s2 = 0.5 * y2 + 0.5
        c2n = s2[:, H2:2 * H2] * c2 + s2[:, :H2] * y2[:, 2 * H2:3 * H2]
        h2n = s2[:, 3 * H2:] * jnp.tanh(c2n)

        # Fused consumers of h2n: next-step Whh2', readout Wo2.
        p2 = jnp.dot(h2n, w2cat_ref[...], preferred_element_type=f32)

        out_ref[t] = (p1[:, 4 * (H1 + H2):] + p2[:, 4 * H2:] + bo).astype(out_ref.dtype)
        return (h1n, c1n, h2n, c2n, p1[:, :4 * H1], p2[:, :4 * H2])

    h1f, c1f, h2f, c2f, _, _ = lax.fori_loop(
        0, T, step, (h1_0, c1_0, h2_0, c2_0, g1h_0, g2h_0), unroll=True
    )

    # Single state write-back (in place, via input_output_aliases).
    h1o_ref[...] = h1f
    c1o_ref[...] = c1f
    h2o_ref[...] = h2f
    c2o_ref[...] = c2f


def _full(shape):
    zeros = (0,) * len(shape)
    return pl.BlockSpec(shape, lambda i, _z=zeros: _z)


@jax.jit
def deep_lstm_forward_seq(x_seq, states, params):
    """Run T sequential DeepLSTM.forward() calls in one fused kernel.

    x_seq: [T, B, I].  Returns (out_seq [T, B, O], new_states).
    """
    h1, c1, h2, c2 = states
    wih1, b1, w1cat, b2, w2cat, bo = params
    T, B, I = x_seq.shape
    H1 = h1.shape[1]
    H2 = h2.shape[1]
    O = w2cat.shape[1] - 4 * H2

    x_flat = x_seq.reshape(T * B, I)
    kernel = functools.partial(deep_lstm_fused_kernel, T=T, B=B, H1=H1, H2=H2, O=O)

    in_specs = [
        _full((T * B, I)),
        _full((B, H1)), _full((B, H1)), _full((B, H2)), _full((B, H2)),
        _full((I, 4 * H1)), _full((1, 4 * H1)),
        _full((H1, 4 * H1 + 4 * H2 + O)),
        _full((1, 4 * H2)),
        _full((H2, 4 * H2 + O)),
        pl.BlockSpec(memory_space=pltpu.SMEM),          # b_o scalar
    ]
    out_specs = [
        _full((T, B, O)),
        _full((B, H1)), _full((B, H1)), _full((B, H2)), _full((B, H2)),
    ]
    out_shape = (
        jax.ShapeDtypeStruct((T, B, O), jnp.float32),
        jax.ShapeDtypeStruct((B, H1), jnp.float32),
        jax.ShapeDtypeStruct((B, H1), jnp.float32),
        jax.ShapeDtypeStruct((B, H2), jnp.float32),
        jax.ShapeDtypeStruct((B, H2), jnp.float32),
    )

    # Advisory estimate, now including output and state write-back bytes.
    flops = (
        2 * T * B * I * 4 * H1
        + 2 * B * (H1 * 4 * H1 + H2 * 4 * H2)
        + 2 * T * B * (H1 * (4 * H1 + 4 * H2 + O) + H2 * (4 * H2 + O))
    )
    transcendentals = T * B * (4 * H1 + H1 + 4 * H2 + H2)
    bytes_accessed = 4 * (
        T * B * I + T * B * O
        + 2 * 2 * B * (H1 + H2)
        + I * 4 * H1 + 4 * H1
        + H1 * (4 * H1 + 4 * H2 + O) + 4 * H2
        + H2 * (4 * H2 + O) + 1
    )

    out_seq, h1n, c1n, h2n, c2n = pl.pallas_call(
        kernel,
        grid=(1,),
        in_specs=in_specs,
        out_specs=out_specs,
        out_shape=out_shape,
        scratch_shapes=[pltpu.VMEM((T * B, 4 * H1), jnp.float32)],
        # Update the state buffers in place (inputs 1..4 -> outputs 1..4).
        input_output_aliases={1: 1, 2: 2, 3: 3, 4: 4},
        compiler_params=pltpu.CompilerParams(
            dimension_semantics=("arbitrary",),
        ),
        cost_estimate=pl.CostEstimate(
            flops=flops, transcendentals=transcendentals,
            bytes_accessed=bytes_accessed,
        ),
    )(x_flat, h1, c1, h2, c2, wih1, b1, w1cat, b2, w2cat, bo)

    return out_seq, (h1n, c1n, h2n, c2n)


def deep_lstm_step(x, states, params):
    """Single module.forward() call (T=1)."""
    out_seq, new_states = deep_lstm_forward_seq(x[None], states, params)
    return out_seq[0], new_states


# ------------------------- parameter construction -------------------------

def init_raw_params(key, input_size, hidden_size, output_size):
    """Deterministic synthetic init mirroring DeepLSTM.__init__/_init_parameters
    (torch.nn.LSTMCell layout, gate order i,f,g,o)."""
    H1, H2 = hidden_size
    ks = jax.random.split(key, 10)

    def xavier(k, fan_out, fan_in, gain=5.0 / 3.0):   # calculate_gain('tanh')
        std = gain * (2.0 / (fan_in + fan_out)) ** 0.5
        return jax.random.normal(k, (fan_out, fan_in), jnp.float32) * std

    w_ih1 = xavier(ks[0], 4 * H1, input_size)
    w_hh1 = xavier(ks[1], 4 * H1, H1)
    b_ih1 = jax.random.normal(ks[2], (4 * H1,), jnp.float32) * 0.1
    b_hh1 = jax.random.normal(ks[3], (4 * H1,), jnp.float32) * 0.1
    w_ih2 = xavier(ks[4], 4 * H2, H1)
    w_hh2 = xavier(ks[5], 4 * H2, H2)
    b_ih2 = jax.random.normal(ks[6], (4 * H2,), jnp.float32) * 0.1
    b_hh2 = jax.random.normal(ks[7], (4 * H2,), jnp.float32) * 0.1
    w_o = jax.random.uniform(ks[8], (output_size, H1 + H2), jnp.float32) * 0.01
    b_o = jax.random.uniform(ks[9], (1,), jnp.float32) * 0.01
    return (w_ih1, w_hh1, b_ih1, b_hh1, w_ih2, w_hh2, b_ih2, b_hh2, w_o, b_o)


def prepare_kernel_params(raw):
    """Kernel-side weight packing (numerically equivalent to the PyTorch forward):
      * transpose to [K, N] for [B,K]@[K,N] matmuls, fold b_ih+b_hh,
      * pre-scale i/f/o gate columns & biases by 0.5 (sigmoid via 0.5*tanh+0.5),
      * fuse matmuls that share an LHS:
          w1cat = [W_hh1' | W_ih2' | W_o1]   (all consumers of h1_new)
          w2cat = [W_hh2' | W_o2]            (all consumers of h2_new)
    """
    (w_ih1, w_hh1, b_ih1, b_hh1, w_ih2, w_hh2, b_ih2, b_hh2, w_o, b_o) = raw
    H1 = w_hh1.shape[1]
    H2 = w_hh2.shape[1]

    def gate_scale(H):   # gate order i, f, g, o  ->  0.5, 0.5, 1.0, 0.5
        return jnp.concatenate(
            [jnp.full((2 * H,), 0.5), jnp.ones((H,)), jnp.full((H,), 0.5)]
        ).astype(jnp.float32)

    s1 = gate_scale(H1)
    s2 = gate_scale(H2)

    wih1 = w_ih1.T * s1[None, :]                       # [I, 4H1]
    whh1 = w_hh1.T * s1[None, :]                       # [H1, 4H1]
    b1 = ((b_ih1 + b_hh1) * s1).reshape(1, 4 * H1)
    wih2 = w_ih2.T * s2[None, :]                       # [H1, 4H2]
    whh2 = w_hh2.T * s2[None, :]                       # [H2, 4H2]
    b2 = ((b_ih2 + b_hh2) * s2).reshape(1, 4 * H2)

    w_o_t = w_o.T                                      # [H1+H2, O]
    w1cat = jnp.concatenate([whh1, wih2, w_o_t[:H1]], axis=1)   # [H1, 4H1+4H2+O]
    w2cat = jnp.concatenate([whh2, w_o_t[H1:]], axis=1)         # [H2, 4H2+O]
    bo = b_o.reshape(1).astype(jnp.float32)            # SMEM scalar

    return (wih1, b1, w1cat, b2, w2cat, bo)


# ------------------------- pure-JAX reference -------------------------

def _lstm_cell_ref(x, h, c, w_ih, w_hh, b_ih, b_hh):
    g = x @ w_ih.T + b_ih + h @ w_hh.T + b_hh
    H = h.shape[1]
    i, f, gg, o = g[:, :H], g[:, H:2 * H], g[:, 2 * H:3 * H], g[:, 3 * H:]
    c_new = jax.nn.sigmoid(f) * c + jax.nn.sigmoid(i) * jnp.tanh(gg)
    h_new = jax.nn.sigmoid(o) * jnp.tanh(c_new)
    return h_new, c_new


def reference_step(x, states, raw):
    h1, c1, h2, c2 = states
    (w_ih1, w_hh1, b_ih1, b_hh1, w_ih2, w_hh2, b_ih2, b_hh2, w_o, b_o) = raw
    h1n, c1n = _lstm_cell_ref(x, h1, c1, w_ih1, w_hh1, b_ih1, b_hh1)
    h2n, c2n = _lstm_cell_ref(h1n, h2, c2, w_ih2, w_hh2, b_ih2, b_hh2)
    out = jnp.concatenate([h1n, h2n], axis=1) @ w_o.T + b_o
    return out, (h1n, c1n, h2n, c2n)


def reference_forward_seq(x_seq, states, raw):
    outs = []
    st = states
    for t in range(x_seq.shape[0]):
        o, st = reference_step(x_seq[t], st, raw)
        outs.append(o)
    return jnp.stack(outs, axis=0), st


if __name__ == "__main__":
    # batch=8, input=16, hidden=(32,32), output=8; T=16 repeated forward() calls
    # fused into one kernel invocation.
    B, I, H1, H2, O, T = 8, 16, 32, 32, 8, 16

    key = jax.random.PRNGKey(0)
    k_x, k_p = jax.random.split(key)
    x_seq = jax.random.normal(k_x, (T, B, I), jnp.float32)
    raw = init_raw_params(k_p, I, (H1, H2), O)
    params = prepare_kernel_params(raw)

    # Buffers start at zeros (as registered in __init__).
    states = (
        jnp.zeros((B, H1), jnp.float32),
        jnp.zeros((B, H1), jnp.float32),
        jnp.zeros((B, H2), jnp.float32),
        jnp.zeros((B, H2), jnp.float32),
    )

    # Fused T-step run.
    out_seq, new_states = deep_lstm_forward_seq(x_seq, states, params)
    out_seq = jax.block_until_ready(out_seq)

    ref_out, ref_states = reference_forward_seq(x_seq, states, raw)
    assert out_seq.shape == (T, B, O)
    assert jnp.allclose(out_seq, ref_out, atol=1e-5, rtol=1e-5)
    for a, b in zip(new_states, ref_states):
        assert jnp.allclose(a, b, atol=1e-5, rtol=1e-5)

    # Single forward() call (T=1), mirroring one stateful module invocation.
    out1, st1 = deep_lstm_step(x_seq[0], states, params)
    out1 = jax.block_until_ready(out1)
    ref1, _ = reference_step(x_seq[0], states, raw)
    assert jnp.allclose(out1, ref1, atol=1e-5, rtol=1e-5)

    print("KERNEL_OK")
</pallas_src>

<mosaic_0001>
module attributes {stable_mosaic.version = 11 : i64} {
  func.func @deep_lstm_fused_kernel(%arg0: i32, %arg1: memref<128x16xf32, #tpu.memory_space<vmem>>, %arg2: memref<8x32xf32, #tpu.memory_space<vmem>>, %arg3: memref<8x32xf32, #tpu.memory_space<vmem>>, %arg4: memref<8x32xf32, #tpu.memory_space<vmem>>, %arg5: memref<8x32xf32, #tpu.memory_space<vmem>>, %arg6: memref<16x128xf32, #tpu.memory_space<vmem>>, %arg7: memref<1x128xf32, #tpu.memory_space<vmem>>, %arg8: memref<32x264xf32, #tpu.memory_space<vmem>>, %arg9: memref<1x128xf32, #tpu.memory_space<vmem>>, %arg10: memref<32x136xf32, #tpu.memory_space<vmem>>, %arg11: memref<1xf32, #tpu.memory_space<smem>>, %arg12: memref<16x8x8xf32, #tpu.memory_space<vmem>>, %arg13: memref<8x32xf32, #tpu.memory_space<vmem>>, %arg14: memref<8x32xf32, #tpu.memory_space<vmem>>, %arg15: memref<8x32xf32, #tpu.memory_space<vmem>>, %arg16: memref<8x32xf32, #tpu.memory_space<vmem>>, %arg17: memref<128x128xf32, #tpu.memory_space<vmem>>) attributes {dimension_semantics = [#tpu.dimension_semantics<arbitrary>], iteration_bounds = array<i64: 1>, scalar_prefetch = 0 : i64, scratch_operands = 1 : i64, tpu.core_type = #tpu.core_type<tc>, window_params = [{pipeline_mode = #tpu.pipeline_mode<synchronous>, transform_indices = @transform_0, window_bounds = array<i64: 128, 16>}, {pipeline_mode = #tpu.pipeline_mode<synchronous>, transform_indices = @transform_1, window_bounds = array<i64: 8, 32>}, {pipeline_mode = #tpu.pipeline_mode<synchronous>, transform_indices = @transform_2, window_bounds = array<i64: 8, 32>}, {pipeline_mode = #tpu.pipeline_mode<synchronous>, transform_indices = @transform_3, window_bounds = array<i64: 8, 32>}, {pipeline_mode = #tpu.pipeline_mode<synchronous>, transform_indices = @transform_4, window_bounds = array<i64: 8, 32>}, {pipeline_mode = #tpu.pipeline_mode<synchronous>, transform_indices = @transform_5, window_bounds = array<i64: 16, 128>}, {pipeline_mode = #tpu.pipeline_mode<synchronous>, transform_indices = @transform_6, window_bounds = array<i64: 1, 128>}, {pipeline_mode = #tpu.pipeline_mode<synchronous>, transform_indices = @transform_7, window_bounds = array<i64: 32, 264>}, {pipeline_mode = #tpu.pipeline_mode<synchronous>, transform_indices = @transform_8, window_bounds = array<i64: 1, 128>}, {pipeline_mode = #tpu.pipeline_mode<synchronous>, transform_indices = @transform_9, window_bounds = array<i64: 32, 136>}, {transform_indices = @transform_10, window_bounds = array<i64: 1>}, {pipeline_mode = #tpu.pipeline_mode<synchronous>, transform_indices = @transform_11, window_bounds = array<i64: 16, 8, 8>}, {pipeline_mode = #tpu.pipeline_mode<synchronous>, transform_indices = @transform_12, window_bounds = array<i64: 8, 32>}, {pipeline_mode = #tpu.pipeline_mode<synchronous>, transform_indices = @transform_13, window_bounds = array<i64: 8, 32>}, {pipeline_mode = #tpu.pipeline_mode<synchronous>, transform_indices = @transform_14, window_bounds = array<i64: 8, 32>}, {pipeline_mode = #tpu.pipeline_mode<synchronous>, transform_indices = @transform_15, window_bounds = array<i64: 8, 32>}]} {
    %c0 = arith.constant 0 : index
    %c0_0 = arith.constant 0 : index
    %0 = vector.load %arg1[%c0, %c0_0] : memref<128x16xf32, #tpu.memory_space<vmem>>, vector<128x16xf32>
    %c0_1 = arith.constant 0 : index
    %c0_2 = arith.constant 0 : index
    %1 = vector.load %arg6[%c0_1, %c0_2] : memref<16x128xf32, #tpu.memory_space<vmem>>, vector<16x128xf32>
    %cst = arith.constant dense<0.000000e+00> : vector<128x128xf32>
    %2 = tpu.matmul %0, %1, %cst {dimension_numbers = #tpu.dot_dimension_numbers<[1], [0], [0], [1], [0, 0, 1, 1], [], []>} : vector<128x16xf32>, vector<16x128xf32>, vector<128x128xf32> -> vector<128x128xf32>
    %c0_3 = arith.constant 0 : index
    %c0_4 = arith.constant 0 : index
    %3 = vector.load %arg7[%c0_3, %c0_4] : memref<1x128xf32, #tpu.memory_space<vmem>>, vector<1x128xf32>
    %4 = vector.broadcast %3 : vector<1x128xf32> to vector<128x128xf32>
    %5 = arith.addf %2, %4 : vector<128x128xf32>
    %c0_5 = arith.constant 0 : index
    %c0_6 = arith.constant 0 : index
    %6 = vector.load %arg17[%c0_5, %c0_6] : memref<128x128xf32, #tpu.memory_space<vmem>>, vector<128x128xf32>
    tpu.vector_store %arg17[%c0_5, %c0_6], %5 {strides = array<i32>} : memref<128x128xf32, #tpu.memory_space<vmem>>, vector<128x128xf32>,
    %c0_7 = arith.constant 0 : index
    %7 = memref.load %arg11[%c0_7] : memref<1xf32, #tpu.memory_space<smem>>
    %c0_8 = arith.constant 0 : index
    %c0_9 = arith.constant 0 : index
    %8 = vector.load %arg9[%c0_8, %c0_9] : memref<1x128xf32, #tpu.memory_space<vmem>>, vector<1x128xf32>
    %c0_10 = arith.constant 0 : index
    %c0_11 = arith.constant 0 : index
    %9 = vector.load %arg2[%c0_10, %c0_11] : memref<8x32xf32, #tpu.memory_space<vmem>>, vector<8x32xf32>
    %c0_12 = arith.constant 0 : index
    %c0_13 = arith.constant 0 : index
    %10 = vector.load %arg3[%c0_12, %c0_13] : memref<8x32xf32, #tpu.memory_space<vmem>>, vector<8x32xf32>
    %c0_14 = arith.constant 0 : index
    %c0_15 = arith.constant 0 : index
    %11 = vector.load %arg4[%c0_14, %c0_15] : memref<8x32xf32, #tpu.memory_space<vmem>>, vector<8x32xf32>
    %c0_16 = arith.constant 0 : index
    %c0_17 = arith.constant 0 : index
    %12 = vector.load %arg5[%c0_16, %c0_17] : memref<8x32xf32, #tpu.memory_space<vmem>>, vector<8x32xf32>
    %c0_18 = arith.constant 0 : index
    %c0_19 = arith.constant 0 : index
    %13 = vector.load %arg8[%c0_18, %c0_19] : memref<32x264xf32, #tpu.memory_space<vmem>>, vector<32x128xf32>
    %cst_20 = arith.constant dense<0.000000e+00> : vector<8x128xf32>
    %14 = tpu.matmul %9, %13, %cst_20 {dimension_numbers = #tpu.dot_dimension_numbers<[1], [0], [0], [1], [0, 0, 1, 1], [], []>} : vector<8x32xf32>, vector<32x128xf32>, vector<8x128xf32> -> vector<8x128xf32>
    %c0_21 = arith.constant 0 : index
    %c0_22 = arith.constant 0 : index
    %15 = vector.load %arg10[%c0_21, %c0_22] : memref<32x136xf32, #tpu.memory_space<vmem>>, vector<32x128xf32>
    %cst_23 = arith.constant dense<0.000000e+00> : vector<8x128xf32>
    %16 = tpu.matmul %11, %15, %cst_23 {dimension_numbers = #tpu.dot_dimension_numbers<[1], [0], [0], [1], [0, 0, 1, 1], [], []>} : vector<8x32xf32>, vector<32x128xf32>, vector<8x128xf32> -> vector<8x128xf32>
    %c0_i32 = arith.constant 0 : i32
    %c8_i32 = arith.constant 8 : i32
    %17 = arith.muli %c0_i32, %c8_i32 : i32
    %18 = tpu.assume_multiple %17, 8 : i32
    %19 = arith.index_cast %18 : i32 to index
    %c0_24 = arith.constant 0 : index
    %20 = vector.load %arg17[%19, %c0_24] : memref<128x128xf32, #tpu.memory_space<vmem>>, vector<8x128xf32>
    %21 = arith.addf %20, %14 : vector<8x128xf32>
    %22 = math.tanh %21 : vector<8x128xf32>
    %cst_25 = arith.constant 5.000000e-01 : f32
    %23 = vector.broadcast %cst_25 : f32 to vector<8x128xf32>
    %24 = arith.mulf %23, %22 : vector<8x128xf32>
    %cst_26 = arith.constant 5.000000e-01 : f32
    %25 = vector.broadcast %cst_26 : f32 to vector<8x128xf32>
    %26 = arith.addf %24, %25 : vector<8x128xf32>
    %27 = vector.extract_strided_slice %26 {offsets = [0, 32], sizes = [8, 32], strides = [1, 1]} : vector<8x128xf32> to vector<8x32xf32>
    %28 = arith.mulf %27, %10 : vector<8x32xf32>
    %29 = vector.extract_strided_slice %26 {offsets = [0, 0], sizes = [8, 32], strides = [1, 1]} : vector<8x128xf32> to vector<8x32xf32>
    %30 = vector.extract_strided_slice %22 {offsets = [0, 64], sizes = [8, 32], strides = [1, 1]} : vector<8x128xf32> to vector<8x32xf32>
    %31 = arith.mulf %29, %30 : vector<8x32xf32>
    %32 = arith.addf %28, %31 : vector<8x32xf32>
    %33 = vector.extract_strided_slice %26 {offsets = [0, 96], sizes = [8, 32], strides = [1, 1]} : vector<8x128xf32> to vector<8x32xf32>
    %34 = math.tanh %32 : vector<8x32xf32>
    %35 = arith.mulf %33, %34 : vector<8x32xf32>
    %c0_27 = arith.constant 0 : index
    %c0_28 = arith.constant 0 : index
    %36 = vector.load %arg8[%c0_27, %c0_28] : memref<32x264xf32, #tpu.memory_space<vmem>>, vector<32x264xf32>
    %cst_29 = arith.constant dense<0.000000e+00> : vector<8x264xf32>
    %37 = tpu.matmul %35, %36, %cst_29 {dimension_numbers = #tpu.dot_dimension_numbers<[1], [0], [0], [1], [0, 0, 1, 1], [], []>} : vector<8x32xf32>, vector<32x264xf32>, vector<8x264xf32> -> vector<8x264xf32>
    %38 = vector.extract_strided_slice %37 {offsets = [0, 128], sizes = [8, 128], strides = [1, 1]} : vector<8x264xf32> to vector<8x128xf32>
    %39 = arith.addf %38, %16 : vector<8x128xf32>
    %40 = vector.broadcast %8 : vector<1x128xf32> to vector<8x128xf32>
    %41 = arith.addf %39, %40 : vector<8x128xf32>
    %42 = math.tanh %41 : vector<8x128xf32>
    %cst_30 = arith.constant 5.000000e-01 : f32
    %43 = vector.broadcast %cst_30 : f32 to vector<8x128xf32>
    %44 = arith.mulf %43, %42 : vector<8x128xf32>
    %cst_31 = arith.constant 5.000000e-01 : f32
    %45 = vector.broadcast %cst_31 : f32 to vector<8x128xf32>
    %46 = arith.addf %44, %45 : vector<8x128xf32>
    %47 = vector.extract_strided_slice %46 {offsets = [0, 32], sizes = [8, 32], strides = [1, 1]} : vector<8x128xf32> to vector<8x32xf32>
    %48 = arith.mulf %47, %12 : vector<8x32xf32>
    %49 = vector.extract_strided_slice %46 {offsets = [0, 0], sizes = [8, 32], strides = [1, 1]} : vector<8x128xf32> to vector<8x32xf32>
    %50 = vector.extract_strided_slice %42 {offsets = [0, 64], sizes = [8, 32], strides = [1, 1]} : vector<8x128xf32> to vector<8x32xf32>
    %51 = arith.mulf %49, %50 : vector<8x32xf32>
    %52 = arith.addf %48, %51 : vector<8x32xf32>
    %53 = vector.extract_strided_slice %46 {offsets = [0, 96], sizes = [8, 32], strides = [1, 1]} : vector<8x128xf32> to vector<8x32xf32>
    %54 = math.tanh %52 : vector<8x32xf32>
    %55 = arith.mulf %53, %54 : vector<8x32xf32>
    %c0_32 = arith.constant 0 : index
    %c0_33 = arith.constant 0 : index
    %56 = vector.load %arg10[%c0_32, %c0_33] : memref<32x136xf32, #tpu.memory_space<vmem>>, vector<32x136xf32>
    %cst_34 = arith.constant dense<0.000000e+00> : vector<8x136xf32>
    %57 = tpu.matmul %55, %56, %cst_34 {dimension_numbers = #tpu.dot_dimension_numbers<[1], [0], [0], [1], [0, 0, 1, 1], [], []>} : vector<8x32xf32>, vector<32x136xf32>, vector<8x136xf32> -> vector<8x136xf32>
    %58 = vector.extract_strided_slice %37 {offsets = [0, 256], sizes = [8, 8], strides = [1, 1]} : vector<8x264xf32> to vector<8x8xf32>
    %59 = vector.extract_strided_slice %57 {offsets = [0, 128], sizes = [8, 8], strides = [1, 1]} : vector<8x136xf32> to vector<8x8xf32>
    %60 = arith.addf %58, %59 : vector<8x8xf32>
    %61 = vector.broadcast %7 : f32 to vector<8x8xf32>
    %62 = arith.addf %60, %61 : vector<8x8xf32>
    %63 = arith.index_cast %c0_i32 : i32 to index
    %c0_35 = arith.constant 0 : index
    %c0_36 = arith.constant 0 : index
    %64 = vector.load %arg12[%63, %c0_35, %c0_36] : memref<16x8x8xf32, #tpu.memory_space<vmem>>, vector<1x8x8xf32>
    %65 = vector.shape_cast %64 : vector<1x8x8xf32> to vector<8x8xf32>
    %66 = vector.shape_cast %62 : vector<8x8xf32> to vector<1x8x8xf32>
    tpu.vector_store %arg12[%63, %c0_35, %c0_36], %66 {strides = array<i32>} : memref<16x8x8xf32, #tpu.memory_space<vmem>>, vector<1x8x8xf32>,
    %67 = vector.extract_strided_slice %37 {offsets = [0, 0], sizes = [8, 128], strides = [1, 1]} : vector<8x264xf32> to vector<8x128xf32>
    %68 = vector.extract_strided_slice %57 {offsets = [0, 0], sizes = [8, 128], strides = [1, 1]} : vector<8x136xf32> to vector<8x128xf32>
    %c1_i32 = arith.constant 1 : i32
    %c8_i32_37 = arith.constant 8 : i32
    %69 = arith.muli %c1_i32, %c8_i32_37 : i32
    %70 = tpu.assume_multiple %69, 8 : i32
    %71 = arith.index_cast %70 : i32 to index
    %c0_38 = arith.constant 0 : index
    %72 = vector.load %arg17[%71, %c0_38] : memref<128x128xf32, #tpu.memory_space<vmem>>, vector<8x128xf32>
    %73 = arith.addf %72, %67 : vector<8x128xf32>
    %74 = math.tanh %73 : vector<8x128xf32>
    %cst_39 = arith.constant 5.000000e-01 : f32
    %75 = vector.broadcast %cst_39 : f32 to vector<8x128xf32>
    %76 = arith.mulf %75, %74 : vector<8x128xf32>
    %cst_40 = arith.constant 5.000000e-01 : f32
    %77 = vector.broadcast %cst_40 : f32 to vector<8x128xf32>
    %78 = arith.addf %76, %77 : vector<8x128xf32>
    %79 = vector.extract_strided_slice %78 {offsets = [0, 32], sizes = [8, 32], strides = [1, 1]} : vector<8x128xf32> to vector<8x32xf32>
    %80 = arith.mulf %79, %32 : vector<8x32xf32>
    %81 = vector.extract_strided_slice %78 {offsets = [0, 0], sizes = [8, 32], strides = [1, 1]} : vector<8x128xf32> to vector<8x32xf32>
    %82 = vector.extract_strided_slice %74 {offsets = [0, 64], sizes = [8, 32], strides = [1, 1]} : vector<8x128xf32> to vector<8x32xf32>
    %83 = arith.mulf %81, %82 : vector<8x32xf32>
    %84 = arith.addf %80, %83 : vector<8x32xf32>
    %85 = vector.extract_strided_slice %78 {offsets = [0, 96], sizes = [8, 32], strides = [1, 1]} : vector<8x128xf32> to vector<8x32xf32>
    %86 = math.tanh %84 : vector<8x32xf32>
    %87 = arith.mulf %85, %86 : vector<8x32xf32>
    %c0_41 = arith.constant 0 : index
    %c0_42 = arith.constant 0 : index
    %88 = vector.load %arg8[%c0_41, %c0_42] : memref<32x264xf32, #tpu.memory_space<vmem>>, vector<32x264xf32>
    %cst_43 = arith.constant dense<0.000000e+00> : vector<8x264xf32>
    %89 = tpu.matmul %87, %88, %cst_43 {dimension_numbers = #tpu.dot_dimension_numbers<[1], [0], [0], [1], [0, 0, 1, 1], [], []>} : vector<8x32xf32>, vector<32x264xf32>, vector<8x264xf32> -> vector<8x264xf32>
    %90 = vector.extract_strided_slice %89 {offsets = [0, 128], sizes = [8, 128], strides = [1, 1]} : vector<8x264xf32> to vector<8x128xf32>
    %91 = arith.addf %90, %68 : vector<8x128xf32>
    %92 = vector.broadcast %8 : vector<1x128xf32> to vector<8x128xf32>
    %93 = arith.addf %91, %92 : vector<8x128xf32>
    %94 = math.tanh %93 : vector<8x128xf32>
    %cst_44 = arith.constant 5.000000e-01 : f32
    %95 = vector.broadcast %cst_44 : f32 to vector<8x128xf32>
    %96 = arith.mulf %95, %94 : vector<8x128xf32>
    %cst_45 = arith.constant 5.000000e-01 : f32
    %97 = vector.broadcast %cst_45 : f32 to vector<8x128xf32>
    %98 = arith.addf %96, %97 : vector<8x128xf32>
    %99 = vector.extract_strided_slice %98 {offsets = [0, 32], sizes = [8, 32], strides = [1, 1]} : vector<8x128xf32> to vector<8x32xf32>
    %100 = arith.mulf %99, %52 : vector<8x32xf32>
    %101 = vector.extract_strided_slice %98 {offsets = [0, 0], sizes = [8, 32], strides = [1, 1]} : vector<8x128xf32> to vector<8x32xf32>
    %102 = vector.extract_strided_slice %94 {offsets = [0, 64], sizes = [8, 32], strides = [1, 1]} : vector<8x128xf32> to vector<8x32xf32>
    %103 = arith.mulf %101, %102 : vector<8x32xf32>
    %104 = arith.addf %100, %103 : vector<8x32xf32>
    %105 = vector.extract_strided_slice %98 {offsets = [0, 96], sizes = [8, 32], strides = [1, 1]} : vector<8x128xf32> to vector<8x32xf32>
    %106 = math.tanh %104 : vector<8x32xf32>
    %107 = arith.mulf %105, %106 : vector<8x32xf32>
    %c0_46 = arith.constant 0 : index
    %c0_47 = arith.constant 0 : index
    %108 = vector.load %arg10[%c0_46, %c0_47] : memref<32x136xf32, #tpu.memory_space<vmem>>, vector<32x136xf32>
    %cst_48 = arith.constant dense<0.000000e+00> : vector<8x136xf32>
    %109 = tpu.matmul %107, %108, %cst_48 {dimension_numbers = #tpu.dot_dimension_numbers<[1], [0], [0], [1], [0, 0, 1, 1], [], []>} : vector<8x32xf32>, vector<32x136xf32>, vector<8x136xf32> -> vector<8x136xf32>
    %110 = vector.extract_strided_slice %89 {offsets = [0, 256], sizes = [8, 8], strides = [1, 1]} : vector<8x264xf32> to vector<8x8xf32>
    %111 = vector.extract_strided_slice %109 {offsets = [0, 128], sizes = [8, 8], strides = [1, 1]} : vector<8x136xf32> to vector<8x8xf32>
    %112 = arith.addf %110, %111 : vector<8x8xf32>
    %113 = vector.broadcast %7 : f32 to vector<8x8xf32>
    %114 = arith.addf %112, %113 : vector<8x8xf32>
    %115 = arith.index_cast %c1_i32 : i32 to index
    %c0_49 = arith.constant 0 : index
    %c0_50 = arith.constant 0 : index
    %116 = vector.load %arg12[%115, %c0_49, %c0_50] : memref<16x8x8xf32, #tpu.memory_space<vmem>>, vector<1x8x8xf32>
    %117 = vector.shape_cast %116 : vector<1x8x8xf32> to vector<8x8xf32>
    %118 = vector.shape_cast %114 : vector<8x8xf32> to vector<1x8x8xf32>
    tpu.vector_store %arg12[%115, %c0_49, %c0_50], %118 {strides = array<i32>} : memref<16x8x8xf32, #tpu.memory_space<vmem>>, vector<1x8x8xf32>,
    %119 = vector.extract_strided_slice %89 {offsets = [0, 0], sizes = [8, 128], strides = [1, 1]} : vector<8x264xf32> to vector<8x128xf32>
    %120 = vector.extract_strided_slice %109 {offsets = [0, 0], sizes = [8, 128], strides = [1, 1]} : vector<8x136xf32> to vector<8x128xf32>
    %c2_i32 = arith.constant 2 : i32
    %c8_i32_51 = arith.constant 8 : i32
    %121 = arith.muli %c2_i32, %c8_i32_51 : i32
    %122 = tpu.assume_multiple %121, 8 : i32
    %123 = arith.index_cast %122 : i32 to index
    %c0_52 = arith.constant 0 : index
    %124 = vector.load %arg17[%123, %c0_52] : memref<128x128xf32, #tpu.memory_space<vmem>>, vector<8x128xf32>
    %125 = arith.addf %124, %119 : vector<8x128xf32>
    %126 = math.tanh %125 : vector<8x128xf32>
    %cst_53 = arith.constant 5.000000e-01 : f32
    %127 = vector.broadcast %cst_53 : f32 to vector<8x128xf32>
    %128 = arith.mulf %127, %126 : vector<8x128xf32>
    %cst_54 = arith.constant 5.000000e-01 : f32
    %129 = vector.broadcast %cst_54 : f32 to vector<8x128xf32>
    %130 = arith.addf %128, %129 : vector<8x128xf32>
    %131 = vector.extract_strided_slice %130 {offsets = [0, 32], sizes = [8, 32], strides = [1, 1]} : vector<8x128xf32> to vector<8x32xf32>
    %132 = arith.mulf %131, %84 : vector<8x32xf32>
    %133 = vector.extract_strided_slice %130 {offsets = [0, 0], sizes = [8, 32], strides = [1, 1]} : vector<8x128xf32> to vector<8x32xf32>
    %134 = vector.extract_strided_slice %126 {offsets = [0, 64], sizes = [8, 32], strides = [1, 1]} : vector<8x128xf32> to vector<8x32xf32>
    %135 = arith.mulf %133, %134 : vector<8x32xf32>
    %136 = arith.addf %132, %135 : vector<8x32xf32>
    %137 = vector.extract_strided_slice %130 {offsets = [0, 96], sizes = [8, 32], strides = [1, 1]} : vector<8x128xf32> to vector<8x32xf32>
    %138 = math.tanh %136 : vector<8x32xf32>
    %139 = arith.mulf %137, %138 : vector<8x32xf32>
    %c0_55 = arith.constant 0 : index
    %c0_56 = arith.constant 0 : index
    %140 = vector.load %arg8[%c0_55, %c0_56] : memref<32x264xf32, #tpu.memory_space<vmem>>, vector<32x264xf32>
    %cst_57 = arith.constant dense<0.000000e+00> : vector<8x264xf32>
    %141 = tpu.matmul %139, %140, %cst_57 {dimension_numbers = #tpu.dot_dimension_numbers<[1], [0], [0], [1], [0, 0, 1, 1], [], []>} : vector<8x32xf32>, vector<32x264xf32>, vector<8x264xf32> -> vector<8x264xf32>
    %142 = vector.extract_strided_slice %141 {offsets = [0, 128], sizes = [8, 128], strides = [1, 1]} : vector<8x264xf32> to vector<8x128xf32>
    %143 = arith.addf %142, %120 : vector<8x128xf32>
    %144 = vector.broadcast %8 : vector<1x128xf32> to vector<8x128xf32>
    %145 = arith.addf %143, %144 : vector<8x128xf32>
    %146 = math.tanh %145 : vector<8x128xf32>
    %cst_58 = arith.constant 5.000000e-01 : f32
    %147 = vector.broadcast %cst_58 : f32 to vector<8x128xf32>
    %148 = arith.mulf %147, %146 : vector<8x128xf32>
    %cst_59 = arith.constant 5.000000e-01 : f32
    %149 = vector.broadcast %cst_59 : f32 to vector<8x128xf32>
    %150 = arith.addf %148, %149 : vector<8x128xf32>
    %151 = vector.extract_strided_slice %150 {offsets = [0, 32], sizes = [8, 32], strides = [1, 1]} : vector<8x128xf32> to vector<8x32xf32>
    %152 = arith.mulf %151, %104 : vector<8x32xf32>
    %153 = vector.extract_strided_slice %150 {offsets = [0, 0], sizes = [8, 32], strides = [1, 1]} : vector<8x128xf32> to vector<8x32xf32>
    %154 = vector.extract_strided_slice %146 {offsets = [0, 64], sizes = [8, 32], strides = [1, 1]} : vector<8x128xf32> to vector<8x32xf32>
    %155 = arith.mulf %153, %154 : vector<8x32xf32>
    %156 = arith.addf %152, %155 : vector<8x32xf32>
    %157 = vector.extract_strided_slice %150 {offsets = [0, 96], sizes = [8, 32], strides = [1, 1]} : vector<8x128xf32> to vector<8x32xf32>
    %158 = math.tanh %156 : vector<8x32xf32>
    %159 = arith.mulf %157, %158 : vector<8x32xf32>
    %c0_60 = arith.constant 0 : index
    %c0_61 = arith.constant 0 : index
    %160 = vector.load %arg10[%c0_60, %c0_61] : memref<32x136xf32, #tpu.memory_space<vmem>>, vector<32x136xf32>
    %cst_62 = arith.constant dense<0.000000e+00> : vector<8x136xf32>
    %161 = tpu.matmul %159, %160, %cst_62 {dimension_numbers = #tpu.dot_dimension_numbers<[1], [0], [0], [1], [0, 0, 1, 1], [], []>} : vector<8x32xf32>, vector<32x136xf32>, vector<8x136xf32> -> vector<8x136xf32>
    %162 = vector.extract_strided_slice %141 {offsets = [0, 256], sizes = [8, 8], strides = [1, 1]} : vector<8x264xf32> to vector<8x8xf32>
    %163 = vector.extract_strided_slice %161 {offsets = [0, 128], sizes = [8, 8], strides = [1, 1]} : vector<8x136xf32> to vector<8x8xf32>
    %164 = arith.addf %162, %163 : vector<8x8xf32>
    %165 = vector.broadcast %7 : f32 to vector<8x8xf32>
    %166 = arith.addf %164, %165 : vector<8x8xf32>
    %167 = arith.index_cast %c2_i32 : i32 to index
    %c0_63 = arith.constant 0 : index
    %c0_64 = arith.constant 0 : index
    %168 = vector.load %arg12[%167, %c0_63, %c0_64] : memref<16x8x8xf32, #tpu.memory_space<vmem>>, vector<1x8x8xf32>
    %169 = vector.shape_cast %168 : vector<1x8x8xf32> to vector<8x8xf32>
    %170 = vector.shape_cast %166 : vector<8x8xf32> to vector<1x8x8xf32>
    tpu.vector_store %arg12[%167, %c0_63, %c0_64], %170 {strides = array<i32>} : memref<16x8x8xf32, #tpu.memory_space<vmem>>, vector<1x8x8xf32>,
    %171 = vector.extract_strided_slice %141 {offsets = [0, 0], sizes = [8, 128], strides = [1, 1]} : vector<8x264xf32> to vector<8x128xf32>
    %172 = vector.extract_strided_slice %161 {offsets = [0, 0], sizes = [8, 128], strides = [1, 1]} : vector<8x136xf32> to vector<8x128xf32>
    %c3_i32 = arith.constant 3 : i32
    %c8_i32_65 = arith.constant 8 : i32
    %173 = arith.muli %c3_i32, %c8_i32_65 : i32
    %174 = tpu.assume_multiple %173, 8 : i32
    %175 = arith.index_cast %174 : i32 to index
    %c0_66 = arith.constant 0 : index
    %176 = vector.load %arg17[%175, %c0_66] : memref<128x128xf32, #tpu.memory_space<vmem>>, vector<8x128xf32>
    %177 = arith.addf %176, %171 : vector<8x128xf32>
    %178 = math.tanh %177 : vector<8x128xf32>
    %cst_67 = arith.constant 5.000000e-01 : f32
    %179 = vector.broadcast %cst_67 : f32 to vector<8x128xf32>
    %180 = arith.mulf %179, %178 : vector<8x128xf32>
    %cst_68 = arith.constant 5.000000e-01 : f32
    %181 = vector.broadcast %cst_68 : f32 to vector<8x128xf32>
    %182 = arith.addf %180, %181 : vector<8x128xf32>
    %183 = vector.extract_strided_slice %182 {offsets = [0, 32], sizes = [8, 32], strides = [1, 1]} : vector<8x128xf32> to vector<8x32xf32>
    %184 = arith.mulf %183, %136 : vector<8x32xf32>
    %185 = vector.extract_strided_slice %182 {offsets = [0, 0], sizes = [8, 32], strides = [1, 1]} : vector<8x128xf32> to vector<8x32xf32>
    %186 = vector.extract_strided_slice %178 {offsets = [0, 64], sizes = [8, 32], strides = [1, 1]} : vector<8x128xf32> to vector<8x32xf32>
    %187 = arith.mulf %185, %186 : vector<8x32xf32>
    %188 = arith.addf %184, %187 : vector<8x32xf32>
    %189 = vector.extract_strided_slice %182 {offsets = [0, 96], sizes = [8, 32], strides = [1, 1]} : vector<8x128xf32> to vector<8x32xf32>
    %190 = math.tanh %188 : vector<8x32xf32>
    %191 = arith.mulf %189, %190 : vector<8x32xf32>
    %c0_69 = arith.constant 0 : index
    %c0_70 = arith.constant 0 : index
    %192 = vector.load %arg8[%c0_69, %c0_70] : memref<32x264xf32, #tpu.memory_space<vmem>>, vector<32x264xf32>
    %cst_71 = arith.constant dense<0.000000e+00> : vector<8x264xf32>
    %193 = tpu.matmul %191, %192, %cst_71 {dimension_numbers = #tpu.dot_dimension_numbers<[1], [0], [0], [1], [0, 0, 1, 1], [], []>} : vector<8x32xf32>, vector<32x264xf32>, vector<8x264xf32> -> vector<8x264xf32>
    %194 = vector.extract_strided_slice %193 {offsets = [0, 128], sizes = [8, 128], strides = [1, 1]} : vector<8x264xf32> to vector<8x128xf32>
    %195 = arith.addf %194, %172 : vector<8x128xf32>
    %196 = vector.broadcast %8 : vector<1x128xf32> to vector<8x128xf32>
    %197 = arith.addf %195, %196 : vector<8x128xf32>
    %198 = math.tanh %197 : vector<8x128xf32>
    %cst_72 = arith.constant 5.000000e-01 : f32
    %199 = vector.broadcast %cst_72 : f32 to vector<8x128xf32>
    %200 = arith.mulf %199, %198 : vector<8x128xf32>
    %cst_73 = arith.constant 5.000000e-01 : f32
    %201 = vector.broadcast %cst_73 : f32 to vector<8x128xf32>
    %202 = arith.addf %200, %201 : vector<8x128xf32>
    %203 = vector.extract_strided_slice %202 {offsets = [0, 32], sizes = [8, 32], strides = [1, 1]} : vector<8x128xf32> to vector<8x32xf32>
    %204 = arith.mulf %203, %156 : vector<8x32xf32>
    %205 = vector.extract_strided_slice %202 {offsets = [0, 0], sizes = [8, 32], strides = [1, 1]} : vector<8x128xf32> to vector<8x32xf32>
    %206 = vector.extract_strided_slice %198 {offsets = [0, 64], sizes = [8, 32], strides = [1, 1]} : vector<8x128xf32> to vector<8x32xf32>
    %207 = arith.mulf %205, %206 : vector<8x32xf32>
    %208 = arith.addf %204, %207 : vector<8x32xf32>
    %209 = vector.extract_strided_slice %202 {offsets = [0, 96], sizes = [8, 32], strides = [1, 1]} : vector<8x128xf32> to vector<8x32xf32>
    %210 = math.tanh %208 : vector<8x32xf32>
    %211 = arith.mulf %209, %210 : vector<8x32xf32>
    %c0_74 = arith.constant 0 : index
    %c0_75 = arith.constant 0 : index
    %212 = vector.load %arg10[%c0_74, %c0_75] : memref<32x136xf32, #tpu.memory_space<vmem>>, vector<32x136xf32>
    %cst_76 = arith.constant dense<0.000000e+00> : vector<8x136xf32>
    %213 = tpu.matmul %211, %212, %cst_76 {dimension_numbers = #tpu.dot_dimension_numbers<[1], [0], [0], [1], [0, 0, 1, 1], [], []>} : vector<8x32xf32>, vector<32x136xf32>, vector<8x136xf32> -> vector<8x136xf32>
    %214 = vector.extract_strided_slice %193 {offsets = [0, 256], sizes = [8, 8], strides = [1, 1]} : vector<8x264xf32> to vector<8x8xf32>
    %215 = vector.extract_strided_slice %213 {offsets = [0, 128], sizes = [8, 8], strides = [1, 1]} : vector<8x136xf32> to vector<8x8xf32>
    %216 = arith.addf %214, %215 : vector<8x8xf32>
    %217 = vector.broadcast %7 : f32 to vector<8x8xf32>
    %218 = arith.addf %216, %217 : vector<8x8xf32>
    %219 = arith.index_cast %c3_i32 : i32 to index
    %c0_77 = arith.constant 0 : index
    %c0_78 = arith.constant 0 : index
    %220 = vector.load %arg12[%219, %c0_77, %c0_78] : memref<16x8x8xf32, #tpu.memory_space<vmem>>, vector<1x8x8xf32>
    %221 = vector.shape_cast %220 : vector<1x8x8xf32> to vector<8x8xf32>
    %222 = vector.shape_cast %218 : vector<8x8xf32> to vector<1x8x8xf32>
    tpu.vector_store %arg12[%219, %c0_77, %c0_78], %222 {strides = array<i32>} : memref<16x8x8xf32, #tpu.memory_space<vmem>>, vector<1x8x8xf32>,
    %223 = vector.extract_strided_slice %193 {offsets = [0, 0], sizes = [8, 128], strides = [1, 1]} : vector<8x264xf32> to vector<8x128xf32>
    %224 = vector.extract_strided_slice %213 {offsets = [0, 0], sizes = [8, 128], strides = [1, 1]} : vector<8x136xf32> to vector<8x128xf32>
    %c4_i32 = arith.constant 4 : i32
    %c8_i32_79 = arith.constant 8 : i32
    %225 = arith.muli %c4_i32, %c8_i32_79 : i32
    %226 = tpu.assume_multiple %225, 8 : i32
    %227 = arith.index_cast %226 : i32 to index
    %c0_80 = arith.constant 0 : index
    %228 = vector.load %arg17[%227, %c0_80] : memref<128x128xf32, #tpu.memory_space<vmem>>, vector<8x128xf32>
    %229 = arith.addf %228, %223 : vector<8x128xf32>
    %230 = math.tanh %229 : vector<8x128xf32>
    %cst_81 = arith.constant 5.000000e-01 : f32
    %231 = vector.broadcast %cst_81 : f32 to vector<8x128xf32>
    %232 = arith.mulf %231, %230 : vector<8x128xf32>
    %cst_82 = arith.constant 5.000000e-01 : f32
    %233 = vector.broadcast %cst_82 : f32 to vector<8x128xf32>
    %234 = arith.addf %232, %233 : vector<8x128xf32>
    %235 = vector.extract_strided_slice %234 {offsets = [0, 32], sizes = [8, 32], strides = [1, 1]} : vector<8x128xf32> to vector<8x32xf32>
    %236 = arith.mulf %235, %188 : vector<8x32xf32>
    %237 = vector.extract_strided_slice %234 {offsets = [0, 0], sizes = [8, 32], strides = [1, 1]} : vector<8x128xf32> to vector<8x32xf32>
    %238 = vector.extract_strided_slice %230 {offsets = [0, 64], sizes = [8, 32], strides = [1, 1]} : vector<8x128xf32> to vector<8x32xf32>
    %239 = arith.mulf %237, %238 : vector<8x32xf32>
    %240 = arith.addf %236, %239 : vector<8x32xf32>
    %241 = vector.extract_strided_slice %234 {offsets = [0, 96], sizes = [8, 32], strides = [1, 1]} : vector<8x128xf32> to vector<8x32xf32>
    %242 = math.tanh %240 : vector<8x32xf32>
    %243 = arith.mulf %241, %242 : vector<8x32xf32>
    %c0_83 = arith.constant 0 : index
    %c0_84 = arith.constant 0 : index
    %244 = vector.load %arg8[%c0_83, %c0_84] : memref<32x264xf32, #tpu.memory_space<vmem>>, vector<32x264xf32>
    %cst_85 = arith.constant dense<0.000000e+00> : vector<8x264xf32>
    %245 = tpu.matmul %243, %244, %cst_85 {dimension_numbers = #tpu.dot_dimension_numbers<[1], [0], [0], [1], [0, 0, 1, 1], [], []>} : vector<8x32xf32>, vector<32x264xf32>, vector<8x264xf32> -> vector<8x264xf32>
    %246 = vector.extract_strided_slice %245 {offsets = [0, 128], sizes = [8, 128], strides = [1, 1]} : vector<8x264xf32> to vector<8x128xf32>
    %247 = arith.addf %246, %224 : vector<8x128xf32>
    %248 = vector.broadcast %8 : vector<1x128xf32> to vector<8x128xf32>
    %249 = arith.addf %247, %248 : vector<8x128xf32>
    %250 = math.tanh %249 : vector<8x128xf32>
    %cst_86 = arith.constant 5.000000e-01 : f32
    %251 = vector.broadcast %cst_86 : f32 to vector<8x128xf32>
    %252 = arith.mulf %251, %250 : vector<8x128xf32>
    %cst_87 = arith.constant 5.000000e-01 : f32
    %253 = vector.broadcast %cst_87 : f32 to vector<8x128xf32>
    %254 = arith.addf %252, %253 : vector<8x128xf32>
    %255 = vector.extract_strided_slice %254 {offsets = [0, 32], sizes = [8, 32], strides = [1, 1]} : vector<8x128xf32> to vector<8x32xf32>
    %256 = arith.mulf %255, %208 : vector<8x32xf32>
    %257 = vector.extract_strided_slice %254 {offsets = [0, 0], sizes = [8, 32], strides = [1, 1]} : vector<8x128xf32> to vector<8x32xf32>
    %258 = vector.extract_strided_slice %250 {offsets = [0, 64], sizes = [8, 32], strides = [1, 1]} : vector<8x128xf32> to vector<8x32xf32>
    %259 = arith.mulf %257, %258 : vector<8x32xf32>
    %260 = arith.addf %256, %259 : vector<8x32xf32>
    %261 = vector.extract_strided_slice %254 {offsets = [0, 96], sizes = [8, 32], strides = [1, 1]} : vector<8x128xf32> to vector<8x32xf32>
    %262 = math.tanh %260 : vector<8x32xf32>
    %263 = arith.mulf %261, %262 : vector<8x32xf32>
    %c0_88 = arith.constant 0 : index
    %c0_89 = arith.constant 0 : index
    %264 = vector.load %arg10[%c0_88, %c0_89] : memref<32x136xf32, #tpu.memory_space<vmem>>, vector<32x136xf32>
    %cst_90 = arith.constant dense<0.000000e+00> : vector<8x136xf32>
    %265 = tpu.matmul %263, %264, %cst_90 {dimension_numbers = #tpu.dot_dimension_numbers<[1], [0], [0], [1], [0, 0, 1, 1], [], []>} : vector<8x32xf32>, vector<32x136xf32>, vector<8x136xf32> -> vector<8x136xf32>
    %266 = vector.extract_strided_slice %245 {offsets = [0, 256], sizes = [8, 8], strides = [1, 1]} : vector<8x264xf32> to vector<8x8xf32>
    %267 = vector.extract_strided_slice %265 {offsets = [0, 128], sizes = [8, 8], strides = [1, 1]} : vector<8x136xf32> to vector<8x8xf32>
    %268 = arith.addf %266, %267 : vector<8x8xf32>
    %269 = vector.broadcast %7 : f32 to vector<8x8xf32>
    %270 = arith.addf %268, %269 : vector<8x8xf32>
    %271 = arith.index_cast %c4_i32 : i32 to index
    %c0_91 = arith.constant 0 : index
    %c0_92 = arith.constant 0 : index
    %272 = vector.load %arg12[%271, %c0_91, %c0_92] : memref<16x8x8xf32, #tpu.memory_space<vmem>>, vector<1x8x8xf32>
    %273 = vector.shape_cast %272 : vector<1x8x8xf32> to vector<8x8xf32>
    %274 = vector.shape_cast %270 : vector<8x8xf32> to vector<1x8x8xf32>
    tpu.vector_store %arg12[%271, %c0_91, %c0_92], %274 {strides = array<i32>} : memref<16x8x8xf32, #tpu.memory_space<vmem>>, vector<1x8x8xf32>,
    %275 = vector.extract_strided_slice %245 {offsets = [0, 0], sizes = [8, 128], strides = [1, 1]} : vector<8x264xf32> to vector<8x128xf32>
    %276 = vector.extract_strided_slice %265 {offsets = [0, 0], sizes = [8, 128], strides = [1, 1]} : vector<8x136xf32> to vector<8x128xf32>
    %c5_i32 = arith.constant 5 : i32
    %c8_i32_93 = arith.constant 8 : i32
    %277 = arith.muli %c5_i32, %c8_i32_93 : i32
    %278 = tpu.assume_multiple %277, 8 : i32
    %279 = arith.index_cast %278 : i32 to index
    %c0_94 = arith.constant 0 : index
    %280 = vector.load %arg17[%279, %c0_94] : memref<128x128xf32, #tpu.memory_space<vmem>>, vector<8x128xf32>
    %281 = arith.addf %280, %275 : vector<8x128xf32>
    %282 = math.tanh %281 : vector<8x128xf32>
    %cst_95 = arith.constant 5.000000e-01 : f32
    %283 = vector.broadcast %cst_95 : f32 to vector<8x128xf32>
    %284 = arith.mulf %283, %282 : vector<8x128xf32>
    %cst_96 = arith.constant 5.000000e-01 : f32
    %285 = vector.broadcast %cst_96 : f32 to vector<8x128xf32>
    %286 = arith.addf %284, %285 : vector<8x128xf32>
    %287 = vector.extract_strided_slice %286 {offsets = [0, 32], sizes = [8, 32], strides = [1, 1]} : vector<8x128xf32> to vector<8x32xf32>
    %288 = arith.mulf %287, %240 : vector<8x32xf32>
    %289 = vector.extract_strided_slice %286 {offsets = [0, 0], sizes = [8, 32], strides = [1, 1]} : vector<8x128xf32> to vector<8x32xf32>
    %290 = vector.extract_strided_slice %282 {offsets = [0, 64], sizes = [8, 32], strides = [1, 1]} : vector<8x128xf32> to vector<8x32xf32>
    %291 = arith.mulf %289, %290 : vector<8x32xf32>
    %292 = arith.addf %288, %291 : vector<8x32xf32>
    %293 = vector.extract_strided_slice %286 {offsets = [0, 96], sizes = [8, 32], strides = [1, 1]} : vector<8x128xf32> to vector<8x32xf32>
    %294 = math.tanh %292 : vector<8x32xf32>
    %295 = arith.mulf %293, %294 : vector<8x32xf32>
    %c0_97 = arith.constant 0 : index
    %c0_98 = arith.constant 0 : index
    %296 = vector.load %arg8[%c0_97, %c0_98] : memref<32x264xf32, #tpu.memory_space<vmem>>, vector<32x264xf32>
    %cst_99 = arith.constant dense<0.000000e+00> : vector<8x264xf32>
    %297 = tpu.matmul %295, %296, %cst_99 {dimension_numbers = #tpu.dot_dimension_numbers<[1], [0], [0], [1], [0, 0, 1, 1], [], []>} : vector<8x32xf32>, vector<32x264xf32>, vector<8x264xf32> -> vector<8x264xf32>
    %298 = vector.extract_strided_slice %297 {offsets = [0, 128], sizes = [8, 128], strides = [1, 1]} : vector<8x264xf32> to vector<8x128xf32>
    %299 = arith.addf %298, %276 : vector<8x128xf32>
    %300 = vector.broadcast %8 : vector<1x128xf32> to vector<8x128xf32>
    %301 = arith.addf %299, %300 : vector<8x128xf32>
    %302 = math.tanh %301 : vector<8x128xf32>
    %cst_100 = arith.constant 5.000000e-01 : f32
    %303 = vector.broadcast %cst_100 : f32 to vector<8x128xf32>
    %304 = arith.mulf %303, %302 : vector<8x128xf32>
    %cst_101 = arith.constant 5.000000e-01 : f32
    %305 = vector.broadcast %cst_101 : f32 to vector<8x128xf32>
    %306 = arith.addf %304, %305 : vector<8x128xf32>
    %307 = vector.extract_strided_slice %306 {offsets = [0, 32], sizes = [8, 32], strides = [1, 1]} : vector<8x128xf32> to vector<8x32xf32>
    %308 = arith.mulf %307, %260 : vector<8x32xf32>
    %309 = vector.extract_strided_slice %306 {offsets = [0, 0], sizes = [8, 32], strides = [1, 1]} : vector<8x128xf32> to vector<8x32xf32>
    %310 = vector.extract_strided_slice %302 {offsets = [0, 64], sizes = [8, 32], strides = [1, 1]} : vector<8x128xf32> to vector<8x32xf32>
    %311 = arith.mulf %309, %310 : vector<8x32xf32>
    %312 = arith.addf %308, %311 : vector<8x32xf32>
    %313 = vector.extract_strided_slice %306 {offsets = [0, 96], sizes = [8, 32], strides = [1, 1]} : vector<8x128xf32> to vector<8x32xf32>
    %314 = math.tanh %312 : vector<8x32xf32>
    %315 = arith.mulf %313, %314 : vector<8x32xf32>
    %c0_102 = arith.constant 0 : index
    %c0_103 = arith.constant 0 : index
    %316 = vector.load %arg10[%c0_102, %c0_103] : memref<32x136xf32, #tpu.memory_space<vmem>>, vector<32x136xf32>
    %cst_104 = arith.constant dense<0.000000e+00> : vector<8x136xf32>
    %317 = tpu.matmul %315, %316, %cst_104 {dimension_numbers = #tpu.dot_dimension_numbers<[1], [0], [0], [1], [0, 0, 1, 1], [], []>} : vector<8x32xf32>, vector<32x136xf32>, vector<8x136xf32> -> vector<8x136xf32>
    %318 = vector.extract_strided_slice %297 {offsets = [0, 256], sizes = [8, 8], strides = [1, 1]} : vector<8x264xf32> to vector<8x8xf32>
    %319 = vector.extract_strided_slice %317 {offsets = [0, 128], sizes = [8, 8], strides = [1, 1]} : vector<8x136xf32> to vector<8x8xf32>
    %320 = arith.addf %318, %319 : vector<8x8xf32>
    %321 = vector.broadcast %7 : f32 to vector<8x8xf32>
    %322 = arith.addf %320, %321 : vector<8x8xf32>
    %323 = arith.index_cast %c5_i32 : i32 to index
    %c0_105 = arith.constant 0 : index
    %c0_106 = arith.constant 0 : index
    %324 = vector.load %arg12[%323, %c0_105, %c0_106] : memref<16x8x8xf32, #tpu.memory_space<vmem>>, vector<1x8x8xf32>
    %325 = vector.shape_cast %324 : vector<1x8x8xf32> to vector<8x8xf32>
    %326 = vector.shape_cast %322 : vector<8x8xf32> to vector<1x8x8xf32>
    tpu.vector_store %arg12[%323, %c0_105, %c0_106], %326 {strides = array<i32>} : memref<16x8x8xf32, #tpu.memory_space<vmem>>, vector<1x8x8xf32>,
    %327 = vector.extract_strided_slice %297 {offsets = [0, 0], sizes = [8, 128], strides = [1, 1]} : vector<8x264xf32> to vector<8x128xf32>
    %328 = vector.extract_strided_slice %317 {offsets = [0, 0], sizes = [8, 128], strides = [1, 1]} : vector<8x136xf32> to vector<8x128xf32>
    %c6_i32 = arith.constant 6 : i32
    %c8_i32_107 = arith.constant 8 : i32
    %329 = arith.muli %c6_i32, %c8_i32_107 : i32
    %330 = tpu.assume_multiple %329, 8 : i32
    %331 = arith.index_cast %330 : i32 to index
    %c0_108 = arith.constant 0 : index
    %332 = vector.load %arg17[%331, %c0_108] : memref<128x128xf32, #tpu.memory_space<vmem>>, vector<8x128xf32>
    %333 = arith.addf %332, %327 : vector<8x128xf32>
    %334 = math.tanh %333 : vector<8x128xf32>
    %cst_109 = arith.constant 5.000000e-01 : f32
    %335 = vector.broadcast %cst_109 : f32 to vector<8x128xf32>
    %336 = arith.mulf %335, %334 : vector<8x128xf32>
    %cst_110 = arith.constant 5.000000e-01 : f32
    %337 = vector.broadcast %cst_110 : f32 to vector<8x128xf32>
    %338 = arith.addf %336, %337 : vector<8x128xf32>
    %339 = vector.extract_strided_slice %338 {offsets = [0, 32], sizes = [8, 32], strides = [1, 1]} : vector<8x128xf32> to vector<8x32xf32>
    %340 = arith.mulf %339, %292 : vector<8x32xf32>
    %341 = vector.extract_strided_slice %338 {offsets = [0, 0], sizes = [8, 32], strides = [1, 1]} : vector<8x128xf32> to vector<8x32xf32>
    %342 = vector.extract_strided_slice %334 {offsets = [0, 64], sizes = [8, 32], strides = [1, 1]} : vector<8x128xf32> to vector<8x32xf32>
    %343 = arith.mulf %341, %342 : vector<8x32xf32>
    %344 = arith.addf %340, %343 : vector<8x32xf32>
    %345 = vector.extract_strided_slice %338 {offsets = [0, 96], sizes = [8, 32], strides = [1, 1]} : vector<8x128xf32> to vector<8x32xf32>
    %346 = math.tanh %344 : vector<8x32xf32>
    %347 = arith.mulf %345, %346 : vector<8x32xf32>
    %c0_111 = arith.constant 0 : index
    %c0_112 = arith.constant 0 : index
    %348 = vector.load %arg8[%c0_111, %c0_112] : memref<32x264xf32, #tpu.memory_space<vmem>>, vector<32x264xf32>
    %cst_113 = arith.constant dense<0.000000e+00> : vector<8x264xf32>
    %349 = tpu.matmul %347, %348, %cst_113 {dimension_numbers = #tpu.dot_dimension_numbers<[1], [0], [0], [1], [0, 0, 1, 1], [], []>} : vector<8x32xf32>, vector<32x264xf32>, vector<8x264xf32> -> vector<8x264xf32>
    %350 = vector.extract_strided_slice %349 {offsets = [0, 128], sizes = [8, 128], strides = [1, 1]} : vector<8x264xf32> to vector<8x128xf32>
    %351 = arith.addf %350, %328 : vector<8x128xf32>
    %352 = vector.broadcast %8 : vector<1x128xf32> to vector<8x128xf32>
    %353 = arith.addf %351, %352 : vector<8x128xf32>
    %354 = math.tanh %353 : vector<8x128xf32>
    %cst_114 = arith.constant 5.000000e-01 : f32
    %355 = vector.broadcast %cst_114 : f32 to vector<8x128xf32>
    %356 = arith.mulf %355, %354 : vector<8x128xf32>
    %cst_115 = arith.constant 5.000000e-01 : f32
    %357 = vector.broadcast %cst_115 : f32 to vector<8x128xf32>
    %358 = arith.addf %356, %357 : vector<8x128xf32>
    %359 = vector.extract_strided_slice %358 {offsets = [0, 32], sizes = [8, 32], strides = [1, 1]} : vector<8x128xf32> to vector<8x32xf32>
    %360 = arith.mulf %359, %312 : vector<8x32xf32>
    %361 = vector.extract_strided_slice %358 {offsets = [0, 0], sizes = [8, 32], strides = [1, 1]} : vector<8x128xf32> to vector<8x32xf32>
    %362 = vector.extract_strided_slice %354 {offsets = [0, 64], sizes = [8, 32], strides = [1, 1]} : vector<8x128xf32> to vector<8x32xf32>
    %363 = arith.mulf %361, %362 : vector<8x32xf32>
    %364 = arith.addf %360, %363 : vector<8x32xf32>
    %365 = vector.extract_strided_slice %358 {offsets = [0, 96], sizes = [8, 32], strides = [1, 1]} : vector<8x128xf32> to vector<8x32xf32>
    %366 = math.tanh %364 : vector<8x32xf32>
    %367 = arith.mulf %365, %366 : vector<8x32xf32>
    %c0_116 = arith.constant 0 : index
    %c0_117 = arith.constant 0 : index
    %368 = vector.load %arg10[%c0_116, %c0_117] : memref<32x136xf32, #tpu.memory_space<vmem>>, vector<32x136xf32>
    %cst_118 = arith.constant dense<0.000000e+00> : vector<8x136xf32>
    %369 = tpu.matmul %367, %368, %cst_118 {dimension_numbers = #tpu.dot_dimension_numbers<[1], [0], [0], [1], [0, 0, 1, 1], [], []>} : vector<8x32xf32>, vector<32x136xf32>, vector<8x136xf32> -> vector<8x136xf32>
    %370 = vector.extract_strided_slice %349 {offsets = [0, 256], sizes = [8, 8], strides = [1, 1]} : vector<8x264xf32> to vector<8x8xf32>
    %371 = vector.extract_strided_slice %369 {offsets = [0, 128], sizes = [8, 8], strides = [1, 1]} : vector<8x136xf32> to vector<8x8xf32>
    %372 = arith.addf %370, %371 : vector<8x8xf32>
    %373 = vector.broadcast %7 : f32 to vector<8x8xf32>
    %374 = arith.addf %372, %373 : vector<8x8xf32>
    %375 = arith.index_cast %c6_i32 : i32 to index
    %c0_119 = arith.constant 0 : index
    %c0_120 = arith.constant 0 : index
    %376 = vector.load %arg12[%375, %c0_119, %c0_120] : memref<16x8x8xf32, #tpu.memory_space<vmem>>, vector<1x8x8xf32>
    %377 = vector.shape_cast %376 : vector<1x8x8xf32> to vector<8x8xf32>
    %378 = vector.shape_cast %374 : vector<8x8xf32> to vector<1x8x8xf32>
    tpu.vector_store %arg12[%375, %c0_119, %c0_120], %378 {strides = array<i32>} : memref<16x8x8xf32, #tpu.memory_space<vmem>>, vector<1x8x8xf32>,
    %379 = vector.extract_strided_slice %349 {offsets = [0, 0], sizes = [8, 128], strides = [1, 1]} : vector<8x264xf32> to vector<8x128xf32>
    %380 = vector.extract_strided_slice %369 {offsets = [0, 0], sizes = [8, 128], strides = [1, 1]} : vector<8x136xf32> to vector<8x128xf32>
    %c7_i32 = arith.constant 7 : i32
    %c8_i32_121 = arith.constant 8 : i32
    %381 = arith.muli %c7_i32, %c8_i32_121 : i32
    %382 = tpu.assume_multiple %381, 8 : i32
    %383 = arith.index_cast %382 : i32 to index
    %c0_122 = arith.constant 0 : index
    %384 = vector.load %arg17[%383, %c0_122] : memref<128x128xf32, #tpu.memory_space<vmem>>, vector<8x128xf32>
    %385 = arith.addf %384, %379 : vector<8x128xf32>
    %386 = math.tanh %385 : vector<8x128xf32>
    %cst_123 = arith.constant 5.000000e-01 : f32
    %387 = vector.broadcast %cst_123 : f32 to vector<8x128xf32>
    %388 = arith.mulf %387, %386 : vector<8x128xf32>
    %cst_124 = arith.constant 5.000000e-01 : f32
    %389 = vector.broadcast %cst_124 : f32 to vector<8x128xf32>
    %390 = arith.addf %388, %389 : vector<8x128xf32>
    %391 = vector.extract_strided_slice %390 {offsets = [0, 32], sizes = [8, 32], strides = [1, 1]} : vector<8x128xf32> to vector<8x32xf32>
    %392 = arith.mulf %391, %344 : vector<8x32xf32>
    %393 = vector.extract_strided_slice %390 {offsets = [0, 0], sizes = [8, 32], strides = [1, 1]} : vector<8x128xf32> to vector<8x32xf32>
    %394 = vector.extract_strided_slice %386 {offsets = [0, 64], sizes = [8, 32], strides = [1, 1]} : vector<8x128xf32> to vector<8x32xf32>
    %395 = arith.mulf %393, %394 : vector<8x32xf32>
    %396 = arith.addf %392, %395 : vector<8x32xf32>
    %397 = vector.extract_strided_slice %390 {offsets = [0, 96], sizes = [8, 32], strides = [1, 1]} : vector<8x128xf32> to vector<8x32xf32>
    %398 = math.tanh %396 : vector<8x32xf32>
    %399 = arith.mulf %397, %398 : vector<8x32xf32>
    %c0_125 = arith.constant 0 : index
    %c0_126 = arith.constant 0 : index
    %400 = vector.load %arg8[%c0_125, %c0_126] : memref<32x264xf32, #tpu.memory_space<vmem>>, vector<32x264xf32>
    %cst_127 = arith.constant dense<0.000000e+00> : vector<8x264xf32>
    %401 = tpu.matmul %399, %400, %cst_127 {dimension_numbers = #tpu.dot_dimension_numbers<[1], [0], [0], [1], [0, 0, 1, 1], [], []>} : vector<8x32xf32>, vector<32x264xf32>, vector<8x264xf32> -> vector<8x264xf32>
    %402 = vector.extract_strided_slice %401 {offsets = [0, 128], sizes = [8, 128], strides = [1, 1]} : vector<8x264xf32> to vector<8x128xf32>
    %403 = arith.addf %402, %380 : vector<8x128xf32>
    %404 = vector.broadcast %8 : vector<1x128xf32> to vector<8x128xf32>
    %405 = arith.addf %403, %404 : vector<8x128xf32>
    %406 = math.tanh %405 : vector<8x128xf32>
    %cst_128 = arith.constant 5.000000e-01 : f32
    %407 = vector.broadcast %cst_128 : f32 to vector<8x128xf32>
    %408 = arith.mulf %407, %406 : vector<8x128xf32>
    %cst_129 = arith.constant 5.000000e-01 : f32
    %409 = vector.broadcast %cst_129 : f32 to vector<8x128xf32>
    %410 = arith.addf %408, %409 : vector<8x128xf32>
    %411 = vector.extract_strided_slice %410 {offsets = [0, 32], sizes = [8, 32], strides = [1, 1]} : vector<8x128xf32> to vector<8x32xf32>
    %412 = arith.mulf %411, %364 : vector<8x32xf32>
    %413 = vector.extract_strided_slice %410 {offsets = [0, 0], sizes = [8, 32], strides = [1, 1]} : vector<8x128xf32> to vector<8x32xf32>
    %414 = vector.extract_strided_slice %406 {offsets = [0, 64], sizes = [8, 32], strides = [1, 1]} : vector<8x128xf32> to vector<8x32xf32>
    %415 = arith.mulf %413, %414 : vector<8x32xf32>
    %416 = arith.addf %412, %415 : vector<8x32xf32>
    %417 = vector.extract_strided_slice %410 {offsets = [0, 96], sizes = [8, 32], strides = [1, 1]} : vector<8x128xf32> to vector<8x32xf32>
    %418 = math.tanh %416 : vector<8x32xf32>
    %419 = arith.mulf %417, %418 : vector<8x32xf32>
    %c0_130 = arith.constant 0 : index
    %c0_131 = arith.constant 0 : index
    %420 = vector.load %arg10[%c0_130, %c0_131] : memref<32x136xf32, #tpu.memory_space<vmem>>, vector<32x136xf32>
    %cst_132 = arith.constant dense<0.000000e+00> : vector<8x136xf32>
    %421 = tpu.matmul %419, %420, %cst_132 {dimension_numbers = #tpu.dot_dimension_numbers<[1], [0], [0], [1], [0, 0, 1, 1], [], []>} : vector<8x32xf32>, vector<32x136xf32>, vector<8x136xf32> -> vector<8x136xf32>
    %422 = vector.extract_strided_slice %401 {offsets = [0, 256], sizes = [8, 8], strides = [1, 1]} : vector<8x264xf32> to vector<8x8xf32>
    %423 = vector.extract_strided_slice %421 {offsets = [0, 128], sizes = [8, 8], strides = [1, 1]} : vector<8x136xf32> to vector<8x8xf32>
    %424 = arith.addf %422, %423 : vector<8x8xf32>
    %425 = vector.broadcast %7 : f32 to vector<8x8xf32>
    %426 = arith.addf %424, %425 : vector<8x8xf32>
    %427 = arith.index_cast %c7_i32 : i32 to index
    %c0_133 = arith.constant 0 : index
    %c0_134 = arith.constant 0 : index
    %428 = vector.load %arg12[%427, %c0_133, %c0_134] : memref<16x8x8xf32, #tpu.memory_space<vmem>>, vector<1x8x8xf32>
    %429 = vector.shape_cast %428 : vector<1x8x8xf32> to vector<8x8xf32>
    %430 = vector.shape_cast %426 : vector<8x8xf32> to vector<1x8x8xf32>
    tpu.vector_store %arg12[%427, %c0_133, %c0_134], %430 {strides = array<i32>} : memref<16x8x8xf32, #tpu.memory_space<vmem>>, vector<1x8x8xf32>,
    %431 = vector.extract_strided_slice %401 {offsets = [0, 0], sizes = [8, 128], strides = [1, 1]} : vector<8x264xf32> to vector<8x128xf32>
    %432 = vector.extract_strided_slice %421 {offsets = [0, 0], sizes = [8, 128], strides = [1, 1]} : vector<8x136xf32> to vector<8x128xf32>
    %c8_i32_135 = arith.constant 8 : i32
    %c8_i32_136 = arith.constant 8 : i32
    %433 = arith.muli %c8_i32_135, %c8_i32_136 : i32
    %434 = tpu.assume_multiple %433, 8 : i32
    %435 = arith.index_cast %434 : i32 to index
    %c0_137 = arith.constant 0 : index
    %436 = vector.load %arg17[%435, %c0_137] : memref<128x128xf32, #tpu.memory_space<vmem>>, vector<8x128xf32>
    %437 = arith.addf %436, %431 : vector<8x128xf32>
    %438 = math.tanh %437 : vector<8x128xf32>
    %cst_138 = arith.constant 5.000000e-01 : f32
    %439 = vector.broadcast %cst_138 : f32 to vector<8x128xf32>
    %440 = arith.mulf %439, %438 : vector<8x128xf32>
    %cst_139 = arith.constant 5.000000e-01 : f32
    %441 = vector.broadcast %cst_139 : f32 to vector<8x128xf32>
    %442 = arith.addf %440, %441 : vector<8x128xf32>
    %443 = vector.extract_strided_slice %442 {offsets = [0, 32], sizes = [8, 32], strides = [1, 1]} : vector<8x128xf32> to vector<8x32xf32>
    %444 = arith.mulf %443, %396 : vector<8x32xf32>
    %445 = vector.extract_strided_slice %442 {offsets = [0, 0], sizes = [8, 32], strides = [1, 1]} : vector<8x128xf32> to vector<8x32xf32>
    %446 = vector.extract_strided_slice %438 {offsets = [0, 64], sizes = [8, 32], strides = [1, 1]} : vector<8x128xf32> to vector<8x32xf32>
    %447 = arith.mulf %445, %446 : vector<8x32xf32>
    %448 = arith.addf %444, %447 : vector<8x32xf32>
    %449 = vector.extract_strided_slice %442 {offsets = [0, 96], sizes = [8, 32], strides = [1, 1]} : vector<8x128xf32> to vector<8x32xf32>
    %450 = math.tanh %448 : vector<8x32xf32>
    %451 = arith.mulf %449, %450 : vector<8x32xf32>
    %c0_140 = arith.constant 0 : index
    %c0_141 = arith.constant 0 : index
    %452 = vector.load %arg8[%c0_140, %c0_141] : memref<32x264xf32, #tpu.memory_space<vmem>>, vector<32x264xf32>
    %cst_142 = arith.constant dense<0.000000e+00> : vector<8x264xf32>
    %453 = tpu.matmul %451, %452, %cst_142 {dimension_numbers = #tpu.dot_dimension_numbers<[1], [0], [0], [1], [0, 0, 1, 1], [], []>} : vector<8x32xf32>, vector<32x264xf32>, vector<8x264xf32> -> vector<8x264xf32>
    %454 = vector.extract_strided_slice %453 {offsets = [0, 128], sizes = [8, 128], strides = [1, 1]} : vector<8x264xf32> to vector<8x128xf32>
    %455 = arith.addf %454, %432 : vector<8x128xf32>
    %456 = vector.broadcast %8 : vector<1x128xf32> to vector<8x128xf32>
    %457 = arith.addf %455, %456 : vector<8x128xf32>
    %458 = math.tanh %457 : vector<8x128xf32>
    %cst_143 = arith.constant 5.000000e-01 : f32
    %459 = vector.broadcast %cst_143 : f32 to vector<8x128xf32>
    %460 = arith.mulf %459, %458 : vector<8x128xf32>
    %cst_144 = arith.constant 5.000000e-01 : f32
    %461 = vector.broadcast %cst_144 : f32 to vector<8x128xf32>
    %462 = arith.addf %460, %461 : vector<8x128xf32>
    %463 = vector.extract_strided_slice %462 {offsets = [0, 32], sizes = [8, 32], strides = [1, 1]} : vector<8x128xf32> to vector<8x32xf32>
    %464 = arith.mulf %463, %416 : vector<8x32xf32>
    %465 = vector.extract_strided_slice %462 {offsets = [0, 0], sizes = [8, 32], strides = [1, 1]} : vector<8x128xf32> to vector<8x32xf32>
    %466 = vector.extract_strided_slice %458 {offsets = [0, 64], sizes = [8, 32], strides = [1, 1]} : vector<8x128xf32> to vector<8x32xf32>
    %467 = arith.mulf %465, %466 : vector<8x32xf32>
    %468 = arith.addf %464, %467 : vector<8x32xf32>
    %469 = vector.extract_strided_slice %462 {offsets = [0, 96], sizes = [8, 32], strides = [1, 1]} : vector<8x128xf32> to vector<8x32xf32>
    %470 = math.tanh %468 : vector<8x32xf32>
    %471 = arith.mulf %469, %470 : vector<8x32xf32>
    %c0_145 = arith.constant 0 : index
    %c0_146 = arith.constant 0 : index
    %472 = vector.load %arg10[%c0_145, %c0_146] : memref<32x136xf32, #tpu.memory_space<vmem>>, vector<32x136xf32>
    %cst_147 = arith.constant dense<0.000000e+00> : vector<8x136xf32>
    %473 = tpu.matmul %471, %472, %cst_147 {dimension_numbers = #tpu.dot_dimension_numbers<[1], [0], [0], [1], [0, 0, 1, 1], [], []>} : vector<8x32xf32>, vector<32x136xf32>, vector<8x136xf32> -> vector<8x136xf32>
    %474 = vector.extract_strided_slice %453 {offsets = [0, 256], sizes = [8, 8], strides = [1, 1]} : vector<8x264xf32> to vector<8x8xf32>
    %475 = vector.extract_strided_slice %473 {offsets = [0, 128], sizes = [8, 8], strides = [1, 1]} : vector<8x136xf32> to vector<8x8xf32>
    %476 = arith.addf %474, %475 : vector<8x8xf32>
    %477 = vector.broadcast %7 : f32 to vector<8x8xf32>
    %478 = arith.addf %476, %477 : vector<8x8xf32>
    %479 = arith.index_cast %c8_i32_135 : i32 to index
    %c0_148 = arith.constant 0 : index
    %c0_149 = arith.constant 0 : index
    %480 = vector.load %arg12[%479, %c0_148, %c0_149] : memref<16x8x8xf32, #tpu.memory_space<vmem>>, vector<1x8x8xf32>
    %481 = vector.shape_cast %480 : vector<1x8x8xf32> to vector<8x8xf32>
    %482 = vector.shape_cast %478 : vector<8x8xf32> to vector<1x8x8xf32>
    tpu.vector_store %arg12[%479, %c0_148, %c0_149], %482 {strides = array<i32>} : memref<16x8x8xf32, #tpu.memory_space<vmem>>, vector<1x8x8xf32>,
    %483 = vector.extract_strided_slice %453 {offsets = [0, 0], sizes = [8, 128], strides = [1, 1]} : vector<8x264xf32> to vector<8x128xf32>
    %484 = vector.extract_strided_slice %473 {offsets = [0, 0], sizes = [8, 128], strides = [1, 1]} : vector<8x136xf32> to vector<8x128xf32>
    %c9_i32 = arith.constant 9 : i32
    %c8_i32_150 = arith.constant 8 : i32
    %485 = arith.muli %c9_i32, %c8_i32_150 : i32
    %486 = tpu.assume_multiple %485, 8 : i32
    %487 = arith.index_cast %486 : i32 to index
    %c0_151 = arith.constant 0 : index
    %488 = vector.load %arg17[%487, %c0_151] : memref<128x128xf32, #tpu.memory_space<vmem>>, vector<8x128xf32>
    %489 = arith.addf %488, %483 : vector<8x128xf32>
    %490 = math.tanh %489 : vector<8x128xf32>
    %cst_152 = arith.constant 5.000000e-01 : f32
    %491 = vector.broadcast %cst_152 : f32 to vector<8x128xf32>
    %492 = arith.mulf %491, %490 : vector<8x128xf32>
    %cst_153 = arith.constant 5.000000e-01 : f32
    %493 = vector.broadcast %cst_153 : f32 to vector<8x128xf32>
    %494 = arith.addf %492, %493 : vector<8x128xf32>
    %495 = vector.extract_strided_slice %494 {offsets = [0, 32], sizes = [8, 32], strides = [1, 1]} : vector<8x128xf32> to vector<8x32xf32>
    %496 = arith.mulf %495, %448 : vector<8x32xf32>
    %497 = vector.extract_strided_slice %494 {offsets = [0, 0], sizes = [8, 32], strides = [1, 1]} : vector<8x128xf32> to vector<8x32xf32>
    %498 = vector.extract_strided_slice %490 {offsets = [0, 64], sizes = [8, 32], strides = [1, 1]} : vector<8x128xf32> to vector<8x32xf32>
    %499 = arith.mulf %497, %498 : vector<8x32xf32>
    %500 = arith.addf %496, %499 : vector<8x32xf32>
    %501 = vector.extract_strided_slice %494 {offsets = [0, 96], sizes = [8, 32], strides = [1, 1]} : vector<8x128xf32> to vector<8x32xf32>
    %502 = math.tanh %500 : vector<8x32xf32>
    %503 = arith.mulf %501, %502 : vector<8x32xf32>
    %c0_154 = arith.constant 0 : index
    %c0_155 = arith.constant 0 : index
    %504 = vector.load %arg8[%c0_154, %c0_155] : memref<32x264xf32, #tpu.memory_space<vmem>>, vector<32x264xf32>
    %cst_156 = arith.constant dense<0.000000e+00> : vector<8x264xf32>
    %505 = tpu.matmul %503, %504, %cst_156 {dimension_numbers = #tpu.dot_dimension_numbers<[1], [0], [0], [1], [0, 0, 1, 1], [], []>} : vector<8x32xf32>, vector<32x264xf32>, vector<8x264xf32> -> vector<8x264xf32>
    %506 = vector.extract_strided_slice %505 {offsets = [0, 128], sizes = [8, 128], strides = [1, 1]} : vector<8x264xf32> to vector<8x128xf32>
    %507 = arith.addf %506, %484 : vector<8x128xf32>
    %508 = vector.broadcast %8 : vector<1x128xf32> to vector<8x128xf32>
    %509 = arith.addf %507, %508 : vector<8x128xf32>
    %510 = math.tanh %509 : vector<8x128xf32>
    %cst_157 = arith.constant 5.000000e-01 : f32
    %511 = vector.broadcast %cst_157 : f32 to vector<8x128xf32>
    %512 = arith.mulf %511, %510 : vector<8x128xf32>
    %cst_158 = arith.constant 5.000000e-01 : f32
    %513 = vector.broadcast %cst_158 : f32 to vector<8x128xf32>
    %514 = arith.addf %512, %513 : vector<8x128xf32>
    %515 = vector.extract_strided_slice %514 {offsets = [0, 32], sizes = [8, 32], strides = [1, 1]} : vector<8x128xf32> to vector<8x32xf32>
    %516 = arith.mulf %515, %468 : vector<8x32xf32>
    %517 = vector.extract_strided_slice %514 {offsets = [0, 0], sizes = [8, 32], strides = [1, 1]} : vector<8x128xf32> to vector<8x32xf32>
    %518 = vector.extract_strided_slice %510 {offsets = [0, 64], sizes = [8, 32], strides = [1, 1]} : vector<8x128xf32> to vector<8x32xf32>
    %519 = arith.mulf %517, %518 : vector<8x32xf32>
    %520 = arith.addf %516, %519 : vector<8x32xf32>
    %521 = vector.extract_strided_slice %514 {offsets = [0, 96], sizes = [8, 32], strides = [1, 1]} : vector<8x128xf32> to vector<8x32xf32>
    %522 = math.tanh %520 : vector<8x32xf32>
    %523 = arith.mulf %521, %522 : vector<8x32xf32>
    %c0_159 = arith.constant 0 : index
    %c0_160 = arith.constant 0 : index
    %524 = vector.load %arg10[%c0_159, %c0_160] : memref<32x136xf32, #tpu.memory_space<vmem>>, vector<32x136xf32>
    %cst_161 = arith.constant dense<0.000000e+00> : vector<8x136xf32>
    %525 = tpu.matmul %523, %524, %cst_161 {dimension_numbers = #tpu.dot_dimension_numbers<[1], [0], [0], [1], [0, 0, 1, 1], [], []>} : vector<8x32xf32>, vector<32x136xf32>, vector<8x136xf32> -> vector<8x136xf32>
    %526 = vector.extract_strided_slice %505 {offsets = [0, 256], sizes = [8, 8], strides = [1, 1]} : vector<8x264xf32> to vector<8x8xf32>
    %527 = vector.extract_strided_slice %525 {offsets = [0, 128], sizes = [8, 8], strides = [1, 1]} : vector<8x136xf32> to vector<8x8xf32>
    %528 = arith.addf %526, %527 : vector<8x8xf32>
    %529 = vector.broadcast %7 : f32 to vector<8x8xf32>
    %530 = arith.addf %528, %529 : vector<8x8xf32>
    %531 = arith.index_cast %c9_i32 : i32 to index
    %c0_162 = arith.constant 0 : index
    %c0_163 = arith.constant 0 : index
    %532 = vector.load %arg12[%531, %c0_162, %c0_163] : memref<16x8x8xf32, #tpu.memory_space<vmem>>, vector<1x8x8xf32>
    %533 = vector.shape_cast %532 : vector<1x8x8xf32> to vector<8x8xf32>
    %534 = vector.shape_cast %530 : vector<8x8xf32> to vector<1x8x8xf32>
    tpu.vector_store %arg12[%531, %c0_162, %c0_163], %534 {strides = array<i32>} : memref<16x8x8xf32, #tpu.memory_space<vmem>>, vector<1x8x8xf32>,
    %535 = vector.extract_strided_slice %505 {offsets = [0, 0], sizes = [8, 128], strides = [1, 1]} : vector<8x264xf32> to vector<8x128xf32>
    %536 = vector.extract_strided_slice %525 {offsets = [0, 0], sizes = [8, 128], strides = [1, 1]} : vector<8x136xf32> to vector<8x128xf32>
    %c10_i32 = arith.constant 10 : i32
    %c8_i32_164 = arith.constant 8 : i32
    %537 = arith.muli %c10_i32, %c8_i32_164 : i32
    %538 = tpu.assume_multiple %537, 8 : i32
    %539 = arith.index_cast %538 : i32 to index
    %c0_165 = arith.constant 0 : index
    %540 = vector.load %arg17[%539, %c0_165] : memref<128x128xf32, #tpu.memory_space<vmem>>, vector<8x128xf32>
    %541 = arith.addf %540, %535 : vector<8x128xf32>
    %542 = math.tanh %541 : vector<8x128xf32>
    %cst_166 = arith.constant 5.000000e-01 : f32
    %543 = vector.broadcast %cst_166 : f32 to vector<8x128xf32>
    %544 = arith.mulf %543, %542 : vector<8x128xf32>
    %cst_167 = arith.constant 5.000000e-01 : f32
    %545 = vector.broadcast %cst_167 : f32 to vector<8x128xf32>
    %546 = arith.addf %544, %545 : vector<8x128xf32>
    %547 = vector.extract_strided_slice %546 {offsets = [0, 32], sizes = [8, 32], strides = [1, 1]} : vector<8x128xf32> to vector<8x32xf32>
    %548 = arith.mulf %547, %500 : vector<8x32xf32>
    %549 = vector.extract_strided_slice %546 {offsets = [0, 0], sizes = [8, 32], strides = [1, 1]} : vector<8x128xf32> to vector<8x32xf32>
    %550 = vector.extract_strided_slice %542 {offsets = [0, 64], sizes = [8, 32], strides = [1, 1]} : vector<8x128xf32> to vector<8x32xf32>
    %551 = arith.mulf %549, %550 : vector<8x32xf32>
    %552 = arith.addf %548, %551 : vector<8x32xf32>
    %553 = vector.extract_strided_slice %546 {offsets = [0, 96], sizes = [8, 32], strides = [1, 1]} : vector<8x128xf32> to vector<8x32xf32>
    %554 = math.tanh %552 : vector<8x32xf32>
    %555 = arith.mulf %553, %554 : vector<8x32xf32>
    %c0_168 = arith.constant 0 : index
    %c0_169 = arith.constant 0 : index
    %556 = vector.load %arg8[%c0_168, %c0_169] : memref<32x264xf32, #tpu.memory_space<vmem>>, vector<32x264xf32>
    %cst_170 = arith.constant dense<0.000000e+00> : vector<8x264xf32>
    %557 = tpu.matmul %555, %556, %cst_170 {dimension_numbers = #tpu.dot_dimension_numbers<[1], [0], [0], [1], [0, 0, 1, 1], [], []>} : vector<8x32xf32>, vector<32x264xf32>, vector<8x264xf32> -> vector<8x264xf32>
    %558 = vector.extract_strided_slice %557 {offsets = [0, 128], sizes = [8, 128], strides = [1, 1]} : vector<8x264xf32> to vector<8x128xf32>
    %559 = arith.addf %558, %536 : vector<8x128xf32>
    %560 = vector.broadcast %8 : vector<1x128xf32> to vector<8x128xf32>
    %561 = arith.addf %559, %560 : vector<8x128xf32>
    %562 = math.tanh %561 : vector<8x128xf32>
    %cst_171 = arith.constant 5.000000e-01 : f32
    %563 = vector.broadcast %cst_171 : f32 to vector<8x128xf32>
    %564 = arith.mulf %563, %562 : vector<8x128xf32>
    %cst_172 = arith.constant 5.000000e-01 : f32
    %565 = vector.broadcast %cst_172 : f32 to vector<8x128xf32>
    %566 = arith.addf %564, %565 : vector<8x128xf32>
    %567 = vector.extract_strided_slice %566 {offsets = [0, 32], sizes = [8, 32], strides = [1, 1]} : vector<8x128xf32> to vector<8x32xf32>
    %568 = arith.mulf %567, %520 : vector<8x32xf32>
    %569 = vector.extract_strided_slice %566 {offsets = [0, 0], sizes = [8, 32], strides = [1, 1]} : vector<8x128xf32> to vector<8x32xf32>
    %570 = vector.extract_strided_slice %562 {offsets = [0, 64], sizes = [8, 32], strides = [1, 1]} : vector<8x128xf32> to vector<8x32xf32>
    %571 = arith.mulf %569, %570 : vector<8x32xf32>
    %572 = arith.addf %568, %571 : vector<8x32xf32>
    %573 = vector.extract_strided_slice %566 {offsets = [0, 96], sizes = [8, 32], strides = [1, 1]} : vector<8x128xf32> to vector<8x32xf32>
    %574 = math.tanh %572 : vector<8x32xf32>
    %575 = arith.mulf %573, %574 : vector<8x32xf32>
    %c0_173 = arith.constant 0 : index
    %c0_174 = arith.constant 0 : index
    %576 = vector.load %arg10[%c0_173, %c0_174] : memref<32x136xf32, #tpu.memory_space<vmem>>, vector<32x136xf32>
    %cst_175 = arith.constant dense<0.000000e+00> : vector<8x136xf32>
    %577 = tpu.matmul %575, %576, %cst_175 {dimension_numbers = #tpu.dot_dimension_numbers<[1], [0], [0], [1], [0, 0, 1, 1], [], []>} : vector<8x32xf32>, vector<32x136xf32>, vector<8x136xf32> -> vector<8x136xf32>
    %578 = vector.extract_strided_slice %557 {offsets = [0, 256], sizes = [8, 8], strides = [1, 1]} : vector<8x264xf32> to vector<8x8xf32>
    %579 = vector.extract_strided_slice %577 {offsets = [0, 128], sizes = [8, 8], strides = [1, 1]} : vector<8x136xf32> to vector<8x8xf32>
    %580 = arith.addf %578, %579 : vector<8x8xf32>
    %581 = vector.broadcast %7 : f32 to vector<8x8xf32>
    %582 = arith.addf %580, %581 : vector<8x8xf32>
    %583 = arith.index_cast %c10_i32 : i32 to index
    %c0_176 = arith.constant 0 : index
    %c0_177 = arith.constant 0 : index
    %584 = vector.load %arg12[%583, %c0_176, %c0_177] : memref<16x8x8xf32, #tpu.memory_space<vmem>>, vector<1x8x8xf32>
    %585 = vector.shape_cast %584 : vector<1x8x8xf32> to vector<8x8xf32>
    %586 = vector.shape_cast %582 : vector<8x8xf32> to vector<1x8x8xf32>
    tpu.vector_store %arg12[%583, %c0_176, %c0_177], %586 {strides = array<i32>} : memref<16x8x8xf32, #tpu.memory_space<vmem>>, vector<1x8x8xf32>,
    %587 = vector.extract_strided_slice %557 {offsets = [0, 0], sizes = [8, 128], strides = [1, 1]} : vector<8x264xf32> to vector<8x128xf32>
    %588 = vector.extract_strided_slice %577 {offsets = [0, 0], sizes = [8, 128], strides = [1, 1]} : vector<8x136xf32> to vector<8x128xf32>
    %c11_i32 = arith.constant 11 : i32
    %c8_i32_178 = arith.constant 8 : i32
    %589 = arith.muli %c11_i32, %c8_i32_178 : i32
    %590 = tpu.assume_multiple %589, 8 : i32
    %591 = arith.index_cast %590 : i32 to index
    %c0_179 = arith.constant 0 : index
    %592 = vector.load %arg17[%591, %c0_179] : memref<128x128xf32, #tpu.memory_space<vmem>>, vector<8x128xf32>
    %593 = arith.addf %592, %587 : vector<8x128xf32>
    %594 = math.tanh %593 : vector<8x128xf32>
    %cst_180 = arith.constant 5.000000e-01 : f32
    %595 = vector.broadcast %cst_180 : f32 to vector<8x128xf32>
    %596 = arith.mulf %595, %594 : vector<8x128xf32>
    %cst_181 = arith.constant 5.000000e-01 : f32
    %597 = vector.broadcast %cst_181 : f32 to vector<8x128xf32>
    %598 = arith.addf %596, %597 : vector<8x128xf32>
    %599 = vector.extract_strided_slice %598 {offsets = [0, 32], sizes = [8, 32], strides = [1, 1]} : vector<8x128xf32> to vector<8x32xf32>
    %600 = arith.mulf %599, %552 : vector<8x32xf32>
    %601 = vector.extract_strided_slice %598 {offsets = [0, 0], sizes = [8, 32], strides = [1, 1]} : vector<8x128xf32> to vector<8x32xf32>
    %602 = vector.extract_strided_slice %594 {offsets = [0, 64], sizes = [8, 32], strides = [1, 1]} : vector<8x128xf32> to vector<8x32xf32>
    %603 = arith.mulf %601, %602 : vector<8x32xf32>
    %604 = arith.addf %600, %603 : vector<8x32xf32>
    %605 = vector.extract_strided_slice %598 {offsets = [0, 96], sizes = [8, 32], strides = [1, 1]} : vector<8x128xf32> to vector<8x32xf32>
    %606 = math.tanh %604 : vector<8x32xf32>
    %607 = arith.mulf %605, %606 : vector<8x32xf32>
    %c0_182 = arith.constant 0 : index
    %c0_183 = arith.constant 0 : index
    %608 = vector.load %arg8[%c0_182, %c0_183] : memref<32x264xf32, #tpu.memory_space<vmem>>, vector<32x264xf32>
    %cst_184 = arith.constant dense<0.000000e+00> : vector<8x264xf32>
    %609 = tpu.matmul %607, %608, %cst_184 {dimension_numbers = #tpu.dot_dimension_numbers<[1], [0], [0], [1], [0, 0, 1, 1], [], []>} : vector<8x32xf32>, vector<32x264xf32>, vector<8x264xf32> -> vector<8x264xf32>
    %610 = vector.extract_strided_slice %609 {offsets = [0, 128], sizes = [8, 128], strides = [1, 1]} : vector<8x264xf32> to vector<8x128xf32>
    %611 = arith.addf %610, %588 : vector<8x128xf32>
    %612 = vector.broadcast %8 : vector<1x128xf32> to vector<8x128xf32>
    %613 = arith.addf %611, %612 : vector<8x128xf32>
    %614 = math.tanh %613 : vector<8x128xf32>
    %cst_185 = arith.constant 5.000000e-01 : f32
    %615 = vector.broadcast %cst_185 : f32 to vector<8x128xf32>
    %616 = arith.mulf %615, %614 : vector<8x128xf32>
    %cst_186 = arith.constant 5.000000e-01 : f32
    %617 = vector.broadcast %cst_186 : f32 to vector<8x128xf32>
    %618 = arith.addf %616, %617 : vector<8x128xf32>
    %619 = vector.extract_strided_slice %618 {offsets = [0, 32], sizes = [8, 32], strides = [1, 1]} : vector<8x128xf32> to vector<8x32xf32>
    %620 = arith.mulf %619, %572 : vector<8x32xf32>
    %621 = vector.extract_strided_slice %618 {offsets = [0, 0], sizes = [8, 32], strides = [1, 1]} : vector<8x128xf32> to vector<8x32xf32>
    %622 = vector.extract_strided_slice %614 {offsets = [0, 64], sizes = [8, 32], strides = [1, 1]} : vector<8x128xf32> to vector<8x32xf32>
    %623 = arith.mulf %621, %622 : vector<8x32xf32>
    %624 = arith.addf %620, %623 : vector<8x32xf32>
    %625 = vector.extract_strided_slice %618 {offsets = [0, 96], sizes = [8, 32], strides = [1, 1]} : vector<8x128xf32> to vector<8x32xf32>
    %626 = math.tanh %624 : vector<8x32xf32>
    %627 = arith.mulf %625, %626 : vector<8x32xf32>
    %c0_187 = arith.constant 0 : index
    %c0_188 = arith.constant 0 : index
    %628 = vector.load %arg10[%c0_187, %c0_188] : memref<32x136xf32, #tpu.memory_space<vmem>>, vector<32x136xf32>
    %cst_189 = arith.constant dense<0.000000e+00> : vector<8x136xf32>
    %629 = tpu.matmul %627, %628, %cst_189 {dimension_numbers = #tpu.dot_dimension_numbers<[1], [0], [0], [1], [0, 0, 1, 1], [], []>} : vector<8x32xf32>, vector<32x136xf32>, vector<8x136xf32> -> vector<8x136xf32>
    %630 = vector.extract_strided_slice %609 {offsets = [0, 256], sizes = [8, 8], strides = [1, 1]} : vector<8x264xf32> to vector<8x8xf32>
    %631 = vector.extract_strided_slice %629 {offsets = [0, 128], sizes = [8, 8], strides = [1, 1]} : vector<8x136xf32> to vector<8x8xf32>
    %632 = arith.addf %630, %631 : vector<8x8xf32>
    %633 = vector.broadcast %7 : f32 to vector<8x8xf32>
    %634 = arith.addf %632, %633 : vector<8x8xf32>
    %635 = arith.index_cast %c11_i32 : i32 to index
    %c0_190 = arith.constant 0 : index
    %c0_191 = arith.constant 0 : index
    %636 = vector.load %arg12[%635, %c0_190, %c0_191] : memref<16x8x8xf32, #tpu.memory_space<vmem>>, vector<1x8x8xf32>
    %637 = vector.shape_cast %636 : vector<1x8x8xf32> to vector<8x8xf32>
    %638 = vector.shape_cast %634 : vector<8x8xf32> to vector<1x8x8xf32>
    tpu.vector_store %arg12[%635, %c0_190, %c0_191], %638 {strides = array<i32>} : memref<16x8x8xf32, #tpu.memory_space<vmem>>, vector<1x8x8xf32>,
    %639 = vector.extract_strided_slice %609 {offsets = [0, 0], sizes = [8, 128], strides = [1, 1]} : vector<8x264xf32> to vector<8x128xf32>
    %640 = vector.extract_strided_slice %629 {offsets = [0, 0], sizes = [8, 128], strides = [1, 1]} : vector<8x136xf32> to vector<8x128xf32>
    %c12_i32 = arith.constant 12 : i32
    %c8_i32_192 = arith.constant 8 : i32
    %641 = arith.muli %c12_i32, %c8_i32_192 : i32
    %642 = tpu.assume_multiple %641, 8 : i32
    %643 = arith.index_cast %642 : i32 to index
    %c0_193 = arith.constant 0 : index
    %644 = vector.load %arg17[%643, %c0_193] : memref<128x128xf32, #tpu.memory_space<vmem>>, vector<8x128xf32>
    %645 = arith.addf %644, %639 : vector<8x128xf32>
    %646 = math.tanh %645 : vector<8x128xf32>
    %cst_194 = arith.constant 5.000000e-01 : f32
    %647 = vector.broadcast %cst_194 : f32 to vector<8x128xf32>
    %648 = arith.mulf %647, %646 : vector<8x128xf32>
    %cst_195 = arith.constant 5.000000e-01 : f32
    %649 = vector.broadcast %cst_195 : f32 to vector<8x128xf32>
    %650 = arith.addf %648, %649 : vector<8x128xf32>
    %651 = vector.extract_strided_slice %650 {offsets = [0, 32], sizes = [8, 32], strides = [1, 1]} : vector<8x128xf32> to vector<8x32xf32>
    %652 = arith.mulf %651, %604 : vector<8x32xf32>
    %653 = vector.extract_strided_slice %650 {offsets = [0, 0], sizes = [8, 32], strides = [1, 1]} : vector<8x128xf32> to vector<8x32xf32>
    %654 = vector.extract_strided_slice %646 {offsets = [0, 64], sizes = [8, 32], strides = [1, 1]} : vector<8x128xf32> to vector<8x32xf32>
    %655 = arith.mulf %653, %654 : vector<8x32xf32>
    %656 = arith.addf %652, %655 : vector<8x32xf32>
    %657 = vector.extract_strided_slice %650 {offsets = [0, 96], sizes = [8, 32], strides = [1, 1]} : vector<8x128xf32> to vector<8x32xf32>
    %658 = math.tanh %656 : vector<8x32xf32>
    %659 = arith.mulf %657, %658 : vector<8x32xf32>
    %c0_196 = arith.constant 0 : index
    %c0_197 = arith.constant 0 : index
    %660 = vector.load %arg8[%c0_196, %c0_197] : memref<32x264xf32, #tpu.memory_space<vmem>>, vector<32x264xf32>
    %cst_198 = arith.constant dense<0.000000e+00> : vector<8x264xf32>
    %661 = tpu.matmul %659, %660, %cst_198 {dimension_numbers = #tpu.dot_dimension_numbers<[1], [0], [0], [1], [0, 0, 1, 1], [], []>} : vector<8x32xf32>, vector<32x264xf32>, vector<8x264xf32> -> vector<8x264xf32>
    %662 = vector.extract_strided_slice %661 {offsets = [0, 128], sizes = [8, 128], strides = [1, 1]} : vector<8x264xf32> to vector<8x128xf32>
    %663 = arith.addf %662, %640 : vector<8x128xf32>
    %664 = vector.broadcast %8 : vector<1x128xf32> to vector<8x128xf32>
    %665 = arith.addf %663, %664 : vector<8x128xf32>
    %666 = math.tanh %665 : vector<8x128xf32>
    %cst_199 = arith.constant 5.000000e-01 : f32
    %667 = vector.broadcast %cst_199 : f32 to vector<8x128xf32>
    %668 = arith.mulf %667, %666 : vector<8x128xf32>
    %cst_200 = arith.constant 5.000000e-01 : f32
    %669 = vector.broadcast %cst_200 : f32 to vector<8x128xf32>
    %670 = arith.addf %668, %669 : vector<8x128xf32>
    %671 = vector.extract_strided_slice %670 {offsets = [0, 32], sizes = [8, 32], strides = [1, 1]} : vector<8x128xf32> to vector<8x32xf32>
    %672 = arith.mulf %671, %624 : vector<8x32xf32>
    %673 = vector.extract_strided_slice %670 {offsets = [0, 0], sizes = [8, 32], strides = [1, 1]} : vector<8x128xf32> to vector<8x32xf32>
    %674 = vector.extract_strided_slice %666 {offsets = [0, 64], sizes = [8, 32], strides = [1, 1]} : vector<8x128xf32> to vector<8x32xf32>
    %675 = arith.mulf %673, %674 : vector<8x32xf32>
    %676 = arith.addf %672, %675 : vector<8x32xf32>
    %677 = vector.extract_strided_slice %670 {offsets = [0, 96], sizes = [8, 32], strides = [1, 1]} : vector<8x128xf32> to vector<8x32xf32>
    %678 = math.tanh %676 : vector<8x32xf32>
    %679 = arith.mulf %677, %678 : vector<8x32xf32>
    %c0_201 = arith.constant 0 : index
    %c0_202 = arith.constant 0 : index
    %680 = vector.load %arg10[%c0_201, %c0_202] : memref<32x136xf32, #tpu.memory_space<vmem>>, vector<32x136xf32>
    %cst_203 = arith.constant dense<0.000000e+00> : vector<8x136xf32>
    %681 = tpu.matmul %679, %680, %cst_203 {dimension_numbers = #tpu.dot_dimension_numbers<[1], [0], [0], [1], [0, 0, 1, 1], [], []>} : vector<8x32xf32>, vector<32x136xf32>, vector<8x136xf32> -> vector<8x136xf32>
    %682 = vector.extract_strided_slice %661 {offsets = [0, 256], sizes = [8, 8], strides = [1, 1]} : vector<8x264xf32> to vector<8x8xf32>
    %683 = vector.extract_strided_slice %681 {offsets = [0, 128], sizes = [8, 8], strides = [1, 1]} : vector<8x136xf32> to vector<8x8xf32>
    %684 = arith.addf %682, %683 : vector<8x8xf32>
    %685 = vector.broadcast %7 : f32 to vector<8x8xf32>
    %686 = arith.addf %684, %685 : vector<8x8xf32>
    %687 = arith.index_cast %c12_i32 : i32 to index
    %c0_204 = arith.constant 0 : index
    %c0_205 = arith.constant 0 : index
    %688 = vector.load %arg12[%687, %c0_204, %c0_205] : memref<16x8x8xf32, #tpu.memory_space<vmem>>, vector<1x8x8xf32>
    %689 = vector.shape_cast %688 : vector<1x8x8xf32> to vector<8x8xf32>
    %690 = vector.shape_cast %686 : vector<8x8xf32> to vector<1x8x8xf32>
    tpu.vector_store %arg12[%687, %c0_204, %c0_205], %690 {strides = array<i32>} : memref<16x8x8xf32, #tpu.memory_space<vmem>>, vector<1x8x8xf32>,
    %691 = vector.extract_strided_slice %661 {offsets = [0, 0], sizes = [8, 128], strides = [1, 1]} : vector<8x264xf32> to vector<8x128xf32>
    %692 = vector.extract_strided_slice %681 {offsets = [0, 0], sizes = [8, 128], strides = [1, 1]} : vector<8x136xf32> to vector<8x128xf32>
    %c13_i32 = arith.constant 13 : i32
    %c8_i32_206 = arith.constant 8 : i32
    %693 = arith.muli %c13_i32, %c8_i32_206 : i32
    %694 = tpu.assume_multiple %693, 8 : i32
    %695 = arith.index_cast %694 : i32 to index
    %c0_207 = arith.constant 0 : index
    %696 = vector.load %arg17[%695, %c0_207] : memref<128x128xf32, #tpu.memory_space<vmem>>, vector<8x128xf32>
    %697 = arith.addf %696, %691 : vector<8x128xf32>
    %698 = math.tanh %697 : vector<8x128xf32>
    %cst_208 = arith.constant 5.000000e-01 : f32
    %699 = vector.broadcast %cst_208 : f32 to vector<8x128xf32>
    %700 = arith.mulf %699, %698 : vector<8x128xf32>
    %cst_209 = arith.constant 5.000000e-01 : f32
    %701 = vector.broadcast %cst_209 : f32 to vector<8x128xf32>
    %702 = arith.addf %700, %701 : vector<8x128xf32>
    %703 = vector.extract_strided_slice %702 {offsets = [0, 32], sizes = [8, 32], strides = [1, 1]} : vector<8x128xf32> to vector<8x32xf32>
    %704 = arith.mulf %703, %656 : vector<8x32xf32>
    %705 = vector.extract_strided_slice %702 {offsets = [0, 0], sizes = [8, 32], strides = [1, 1]} : vector<8x128xf32> to vector<8x32xf32>
    %706 = vector.extract_strided_slice %698 {offsets = [0, 64], sizes = [8, 32], strides = [1, 1]} : vector<8x128xf32> to vector<8x32xf32>
    %707 = arith.mulf %705, %706 : vector<8x32xf32>
    %708 = arith.addf %704, %707 : vector<8x32xf32>
    %709 = vector.extract_strided_slice %702 {offsets = [0, 96], sizes = [8, 32], strides = [1, 1]} : vector<8x128xf32> to vector<8x32xf32>
    %710 = math.tanh %708 : vector<8x32xf32>
    %711 = arith.mulf %709, %710 : vector<8x32xf32>
    %c0_210 = arith.constant 0 : index
    %c0_211 = arith.constant 0 : index
    %712 = vector.load %arg8[%c0_210, %c0_211] : memref<32x264xf32, #tpu.memory_space<vmem>>, vector<32x264xf32>
    %cst_212 = arith.constant dense<0.000000e+00> : vector<8x264xf32>
    %713 = tpu.matmul %711, %712, %cst_212 {dimension_numbers = #tpu.dot_dimension_numbers<[1], [0], [0], [1], [0, 0, 1, 1], [], []>} : vector<8x32xf32>, vector<32x264xf32>, vector<8x264xf32> -> vector<8x264xf32>
    %714 = vector.extract_strided_slice %713 {offsets = [0, 128], sizes = [8, 128], strides = [1, 1]} : vector<8x264xf32> to vector<8x128xf32>
    %715 = arith.addf %714, %692 : vector<8x128xf32>
    %716 = vector.broadcast %8 : vector<1x128xf32> to vector<8x128xf32>
    %717 = arith.addf %715, %716 : vector<8x128xf32>
    %718 = math.tanh %717 : vector<8x128xf32>
    %cst_213 = arith.constant 5.000000e-01 : f32
    %719 = vector.broadcast %cst_213 : f32 to vector<8x128xf32>
    %720 = arith.mulf %719, %718 : vector<8x128xf32>
    %cst_214 = arith.constant 5.000000e-01 : f32
    %721 = vector.broadcast %cst_214 : f32 to vector<8x128xf32>
    %722 = arith.addf %720, %721 : vector<8x128xf32>
    %723 = vector.extract_strided_slice %722 {offsets = [0, 32], sizes = [8, 32], strides = [1, 1]} : vector<8x128xf32> to vector<8x32xf32>
    %724 = arith.mulf %723, %676 : vector<8x32xf32>
    %725 = vector.extract_strided_slice %722 {offsets = [0, 0], sizes = [8, 32], strides = [1, 1]} : vector<8x128xf32> to vector<8x32xf32>
    %726 = vector.extract_strided_slice %718 {offsets = [0, 64], sizes = [8, 32], strides = [1, 1]} : vector<8x128xf32> to vector<8x32xf32>
    %727 = arith.mulf %725, %726 : vector<8x32xf32>
    %728 = arith.addf %724, %727 : vector<8x32xf32>
    %729 = vector.extract_strided_slice %722 {offsets = [0, 96], sizes = [8, 32], strides = [1, 1]} : vector<8x128xf32> to vector<8x32xf32>
    %730 = math.tanh %728 : vector<8x32xf32>
    %731 = arith.mulf %729, %730 : vector<8x32xf32>
    %c0_215 = arith.constant 0 : index
    %c0_216 = arith.constant 0 : index
    %732 = vector.load %arg10[%c0_215, %c0_216] : memref<32x136xf32, #tpu.memory_space<vmem>>, vector<32x136xf32>
    %cst_217 = arith.constant dense<0.000000e+00> : vector<8x136xf32>
    %733 = tpu.matmul %731, %732, %cst_217 {dimension_numbers = #tpu.dot_dimension_numbers<[1], [0], [0], [1], [0, 0, 1, 1], [], []>} : vector<8x32xf32>, vector<32x136xf32>, vector<8x136xf32> -> vector<8x136xf32>
    %734 = vector.extract_strided_slice %713 {offsets = [0, 256], sizes = [8, 8], strides = [1, 1]} : vector<8x264xf32> to vector<8x8xf32>
    %735 = vector.extract_strided_slice %733 {offsets = [0, 128], sizes = [8, 8], strides = [1, 1]} : vector<8x136xf32> to vector<8x8xf32>
    %736 = arith.addf %734, %735 : vector<8x8xf32>
    %737 = vector.broadcast %7 : f32 to vector<8x8xf32>
    %738 = arith.addf %736, %737 : vector<8x8xf32>
    %739 = arith.index_cast %c13_i32 : i32 to index
    %c0_218 = arith.constant 0 : index
    %c0_219 = arith.constant 0 : index
    %740 = vector.load %arg12[%739, %c0_218, %c0_219] : memref<16x8x8xf32, #tpu.memory_space<vmem>>, vector<1x8x8xf32>
    %741 = vector.shape_cast %740 : vector<1x8x8xf32> to vector<8x8xf32>
    %742 = vector.shape_cast %738 : vector<8x8xf32> to vector<1x8x8xf32>
    tpu.vector_store %arg12[%739, %c0_218, %c0_219], %742 {strides = array<i32>} : memref<16x8x8xf32, #tpu.memory_space<vmem>>, vector<1x8x8xf32>,
    %743 = vector.extract_strided_slice %713 {offsets = [0, 0], sizes = [8, 128], strides = [1, 1]} : vector<8x264xf32> to vector<8x128xf32>
    %744 = vector.extract_strided_slice %733 {offsets = [0, 0], sizes = [8, 128], strides = [1, 1]} : vector<8x136xf32> to vector<8x128xf32>
    %c14_i32 = arith.constant 14 : i32
    %c8_i32_220 = arith.constant 8 : i32
    %745 = arith.muli %c14_i32, %c8_i32_220 : i32
    %746 = tpu.assume_multiple %745, 8 : i32
    %747 = arith.index_cast %746 : i32 to index
    %c0_221 = arith.constant 0 : index
    %748 = vector.load %arg17[%747, %c0_221] : memref<128x128xf32, #tpu.memory_space<vmem>>, vector<8x128xf32>
    %749 = arith.addf %748, %743 : vector<8x128xf32>
    %750 = math.tanh %749 : vector<8x128xf32>
    %cst_222 = arith.constant 5.000000e-01 : f32
    %751 = vector.broadcast %cst_222 : f32 to vector<8x128xf32>
    %752 = arith.mulf %751, %750 : vector<8x128xf32>
    %cst_223 = arith.constant 5.000000e-01 : f32
    %753 = vector.broadcast %cst_223 : f32 to vector<8x128xf32>
    %754 = arith.addf %752, %753 : vector<8x128xf32>
    %755 = vector.extract_strided_slice %754 {offsets = [0, 32], sizes = [8, 32], strides = [1, 1]} : vector<8x128xf32> to vector<8x32xf32>
    %756 = arith.mulf %755, %708 : vector<8x32xf32>
    %757 = vector.extract_strided_slice %754 {offsets = [0, 0], sizes = [8, 32], strides = [1, 1]} : vector<8x128xf32> to vector<8x32xf32>
    %758 = vector.extract_strided_slice %750 {offsets = [0, 64], sizes = [8, 32], strides = [1, 1]} : vector<8x128xf32> to vector<8x32xf32>
    %759 = arith.mulf %757, %758 : vector<8x32xf32>
    %760 = arith.addf %756, %759 : vector<8x32xf32>
    %761 = vector.extract_strided_slice %754 {offsets = [0, 96], sizes = [8, 32], strides = [1, 1]} : vector<8x128xf32> to vector<8x32xf32>
    %762 = math.tanh %760 : vector<8x32xf32>
    %763 = arith.mulf %761, %762 : vector<8x32xf32>
    %c0_224 = arith.constant 0 : index
    %c0_225 = arith.constant 0 : index
    %764 = vector.load %arg8[%c0_224, %c0_225] : memref<32x264xf32, #tpu.memory_space<vmem>>, vector<32x264xf32>
    %cst_226 = arith.constant dense<0.000000e+00> : vector<8x264xf32>
    %765 = tpu.matmul %763, %764, %cst_226 {dimension_numbers = #tpu.dot_dimension_numbers<[1], [0], [0], [1], [0, 0, 1, 1], [], []>} : vector<8x32xf32>, vector<32x264xf32>, vector<8x264xf32> -> vector<8x264xf32>
    %766 = vector.extract_strided_slice %765 {offsets = [0, 128], sizes = [8, 128], strides = [1, 1]} : vector<8x264xf32> to vector<8x128xf32>
    %767 = arith.addf %766, %744 : vector<8x128xf32>
    %768 = vector.broadcast %8 : vector<1x128xf32> to vector<8x128xf32>
    %769 = arith.addf %767, %768 : vector<8x128xf32>
    %770 = math.tanh %769 : vector<8x128xf32>
    %cst_227 = arith.constant 5.000000e-01 : f32
    %771 = vector.broadcast %cst_227 : f32 to vector<8x128xf32>
    %772 = arith.mulf %771, %770 : vector<8x128xf32>
    %cst_228 = arith.constant 5.000000e-01 : f32
    %773 = vector.broadcast %cst_228 : f32 to vector<8x128xf32>
    %774 = arith.addf %772, %773 : vector<8x128xf32>
    %775 = vector.extract_strided_slice %774 {offsets = [0, 32], sizes = [8, 32], strides = [1, 1]} : vector<8x128xf32> to vector<8x32xf32>
    %776 = arith.mulf %775, %728 : vector<8x32xf32>
    %777 = vector.extract_strided_slice %774 {offsets = [0, 0], sizes = [8, 32], strides = [1, 1]} : vector<8x128xf32> to vector<8x32xf32>
    %778 = vector.extract_strided_slice %770 {offsets = [0, 64], sizes = [8, 32], strides = [1, 1]} : vector<8x128xf32> to vector<8x32xf32>
    %779 = arith.mulf %777, %778 : vector<8x32xf32>
    %780 = arith.addf %776, %779 : vector<8x32xf32>
    %781 = vector.extract_strided_slice %774 {offsets = [0, 96], sizes = [8, 32], strides = [1, 1]} : vector<8x128xf32> to vector<8x32xf32>
    %782 = math.tanh %780 : vector<8x32xf32>
    %783 = arith.mulf %781, %782 : vector<8x32xf32>
    %c0_229 = arith.constant 0 : index
    %c0_230 = arith.constant 0 : index
    %784 = vector.load %arg10[%c0_229, %c0_230] : memref<32x136xf32, #tpu.memory_space<vmem>>, vector<32x136xf32>
    %cst_231 = arith.constant dense<0.000000e+00> : vector<8x136xf32>
    %785 = tpu.matmul %783, %784, %cst_231 {dimension_numbers = #tpu.dot_dimension_numbers<[1], [0], [0], [1], [0, 0, 1, 1], [], []>} : vector<8x32xf32>, vector<32x136xf32>, vector<8x136xf32> -> vector<8x136xf32>
    %786 = vector.extract_strided_slice %765 {offsets = [0, 256], sizes = [8, 8], strides = [1, 1]} : vector<8x264xf32> to vector<8x8xf32>
    %787 = vector.extract_strided_slice %785 {offsets = [0, 128], sizes = [8, 8], strides = [1, 1]} : vector<8x136xf32> to vector<8x8xf32>
    %788 = arith.addf %786, %787 : vector<8x8xf32>
    %789 = vector.broadcast %7 : f32 to vector<8x8xf32>
    %790 = arith.addf %788, %789 : vector<8x8xf32>
    %791 = arith.index_cast %c14_i32 : i32 to index
    %c0_232 = arith.constant 0 : index
    %c0_233 = arith.constant 0 : index
    %792 = vector.load %arg12[%791, %c0_232, %c0_233] : memref<16x8x8xf32, #tpu.memory_space<vmem>>, vector<1x8x8xf32>
    %793 = vector.shape_cast %792 : vector<1x8x8xf32> to vector<8x8xf32>
    %794 = vector.shape_cast %790 : vector<8x8xf32> to vector<1x8x8xf32>
    tpu.vector_store %arg12[%791, %c0_232, %c0_233], %794 {strides = array<i32>} : memref<16x8x8xf32, #tpu.memory_space<vmem>>, vector<1x8x8xf32>,
    %795 = vector.extract_strided_slice %765 {offsets = [0, 0], sizes = [8, 128], strides = [1, 1]} : vector<8x264xf32> to vector<8x128xf32>
    %796 = vector.extract_strided_slice %785 {offsets = [0, 0], sizes = [8, 128], strides = [1, 1]} : vector<8x136xf32> to vector<8x128xf32>
    %c15_i32 = arith.constant 15 : i32
    %c8_i32_234 = arith.constant 8 : i32
    %797 = arith.muli %c15_i32, %c8_i32_234 : i32
    %798 = tpu.assume_multiple %797, 8 : i32
    %799 = arith.index_cast %798 : i32 to index
    %c0_235 = arith.constant 0 : index
    %800 = vector.load %arg17[%799, %c0_235] : memref<128x128xf32, #tpu.memory_space<vmem>>, vector<8x128xf32>
    %801 = arith.addf %800, %795 : vector<8x128xf32>
    %802 = math.tanh %801 : vector<8x128xf32>
    %cst_236 = arith.constant 5.000000e-01 : f32
    %803 = vector.broadcast %cst_236 : f32 to vector<8x128xf32>
    %804 = arith.mulf %803, %802 : vector<8x128xf32>
    %cst_237 = arith.constant 5.000000e-01 : f32
    %805 = vector.broadcast %cst_237 : f32 to vector<8x128xf32>
    %806 = arith.addf %804, %805 : vector<8x128xf32>
    %807 = vector.extract_strided_slice %806 {offsets = [0, 32], sizes = [8, 32], strides = [1, 1]} : vector<8x128xf32> to vector<8x32xf32>
    %808 = arith.mulf %807, %760 : vector<8x32xf32>
    %809 = vector.extract_strided_slice %806 {offsets = [0, 0], sizes = [8, 32], strides = [1, 1]} : vector<8x128xf32> to vector<8x32xf32>
    %810 = vector.extract_strided_slice %802 {offsets = [0, 64], sizes = [8, 32], strides = [1, 1]} : vector<8x128xf32> to vector<8x32xf32>
    %811 = arith.mulf %809, %810 : vector<8x32xf32>
    %812 = arith.addf %808, %811 : vector<8x32xf32>
    %813 = vector.extract_strided_slice %806 {offsets = [0, 96], sizes = [8, 32], strides = [1, 1]} : vector<8x128xf32> to vector<8x32xf32>
    %814 = math.tanh %812 : vector<8x32xf32>
    %815 = arith.mulf %813, %814 : vector<8x32xf32>
    %c0_238 = arith.constant 0 : index
    %c0_239 = arith.constant 0 : index
    %816 = vector.load %arg8[%c0_238, %c0_239] : memref<32x264xf32, #tpu.memory_space<vmem>>, vector<32x264xf32>
    %cst_240 = arith.constant dense<0.000000e+00> : vector<8x264xf32>
    %817 = tpu.matmul %815, %816, %cst_240 {dimension_numbers = #tpu.dot_dimension_numbers<[1], [0], [0], [1], [0, 0, 1, 1], [], []>} : vector<8x32xf32>, vector<32x264xf32>, vector<8x264xf32> -> vector<8x264xf32>
    %818 = vector.extract_strided_slice %817 {offsets = [0, 128], sizes = [8, 128], strides = [1, 1]} : vector<8x264xf32> to vector<8x128xf32>
    %819 = arith.addf %818, %796 : vector<8x128xf32>
    %820 = vector.broadcast %8 : vector<1x128xf32> to vector<8x128xf32>
    %821 = arith.addf %819, %820 : vector<8x128xf32>
    %822 = math.tanh %821 : vector<8x128xf32>
    %cst_241 = arith.constant 5.000000e-01 : f32
    %823 = vector.broadcast %cst_241 : f32 to vector<8x128xf32>
    %824 = arith.mulf %823, %822 : vector<8x128xf32>
    %cst_242 = arith.constant 5.000000e-01 : f32
    %825 = vector.broadcast %cst_242 : f32 to vector<8x128xf32>
    %826 = arith.addf %824, %825 : vector<8x128xf32>
    %827 = vector.extract_strided_slice %826 {offsets = [0, 32], sizes = [8, 32], strides = [1, 1]} : vector<8x128xf32> to vector<8x32xf32>
    %828 = arith.mulf %827, %780 : vector<8x32xf32>
    %829 = vector.extract_strided_slice %826 {offsets = [0, 0], sizes = [8, 32], strides = [1, 1]} : vector<8x128xf32> to vector<8x32xf32>
    %830 = vector.extract_strided_slice %822 {offsets = [0, 64], sizes = [8, 32], strides = [1, 1]} : vector<8x128xf32> to vector<8x32xf32>
    %831 = arith.mulf %829, %830 : vector<8x32xf32>
    %832 = arith.addf %828, %831 : vector<8x32xf32>
    %833 = vector.extract_strided_slice %826 {offsets = [0, 96], sizes = [8, 32], strides = [1, 1]} : vector<8x128xf32> to vector<8x32xf32>
    %834 = math.tanh %832 : vector<8x32xf32>
    %835 = arith.mulf %833, %834 : vector<8x32xf32>
    %c0_243 = arith.constant 0 : index
    %c0_244 = arith.constant 0 : index
    %836 = vector.load %arg10[%c0_243, %c0_244] : memref<32x136xf32, #tpu.memory_space<vmem>>, vector<32x136xf32>
    %cst_245 = arith.constant dense<0.000000e+00> : vector<8x136xf32>
    %837 = tpu.matmul %835, %836, %cst_245 {dimension_numbers = #tpu.dot_dimension_numbers<[1], [0], [0], [1], [0, 0, 1, 1], [], []>} : vector<8x32xf32>, vector<32x136xf32>, vector<8x136xf32> -> vector<8x136xf32>
    %838 = vector.extract_strided_slice %817 {offsets = [0, 256], sizes = [8, 8], strides = [1, 1]} : vector<8x264xf32> to vector<8x8xf32>
    %839 = vector.extract_strided_slice %837 {offsets = [0, 128], sizes = [8, 8], strides = [1, 1]} : vector<8x136xf32> to vector<8x8xf32>
    %840 = arith.addf %838, %839 : vector<8x8xf32>
    %841 = vector.broadcast %7 : f32 to vector<8x8xf32>
    %842 = arith.addf %840, %841 : vector<8x8xf32>
    %843 = arith.index_cast %c15_i32 : i32 to index
    %c0_246 = arith.constant 0 : index
    %c0_247 = arith.constant 0 : index
    %844 = vector.load %arg12[%843, %c0_246, %c0_247] : memref<16x8x8xf32, #tpu.memory_space<vmem>>, vector<1x8x8xf32>
    %845 = vector.shape_cast %844 : vector<1x8x8xf32> to vector<8x8xf32>
    %846 = vector.shape_cast %842 : vector<8x8xf32> to vector<1x8x8xf32>
    tpu.vector_store %arg12[%843, %c0_246, %c0_247], %846 {strides = array<i32>} : memref<16x8x8xf32, #tpu.memory_space<vmem>>, vector<1x8x8xf32>,
    %847 = vector.extract_strided_slice %817 {offsets = [0, 0], sizes = [8, 128], strides = [1, 1]} : vector<8x264xf32> to vector<8x128xf32>
    %848 = vector.extract_strided_slice %837 {offsets = [0, 0], sizes = [8, 128], strides = [1, 1]} : vector<8x136xf32> to vector<8x128xf32>
    %c16_i32 = arith.constant 16 : i32
    %c0_248 = arith.constant 0 : index
    %c0_249 = arith.constant 0 : index
    %849 = vector.load %arg13[%c0_248, %c0_249] : memref<8x32xf32, #tpu.memory_space<vmem>>, vector<8x32xf32>
    tpu.vector_store %arg13[%c0_248, %c0_249], %815 {strides = array<i32>} : memref<8x32xf32, #tpu.memory_space<vmem>>, vector<8x32xf32>,
    %c0_250 = arith.constant 0 : index
    %c0_251 = arith.constant 0 : index
    %850 = vector.load %arg14[%c0_250, %c0_251] : memref<8x32xf32, #tpu.memory_space<vmem>>, vector<8x32xf32>
    tpu.vector_store %arg14[%c0_250, %c0_251], %812 {strides = array<i32>} : memref<8x32xf32, #tpu.memory_space<vmem>>, vector<8x32xf32>,
    %c0_252 = arith.constant 0 : index
    %c0_253 = arith.constant 0 : index
    %851 = vector.load %arg15[%c0_252, %c0_253] : memref<8x32xf32, #tpu.memory_space<vmem>>, vector<8x32xf32>
    tpu.vector_store %arg15[%c0_252, %c0_253], %835 {strides = array<i32>} : memref<8x32xf32, #tpu.memory_space<vmem>>, vector<8x32xf32>,
    %c0_254 = arith.constant 0 : index
    %c0_255 = arith.constant 0 : index
    %852 = vector.load %arg16[%c0_254, %c0_255] : memref<8x32xf32, #tpu.memory_space<vmem>>, vector<8x32xf32>
    tpu.vector_store %arg16[%c0_254, %c0_255], %832 {strides = array<i32>} : memref<8x32xf32, #tpu.memory_space<vmem>>, vector<8x32xf32>,
    return
  }
  func.func @transform_0(%arg0: i32) -> (i32, i32) {
    %c0_i32 = arith.constant 0 : i32
    %c0_i32_0 = arith.constant 0 : i32
    %c0_i32_1 = arith.constant 0 : i32
    return %c0_i32, %c0_i32_0 : i32, i32
  }
  func.func @transform_1(%arg0: i32) -> (i32, i32) {
    %c0_i32 = arith.constant 0 : i32
    %c0_i32_0 = arith.constant 0 : i32
    %c0_i32_1 = arith.constant 0 : i32
    return %c0_i32, %c0_i32_0 : i32, i32
  }
  func.func @transform_2(%arg0: i32) -> (i32, i32) {
    %c0_i32 = arith.constant 0 : i32
    %c0_i32_0 = arith.constant 0 : i32
    %c0_i32_1 = arith.constant 0 : i32
    return %c0_i32, %c0_i32_0 : i32, i32
  }
  func.func @transform_3(%arg0: i32) -> (i32, i32) {
    %c0_i32 = arith.constant 0 : i32
    %c0_i32_0 = arith.constant 0 : i32
    %c0_i32_1 = arith.constant 0 : i32
    return %c0_i32, %c0_i32_0 : i32, i32
  }
  func.func @transform_4(%arg0: i32) -> (i32, i32) {
    %c0_i32 = arith.constant 0 : i32
    %c0_i32_0 = arith.constant 0 : i32
    %c0_i32_1 = arith.constant 0 : i32
    return %c0_i32, %c0_i32_0 : i32, i32
  }
  func.func @transform_5(%arg0: i32) -> (i32, i32) {
    %c0_i32 = arith.constant 0 : i32
    %c0_i32_0 = arith.constant 0 : i32
    %c0_i32_1 = arith.constant 0 : i32
    return %c0_i32, %c0_i32_0 : i32, i32
  }
  func.func @transform_6(%arg0: i32) -> (i32, i32) {
    %c0_i32 = arith.constant 0 : i32
    %c0_i32_0 = arith.constant 0 : i32
    %c0_i32_1 = arith.constant 0 : i32
    return %c0_i32, %c0_i32_0 : i32, i32
  }
  func.func @transform_7(%arg0: i32) -> (i32, i32) {
    %c0_i32 = arith.constant 0 : i32
    %c0_i32_0 = arith.constant 0 : i32
    %c0_i32_1 = arith.constant 0 : i32
    return %c0_i32, %c0_i32_0 : i32, i32
  }
  func.func @transform_8(%arg0: i32) -> (i32, i32) {
    %c0_i32 = arith.constant 0 : i32
    %c0_i32_0 = arith.constant 0 : i32
    %c0_i32_1 = arith.constant 0 : i32
    return %c0_i32, %c0_i32_0 : i32, i32
  }
  func.func @transform_9(%arg0: i32) -> (i32, i32) {
    %c0_i32 = arith.constant 0 : i32
    %c0_i32_0 = arith.constant 0 : i32
    %c0_i32_1 = arith.constant 0 : i32
    return %c0_i32, %c0_i32_0 : i32, i32
  }
  func.func @transform_10(%arg0: i32) -> i32 {
    %c0_i32 = arith.constant 0 : i32
    %c0_i32_0 = arith.constant 0 : i32
    return %c0_i32 : i32
  }
  func.func @transform_11(%arg0: i32) -> (i32, i32, i32) {
    %c0_i32 = arith.constant 0 : i32
    %c0_i32_0 = arith.constant 0 : i32
    %c0_i32_1 = arith.constant 0 : i32
    %c0_i32_2 = arith.constant 0 : i32
    return %c0_i32, %c0_i32_0, %c0_i32_1 : i32, i32, i32
  }
  func.func @transform_12(%arg0: i32) -> (i32, i32) {
    %c0_i32 = arith.constant 0 : i32
    %c0_i32_0 = arith.constant 0 : i32
    %c0_i32_1 = arith.constant 0 : i32
    return %c0_i32, %c0_i32_0 : i32, i32
  }
  func.func @transform_13(%arg0: i32) -> (i32, i32) {
    %c0_i32 = arith.constant 0 : i32
    %c0_i32_0 = arith.constant 0 : i32
    %c0_i32_1 = arith.constant 0 : i32
    return %c0_i32, %c0_i32_0 : i32, i32
  }
  func.func @transform_14(%arg0: i32) -> (i32, i32) {
    %c0_i32 = arith.constant 0 : i32
    %c0_i32_0 = arith.constant 0 : i32
    %c0_i32_1 = arith.constant 0 : i32
    return %c0_i32, %c0_i32_0 : i32, i32
  }
  func.func @transform_15(%arg0: i32) -> (i32, i32) {
    %c0_i32 = arith.constant 0 : i32
    %c0_i32_0 = arith.constant 0 : i32
    %c0_i32_1 = arith.constant 0 : i32
    return %c0_i32, %c0_i32_0 : i32, i32
  }
}

</mosaic_0001>

<bundles_post_ra>
// kernel: deep_lstm_forward_seq.1
= control target key start
LH: loop header
LB: loop body
LE: loop exit
PB: predicated region body
PF: predicated region fallthrough
CT: control target
= control target key end

     0   :  { %s4659_s0 = inlined_call_operand.hbm [shape: f32[128,16], index: 0, kind: input, shape index: {}]   ;;  %s4660_s1 = inlined_call_operand.vmem [shape: f32[8,32], index: 1, kind: input, shape index: {}, may-alias: {1,12}]   ;;  %s4661_s2 = inlined_call_operand.vmem [shape: f32[8,32], index: 2, kind: input, shape index: {}, may-alias: {2,13}]   ;;  %s4662_s3 = inlined_call_operand.vmem [shape: f32[8,32], index: 3, kind: input, shape index: {}, may-alias: {3,14}]   ;;  %s4663_s4 = inlined_call_operand.vmem [shape: f32[8,32], index: 4, kind: input, shape index: {}, may-alias: {4,15}]   ;;  %s4664_s5 = inlined_call_operand.hbm [shape: f32[16,128], index: 5, kind: input, shape index: {}]   ;;  %s4665_s6 = inlined_call_operand.hbm [shape: f32[1,128], index: 6, kind: input, shape index: {}]   ;;  %s4666_s7 = inlined_call_operand.hbm [shape: f32[32,264], index: 7, kind: input, shape index: {}]   ;;  %s4667_s8 = inlined_call_operand.hbm [shape: f32[1,128], index: 8, kind: input, shape index: {}]   ;;  %s4668_s9 = inlined_call_operand.vmem [shape: f32[32,136], index: 9, kind: input, shape index: {}]   ;;  %s4669_s10 = inlined_call_operand.<no memory space> [shape: f32[1], index: 10, kind: input, shape index: {}]   ;;  %s4670_s11 = inlined_call_operand.vmem [shape: f32[16,8,8], index: 11, kind: output, shape index: {0}]   ;;  %s4671_s12 = inlined_call_operand.vmem [shape: f32[8,32], index: 12, kind: output, shape index: {1}, may-alias: {1,12}]   ;;  %s4672_s13 = inlined_call_operand.vmem [shape: f32[8,32], index: 13, kind: output, shape index: {2}, may-alias: {2,13}]   ;;  %s4673_s14 = inlined_call_operand.vmem [shape: f32[8,32], index: 14, kind: output, shape index: {3}, may-alias: {3,14}]   ;;  %s4674_s15 = inlined_call_operand.vmem [shape: f32[8,32], index: 15, kind: output, shape index: {4}, may-alias: {4,15}]  }
   0x1   :  { %4675 = sst [smem:[#allocation15_spill]] %s4673_s14 }
   0x2   :  { %22 = vsyncpa [#allocation5], 0 }
   0x3   :  { %23 = vsyncpa [#allocation7], 0 }
   0x4   :  { %24 = vsyncpa [#allocation10], 0  ;;  %s50_s20 = sshll.u32 %s4664_s5, 4  ;;  %s3578_s21 = smov [#allocation6]   ;;  %s51_s20 = int_to_ptr.hbm [resolvable:$true] %s50_s20 }
   0x5   :  { %s52_s22 = sshll.u32 %s3578_s21, 4  ;;  %s74_s25 = sshll.u32 %s4666_s7, 4  ;;  %s53_s22 = int_to_ptr.vmem [resolvable:$true] %s52_s22  ;;  %s75_s25 = int_to_ptr.hbm [resolvable:$true] %s74_s25 }
   0x6   :  { %s3579_s26 = smov 128   ;;  %s3580_s27 = smov 8  }
   0x7   :  { %58 = dma.hbm_to_vmem [thread:$0]  %s51_s20, 256, %s53_s22, [#allocation7], %s3579_s26, %s3579_s26, %s3580_s27  }
   0x8   :  { %s3581_s28 = smov [#allocation9]   ;;  %s3582_s30 = smov 384  }
   0x9   :  { %s76_s29 = sshll.u32 %s3581_s28, 4  ;;  %s3583_s16 = smov 24   ;;  %s77_s29 = int_to_ptr.vmem [resolvable:$true] %s76_s29 }
   0xa   :  { %82 = dma.hbm_to_vmem [thread:$0]  %s75_s25, 1536, %s77_s29, [#allocation10], %s3582_s30, %s3582_s30, %s3583_s16  }
   0xb   :  { %s29_s18 = sshll.u32 %s4659_s0, 4  ;;  %s3584_s19 = smov [#allocation4]   ;;  %s30_s18 = int_to_ptr.hbm [resolvable:$true] %s29_s18 }
   0xc   :  { %s31_s21 = sshll.u32 %s3584_s19, 4  ;;  %s64_s24 = sshll.u32 %s4665_s6, 4  ;;  %s32_s21 = int_to_ptr.vmem [resolvable:$true] %s31_s21  ;;  %s65_s24 = int_to_ptr.hbm [resolvable:$true] %s64_s24 }
   0xd   :  { %37 = dma.hbm_to_vmem [thread:$0]  %s30_s18, 2048, %s32_s21, [#allocation5], %s3579_s26, %s3579_s26, %s3580_s27  }
   0xe   :  { %s3585_s20 = smov [#allocation8]   ;;  %s88_s25 = sshll.u32 %s4667_s8, 4  ;;  %s89_s25 = int_to_ptr.hbm [resolvable:$true] %s88_s25 }
   0xf   :  { %s66_s22 = sshll.u32 %s3585_s20, 4  ;;  %s3586_s0 = smov [#allocation11]   ;;  %s67_s22 = int_to_ptr.vmem [resolvable:$true] %s66_s22 }
  0x10   :  { %69 = dma.hbm_to_vmem [thread:$0]  %s65_s24, 16, %s67_s22, [#allocation7]  }
  0x11   :  { %s90_s29 = sshll.u32 %s3586_s0, 4  ;;  %s91_s29 = int_to_ptr.vmem [resolvable:$true] %s90_s29 }
  0x12   :  { %93 = dma.hbm_to_vmem [thread:$0]  %s89_s25, 16, %s91_s29, [#allocation10]  }
  0x13   :  { %3572 = dma.done.wait [#allocation5], 2048  }
  0x14   :  { %3573 = vsyncadd [#allocation5], 4294965248 }
  0x15   :  { %3574 = dma.done.wait [#allocation7], 272  }
  0x16   :  { %3575 = vsyncadd [#allocation7], 4294967024 }
  0x17   :  { %3576 = dma.done.wait [#allocation10], 1552  }
  0x18   :  { %3577 = vsyncadd [#allocation10], 4294965744  ;;  %v3685_v0 = vld [vmem:[#allocation9 + $0x48] sm:$0xff]  ;;  %v135_v1 = vld [vmem:[#allocation6 + $0x8] sm:$0xff]  ;;  %vm140_vm0 = vcmask 130048   ;;  %vm280_vm1 = vcmask 261120  }
  0x19   :  { %v3687_v2 = vld [vmem:[#allocation9 + $0x30] sm:$0xff]  ;;  %296 = vmatpush.msra.mxu1 %v3685_v0  ;;  %203 = vmatpush.msra.mxu0 %v135_v1  ;;  %v3690_v5 = vld [vmem:[#allocation9 + $0x18] sm:$0xff]  ;;  %v3695_v6 = vld [vmem:[#allocation9] sm:$0xff]  ;;  %s3587_s14 = smov 64   ;;  %s3588_s27 = smov 32   ;;  %vm519_vm2 = vcmask 64512  }
  0x1a   :  { %v134_v3 = vld [vmem:[#allocation6] sm:$0xff]  ;;  %386 = vmatpush.msra.mxu3 %v3685_v0  ;;  %v3706_v8 = vld [vmem:[#allocation8] ss:$0 sm:$0xff]  ;;  %v3742_v29 = vld [vmem:[#allocation9 + $0x20] sm:$0xff]  ;;  %s4676_s6 = sld [smem:[#allocation15_spill]] }
  0x1b   :  { %v118_v4 = vld [vmem:[#allocation4] sm:$0xff]  ;;  %297 = vmatpush.msra.mxu1 %v3687_v2  ;;  %204 = vmatpush.msra.mxu0 %v134_v3  ;;  %v3722_v24 = vld [vmem:[%s4668_s9 + $0x30] sm:$0xff]  ;;  %v119_v39 = vld [vmem:[#allocation4 + $0x8] sm:$0xff] }
  0x1c   :  { %3195 = vmatmul.msk.f32.vlgmr.msra.gmra.mxu0 %vm140_vm0, %v118_v4  ;;  %387 = vmatpush.msra.mxu3 %v3687_v2  ;;  %v272_v7 = vld [vmem:[%s4660_s1] sm:$0xff]  ;;  %v3736_v27 = vld [vmem:[%s4668_s9 + $0x10] sm:$0xff] }
  0x1d   :  { %298 = vmatpush.msra.mxu1 %v3690_v5  ;;  %v273_v14 = vld [vmem:[%s4661_s2] sm:$0xff]  ;;  %323 = vmatpush.msra.mxu2 %v3722_v24  ;;  %v3739_v28 = vld [vmem:[#allocation9 + $0x38] sm:$0xff]  ;;  %v3764_v34 = vld [vmem:[#allocation9 + $0x40] sm:$0xff] }
  0x1e   :  { %388 = vmatpush.msra.mxu3 %v3690_v5  ;;  %v3727_v25 = vld [vmem:[%s4668_s9 + $0x20] sm:$0xff]  ;;  %v3758_v33 = vld [vmem:[#allocation9 + $0x58] sm:$0xff]  ;;  %v3796_v43 = vld [vmem:[#allocation11] ss:$0 sm:$0xff] }
  0x1f   :  { %299 = vmatpush.msra.mxu1 %v3695_v6  ;;  %v3730_v26 = vld [vmem:[#allocation9 + $0x50] sm:$0xff]  ;;  %324 = vmatpush.msra.mxu2 %v3727_v25  ;;  %v3755_v32 = vld [vmem:[#allocation9 + $0x8] sm:$0xff] }
  0x20   :  { %3211 = vmatmul.msk.f32.vlgmr.msra.gmra.mxu1 %vm280_vm1, %v272_v7  ;;  %389 = vmatpush.msra.mxu3 %v3695_v6  ;;  %v3748_v30 = vld [vmem:[%s4668_s9] sm:$0xff] }
  0x21   :  { %406 = vmatpush.msrb.mxu1 %v3730_v26  ;;  %325 = vmatpush.msra.mxu2 %v3736_v27  ;;  %v274_v31 = vld [vmem:[%s4662_s3] sm:$0xff] }
  0x22   :  { %488 = vmatpush.msrb.mxu3 %v3722_v24  ;;  %v3768_v35 = vld [vmem:[#allocation9 + $0x28] sm:$0xff]  ;;  %v3771_v36 = vld [vmem:[#allocation9 + $0x10] sm:$0xff] }
  0x23   :  { %407 = vmatpush.msrb.mxu1 %v3739_v28  ;;  %326 = vmatpush.msra.mxu2 %v3748_v30  ;;  %v275_v40 = vld [vmem:[%s4663_s4] sm:$0xff] }
  0x24   :  { %489 = vmatpush.msrb.mxu3 %v3727_v25  ;;  %3212 = vmatmul.msk.f32.vlgmr.msra.gmra.mxu2 %vm280_vm1, %v274_v31  ;;  %v3872_v31 = vstv %s4669_s10 }
  0x25   :  { %408 = vmatpush.msrb.mxu1 %v3742_v29  ;;  %426 = vmatpush.msrb.mxu2 %v3758_v33 }
  0x26   :  { %490 = vmatpush.msrb.mxu3 %v3736_v27  ;;  %3196 = vmatmul.msk.f32.gmra.mxu0 %vm140_vm0, %v119_v39 }
  0x27   :  { %409 = vmatpush.msrb.mxu1 %v3755_v32  ;;  %427 = vmatpush.msrb.mxu2 %v3764_v34 }
  0x28   :  { %491 = vmatpush.msrb.mxu3 %v3748_v30 }
  0x29   :  { %428 = vmatpush.msrb.mxu2 %v3768_v35 }
  0x2b   :  { %429 = vmatpush.msrb.mxu2 %v3771_v36 }
  0x2d   :  { %573 = vmatpush.msra.mxu2 %v3685_v0 }
  0x2f   :  { %574 = vmatpush.msra.mxu2 %v3687_v2 }
  0x31   :  { %575 = vmatpush.msra.mxu2 %v3690_v5 }
  0x33   :  { %576 = vmatpush.msra.mxu2 %v3695_v6 }
  0x99   :  { %v206_v9 = vpop.f32.mrf.mxu0 }
  0x9a   :  { %v207_v10 = vadd.f32 %v3706_v8, %v206_v9 }
  0x9d   :  { %v301_v11 = vpop.f32.mrf.mxu1 }
  0x9e   :  { %v332_v12 = vadd.f32 %v301_v11, %v207_v10  ;;  %v3816_v11 = vld [vmem:[%s4668_s9 + $0x38] sm:$0xff] }
  0x9f   :  { %508 = vmatpush.msra.mxu1 %v3816_v11 }
  0xa0   :  { %3320 = vtanh.f32 %v332_v12  ;;  %v3821_v12 = vld [vmem:[%s4668_s9 + $0x28] sm:$0xff] }
  0xa1   :  { %509 = vmatpush.msra.mxu1 %v3821_v12 }
  0xa3   :  { %v209_v45 = vpop.f32.mrf.mxu0 }
  0xa4   :  { %v210_v48 = vadd.f32 %v3706_v8, %v209_v45 }
  0xa6   :  { %v3321_v13 = vpop.eup %3320 }
  0xa7   :  { %342 = vrot.lane.b32.xlu0 %v3321_v13, %s3587_s14  ;;  %v334_v15 = vmul.f32 0.5, %v3321_v13  ;;  %v328_v42 = vpop.f32.mrf.mxu2 }
  0xa9   :  { %v335_v16 = vadd.f32 0.5, %v334_v15  ;;  %v3827_v15 = vld [vmem:[%s4668_s9 + $0x18] sm:$0xff] }
  0xaa   :  { %510 = vmatpush.msra.mxu1 %v3827_v15 }
  0xaf   :  { %337 = vrot.lane.b32.xlu0 %v273_v14, %s3588_s27 }
 0x119   :  { %v343_v17 = vpop.permute.xlu0 %342 }
 0x11a   :  { %v345_v18 = vmul.f32 %v343_v17, %v335_v16 }
 0x11c   :  { %347 = vrot.lane.b32.xlu1 %v345_v18, %s3588_s27 }
 0x121   :  { %v338_v19 = vpop.permute.xlu0 %337 }
 0x122   :  { %v340_v20 = vmul.f32 %v338_v19, %v335_v16  ;;  %v120_v19 = vld [vmem:[#allocation4 + $0x10] sm:$0xff] }
 0x123   :  { %3197 = vmatmul.msk.f32.gmra.mxu0 %vm140_vm0, %v120_v19 }
 0x18e   :  { %v348_v21 = vpop.permute.xlu1 %347 }
 0x18f   :  { %v3715_v22 = vadd.f32 %v348_v21, %v340_v20 }
 0x191   :  { %3322 = vtanh.f32 %v3715_v22 }
 0x197   :  { %v3323_v23 = vpop.eup %3322 }
 0x198   :  { %353 = vrot.lane.b32.xlu1 %v3323_v23, %s3587_s14 }
 0x1a0   :  { %443 = vrot.lane.b32.xlu1 %v275_v40, %s3588_s27  ;;  %v212_v40 = vpop.f32.mrf.mxu0 }
 0x20a   :  { %v354_v37 = vpop.permute.xlu1 %353 }
 0x20b   :  { %v356_v38 = vmul.f32 %v354_v37, %v335_v16  ;;  %v3834_v16 = vld [vmem:[%s4668_s9 + $0x8] sm:$0xff] }
 0x20c   :  { %511 = vmatpush.msra.mxu1 %v3834_v16 }
 0x20d   :  { %370 = vrot.lane.b32.xlu2 %v356_v38, %s3588_s27 }
 0x212   :  { %v444_v61 = vpop.permute.xlu1 %443 }
 0x267   :  { %v371_v41 = vpop.permute.xlu2 %370 }
 0x268   :  { %3213 = vmatmul.msk.f32.vlgmr.msra.gmra.mxu3 %vm280_vm1, %v371_v41  ;;  %3214 = vmatmul.msk.f32.vlgmr.msrb.gmra.mxu1 %vm280_vm1, %v371_v41 }
 0x269   :  { %3215 = vmatmul.msk.f32.vlgmr.msrb.gmra.mxu2 %vm280_vm1, %v371_v41  ;;  %593 = vmatpush.msra.mxu3 %v3730_v26  ;;  %v213_v41 = vadd.f32 %v3706_v8, %v212_v40 }
 0x26a   :  { %668 = vmatpush.msrb.mxu2 %v3722_v24  ;;  %613 = vmatpush.msrb.mxu1 %v3758_v33 }
 0x26b   :  { %594 = vmatpush.msra.mxu3 %v3739_v28 }
 0x26c   :  { %669 = vmatpush.msrb.mxu2 %v3727_v25  ;;  %614 = vmatpush.msrb.mxu1 %v3764_v34 }
 0x26d   :  { %595 = vmatpush.msra.mxu3 %v3742_v29 }
 0x26e   :  { %670 = vmatpush.msrb.mxu2 %v3736_v27  ;;  %615 = vmatpush.msrb.mxu1 %v3768_v35 }
 0x26f   :  { %596 = vmatpush.msra.mxu3 %v3755_v32 }
 0x270   :  { %671 = vmatpush.msrb.mxu2 %v3748_v30  ;;  %616 = vmatpush.msrb.mxu1 %v3771_v36 }
 0x2e5   :  { %v411_v44 = vpop.f32.mrf.mxu1 }
 0x2e6   :  { %v434_v46 = vadd.f32 %v411_v44, %v328_v42 }
 0x2e8   :  { %v438_v47 = vadd.f32 %v3796_v43, %v434_v46 }
 0x2ea   :  { %3324 = vtanh.f32 %v438_v47 }
 0x2eb   :  { %v391_v49 = vpop.f32.mrf.mxu3 }
 0x2ec   :  { %v523_v50 = vadd.f32 %v391_v49, %v210_v48 }
 0x2ee   :  { %3326 = vtanh.f32 %v523_v50 }
 0x2f0   :  { %v3325_v51 = vpop.eup %3324 }
 0x2f1   :  { %448 = vrot.lane.b32.xlu2 %v3325_v51, %s3587_s14  ;;  %v440_v53 = vmul.f32 0.5, %v3325_v51 }
 0x2f3   :  { %v441_v54 = vadd.f32 0.5, %v440_v53 }
 0x2f4   :  { %v3327_v52 = vpop.eup %3326 }
 0x2f5   :  { %529 = vrot.lane.b32.xlu0 %v3327_v52, %s3587_s14  ;;  %v525_v57 = vmul.f32 0.5, %v3327_v52  ;;  %v446_v62 = vmul.f32 %v444_v61, %v441_v54 }
 0x2f7   :  { %v526_v58 = vadd.f32 0.5, %v525_v57 }
 0x2f9   :  { %v527_v4 = vmul.f32 %v526_v58, %v3715_v22  ;;  %v431_v22 = vpop.f32.mrf.mxu2 }
 0x34b   :  { %v449_v55 = vpop.permute.xlu2 %448 }
 0x34c   :  { %v451_v56 = vmul.f32 %v449_v55, %v441_v54 }
 0x34e   :  { %453 = vrot.lane.b32.xlu2 %v451_v56, %s3588_s27 }
 0x367   :  { %v530_v59 = vpop.permute.xlu0 %529 }
 0x368   :  { %v532_v60 = vmul.f32 %v530_v59, %v526_v58 }
 0x36a   :  { %534 = vrot.lane.b32.xlu0 %v532_v60, %s3588_s27 }
 0x3a8   :  { %v454_v63 = vpop.permute.xlu2 %453 }
 0x3a9   :  { %v3804_v1 = vadd.f32 %v454_v63, %v446_v62 }
 0x3ab   :  { %3328 = vtanh.f32 %v3804_v1 }
 0x3b1   :  { %v3329_v3 = vpop.eup %3328 }
 0x3b2   :  { %459 = vrot.lane.b32.xlu1 %v3329_v3, %s3587_s14 }
 0x3dc   :  { %v535_v7 = vpop.permute.xlu0 %534 }
 0x3dd   :  { %v3809_v9 = vadd.f32 %v535_v7, %v527_v4 }
 0x3df   :  { %3330 = vtanh.f32 %v3809_v9 }
 0x3e5   :  { %v3331_v10 = vpop.eup %3330 }
 0x3e6   :  { %540 = vrot.lane.b32.xlu2 %v3331_v10, %s3587_s14 }
 0x424   :  { %v460_v13 = vpop.permute.xlu1 %459 }
 0x425   :  { %v462_v14 = vmul.f32 %v460_v13, %v441_v54 }
 0x427   :  { %472 = vrot.lane.b32.xlu0 %v462_v14, %s3588_s27 }
 0x440   :  { %v541_v17 = vpop.permute.xlu2 %540 }
 0x441   :  { %v543_v18 = vmul.f32 %v541_v17, %v526_v58 }
 0x443   :  { %557 = vrot.lane.b32.xlu1 %v543_v18, %s3588_s27 }
 0x499   :  { %v473_v20 = vpop.permute.xlu0 %472 }
 0x49a   :  { %3216 = vmatmul.msk.f32.vlgmr.msrb.gmra.mxu3 %vm280_vm1, %v473_v20  ;;  %3217 = vmatmul.msk.f32.vlgmr.msra.gmra.mxu1 %vm280_vm1, %v473_v20 }
 0x49b   :  { %688 = vmatpush.msrb.mxu3 %v3816_v11  ;;  %752 = vmatpush.msra.mxu1 %v3685_v0 }
 0x49d   :  { %689 = vmatpush.msrb.mxu3 %v3821_v12  ;;  %753 = vmatpush.msra.mxu1 %v3687_v2 }
 0x49f   :  { %690 = vmatpush.msrb.mxu3 %v3827_v15  ;;  %754 = vmatpush.msra.mxu1 %v3690_v5 }
 0x4a1   :  { %691 = vmatpush.msrb.mxu3 %v3834_v16  ;;  %755 = vmatpush.msra.mxu1 %v3695_v6 }
 0x4b5   :  { %v558_v21 = vpop.permute.xlu1 %557 }
 0x4b6   :  { %3218 = vmatmul.msk.f32.vlgmr.msra.gmra.mxu2 %vm280_vm1, %v558_v21  ;;  %3219 = vmatmul.msk.f32.vlgmr.msra.gmra.mxu3 %vm280_vm1, %v558_v21 }
 0x4b7   :  { %3220 = vmatmul.msk.f32.vlgmr.msrb.gmra.mxu1 %vm280_vm1, %v558_v21  ;;  %772 = vmatpush.msra.mxu2 %v3730_v26 }
 0x4b8   :  { %792 = vmatpush.msra.mxu3 %v3758_v33  ;;  %847 = vmatpush.msrb.mxu1 %v3722_v24 }
 0x4b9   :  { %773 = vmatpush.msra.mxu2 %v3739_v28 }
 0x4ba   :  { %793 = vmatpush.msra.mxu3 %v3764_v34  ;;  %848 = vmatpush.msrb.mxu1 %v3727_v25 }
 0x4bb   :  { %774 = vmatpush.msra.mxu2 %v3742_v29 }
 0x4bc   :  { %794 = vmatpush.msra.mxu3 %v3768_v35  ;;  %849 = vmatpush.msrb.mxu1 %v3736_v27 }
 0x4bd   :  { %775 = vmatpush.msra.mxu2 %v3755_v32 }
 0x4be   :  { %795 = vmatpush.msra.mxu3 %v3771_v36  ;;  %850 = vmatpush.msrb.mxu1 %v3748_v30 }
 0x517   :  { %v513_v23 = vpop.f32.mrf.mxu1 }
 0x518   :  { %v516_v37 = vadd.f32 %v513_v23, %v431_v22 }
 0x51a   :  { %v518_v38 = vadd.f32 %v3872_v31, %v516_v37 }
 0x51c   :  { %520 = vst.msk [vmem:[%s4670_s11] sm:$0xff] %vm519_vm2, %v518_v38 }
 0x51d   :  { %v493_v39 = vpop.f32.mrf.mxu3 }
 0x534   :  { %v618_v18 = vpop.f32.mrf.mxu1 }
 0x539   :  { %v578_v42 = vpop.f32.mrf.mxu2  ;;  %v598_v44 = vpop.f32.mrf.mxu3 }
 0x53a   :  { %v702_v45 = vadd.f32 %v578_v42, %v213_v41  ;;  %v621_v46 = vadd.f32 %v598_v44, %v493_v39 }
 0x53c   :  { %3332 = vtanh.f32 %v702_v45  ;;  %v622_v47 = vadd.f32 %v3796_v43, %v621_v46 }
 0x53e   :  { %3334 = vtanh.f32 %v622_v47 }
 0x542   :  { %v3333_v48 = vpop.eup %3332 }
 0x543   :  { %708 = vrot.lane.b32.xlu0 %v3333_v48, %s3587_s14  ;;  %v704_v54 = vmul.f32 0.5, %v3333_v48 }
 0x544   :  { %v3335_v49 = vpop.eup %3334 }
 0x545   :  { %628 = vrot.lane.b32.xlu2 %v3335_v49, %s3587_s14  ;;  %v624_v50 = vmul.f32 0.5, %v3335_v49  ;;  %v705_v55 = vadd.f32 0.5, %v704_v54 }
 0x547   :  { %v625_v51 = vadd.f32 0.5, %v624_v50  ;;  %v706_v58 = vmul.f32 %v705_v55, %v3809_v9 }
 0x549   :  { %v626_v61 = vmul.f32 %v625_v51, %v3804_v1  ;;  %v121_v1 = vld [vmem:[#allocation4 + $0x18] sm:$0xff] }
 0x54a   :  { %3198 = vmatmul.msk.f32.gmra.mxu0 %vm140_vm0, %v121_v1 }
 0x59f   :  { %v629_v52 = vpop.permute.xlu2 %628 }
 0x5a0   :  { %v631_v53 = vmul.f32 %v629_v52, %v625_v51 }
 0x5a2   :  { %633 = vrot.lane.b32.xlu1 %v631_v53, %s3588_s27 }
 0x5b5   :  { %v709_v56 = vpop.permute.xlu0 %708 }
 0x5b6   :  { %v711_v57 = vmul.f32 %v709_v56, %v705_v55 }
 0x5b8   :  { %713 = vrot.lane.b32.xlu2 %v711_v57, %s3588_s27 }
 0x5c7   :  { %v215_v22 = vpop.f32.mrf.mxu0 }
 0x5c8   :  { %v216_v23 = vadd.f32 %v3706_v8, %v215_v22 }
 0x612   :  { %v714_v59 = vpop.permute.xlu2 %713 }
 0x613   :  { %v3886_v60 = vadd.f32 %v714_v59, %v706_v58 }
 0x614   :  { %v634_v62 = vpop.permute.xlu1 %633 }
 0x615   :  { %3336 = vtanh.f32 %v3886_v60  ;;  %v3890_v63 = vadd.f32 %v634_v62, %v626_v61 }
 0x617   :  { %3338 = vtanh.f32 %v3890_v63 }
 0x61b   :  { %v3337_v3 = vpop.eup %3336 }
 0x61c   :  { %719 = vrot.lane.b32.xlu1 %v3337_v3, %s3587_s14 }
 0x61d   :  { %v3339_v4 = vpop.eup %3338 }
 0x61e   :  { %639 = vrot.lane.b32.xlu0 %v3339_v4, %s3587_s14 }
 0x68e   :  { %v720_v7 = vpop.permute.xlu1 %719 }
 0x68f   :  { %v722_v9 = vmul.f32 %v720_v7, %v705_v55 }
 0x690   :  { %v640_v10 = vpop.permute.xlu0 %639 }
 0x691   :  { %v642_v13 = vmul.f32 %v640_v10, %v625_v51  ;;  %736 = vrot.lane.b32.xlu0 %v722_v9, %s3588_s27  ;;  %v122_v9 = vld [vmem:[#allocation4 + $0x20] sm:$0xff] }
 0x692   :  { %3199 = vmatmul.msk.f32.gmra.mxu0 %vm140_vm0, %v122_v9 }
 0x693   :  { %652 = vrot.lane.b32.xlu2 %v642_v13, %s3588_s27 }
 0x6ed   :  { %v653_v14 = vpop.permute.xlu2 %652 }
 0x6ee   :  { %3221 = vmatmul.msk.f32.vlgmr.msrb.gmra.mxu2 %vm280_vm1, %v653_v14  ;;  %3222 = vmatmul.msk.f32.vlgmr.msrb.gmra.mxu3 %vm280_vm1, %v653_v14 }
 0x6ef   :  { %931 = vmatpush.msrb.mxu3 %v3685_v0  ;;  %867 = vmatpush.msrb.mxu2 %v3816_v11 }
 0x6f1   :  { %932 = vmatpush.msrb.mxu3 %v3687_v2  ;;  %868 = vmatpush.msrb.mxu2 %v3821_v12 }
 0x6f3   :  { %933 = vmatpush.msrb.mxu3 %v3690_v5  ;;  %869 = vmatpush.msrb.mxu2 %v3827_v15 }
 0x6f5   :  { %934 = vmatpush.msrb.mxu3 %v3695_v6  ;;  %870 = vmatpush.msrb.mxu2 %v3834_v16 }
 0x703   :  { %v737_v17 = vpop.permute.xlu0 %736 }
 0x704   :  { %3224 = vmatmul.msk.f32.vlgmr.msra.gmra.mxu1 %vm280_vm1, %v737_v17  ;;  %3225 = vmatmul.msk.f32.vlgmr.msra.gmra.mxu2 %vm280_vm1, %v737_v17 }
 0x705   :  { %3226 = vmatmul.msk.f32.vlgmr.msra.gmra.mxu3 %vm280_vm1, %v737_v17  ;;  %951 = vmatpush.msra.mxu1 %v3730_v26 }
 0x706   :  { %971 = vmatpush.msra.mxu2 %v3758_v33  ;;  %1026 = vmatpush.msra.mxu3 %v3722_v24 }
 0x707   :  { %952 = vmatpush.msra.mxu1 %v3739_v28 }
 0x708   :  { %972 = vmatpush.msra.mxu2 %v3764_v34  ;;  %1027 = vmatpush.msra.mxu3 %v3727_v25 }
 0x709   :  { %953 = vmatpush.msra.mxu1 %v3742_v29 }
 0x70a   :  { %973 = vmatpush.msra.mxu2 %v3768_v35  ;;  %1028 = vmatpush.msra.mxu3 %v3736_v27 }
 0x70b   :  { %954 = vmatpush.msra.mxu1 %v3755_v32 }
 0x70c   :  { %974 = vmatpush.msra.mxu2 %v3771_v36  ;;  %1029 = vmatpush.msra.mxu3 %v3748_v30 }
 0x70f   :  { %v218_v1 = vpop.f32.mrf.mxu0 }
 0x710   :  { %v219_v14 = vadd.f32 %v3706_v8, %v218_v1 }
 0x771   :  { %v693_v19 = vpop.f32.mrf.mxu3  ;;  %v673_v37 = vpop.f32.mrf.mxu2 }
 0x772   :  { %v696_v20 = vadd.f32 %v693_v19, %v618_v18 }
 0x774   :  { %v697_v21 = vadd.f32 %v696_v20, %v3872_v31 }
 0x776   :  { %3223 = vst.msk [vmem:[%s4670_s11 + $0x8] sm:$0xff] %vm519_vm2, %v697_v21 }
 0x781   :  { %v757_v38 = vpop.f32.mrf.mxu1 }
 0x782   :  { %v881_v39 = vadd.f32 %v757_v38, %v216_v23 }
 0x784   :  { %3340 = vtanh.f32 %v881_v39 }
 0x787   :  { %v777_v40 = vpop.f32.mrf.mxu2 }
 0x788   :  { %v800_v41 = vadd.f32 %v777_v40, %v673_v37  ;;  %v797_v13 = vpop.f32.mrf.mxu3 }
 0x78a   :  { %v3341_v42 = vpop.eup %3340  ;;  %v801_v44 = vadd.f32 %v3796_v43, %v800_v41 }
 0x78b   :  { %887 = vrot.lane.b32.xlu2 %v3341_v42, %s3587_s14  ;;  %v883_v46 = vmul.f32 0.5, %v3341_v42 }
 0x78c   :  { %3342 = vtanh.f32 %v801_v44 }
 0x78d   :  { %v884_v47 = vadd.f32 0.5, %v883_v46 }
 0x78f   :  { %v885_v54 = vmul.f32 %v884_v47, %v3886_v60 }
 0x792   :  { %v3343_v45 = vpop.eup %3342 }
 0x793   :  { %807 = vrot.lane.b32.xlu1 %v3343_v45, %s3587_s14  ;;  %v803_v50 = vmul.f32 0.5, %v3343_v45 }
 0x795   :  { %v804_v51 = vadd.f32 0.5, %v803_v50 }
 0x797   :  { %v805_v58 = vmul.f32 %v804_v51, %v3890_v63 }
 0x7e5   :  { %v888_v48 = vpop.permute.xlu2 %887 }
 0x7e6   :  { %v890_v49 = vmul.f32 %v888_v48, %v884_v47 }
 0x7e8   :  { %892 = vrot.lane.b32.xlu1 %v890_v49, %s3588_s27 }
 0x805   :  { %v808_v52 = vpop.permute.xlu1 %807 }
 0x806   :  { %v810_v53 = vmul.f32 %v808_v52, %v804_v51 }
 0x808   :  { %812 = vrot.lane.b32.xlu0 %v810_v53, %s3588_s27 }
 0x85a   :  { %v893_v55 = vpop.permute.xlu1 %892 }
 0x85b   :  { %v3935_v56 = vadd.f32 %v893_v55, %v885_v54 }
 0x85d   :  { %3344 = vtanh.f32 %v3935_v56 }
 0x863   :  { %v3345_v57 = vpop.eup %3344 }
 0x864   :  { %898 = vrot.lane.b32.xlu0 %v3345_v57, %s3587_s14 }
 0x87a   :  { %v813_v59 = vpop.permute.xlu0 %812 }
 0x87b   :  { %v3940_v61 = vadd.f32 %v813_v59, %v805_v58  ;;  %v123_v58 = vld [vmem:[#allocation4 + $0x28] sm:$0xff] }
 0x87c   :  { %3200 = vmatmul.msk.f32.gmra.mxu0 %vm140_vm0, %v123_v58 }
 0x87d   :  { %3346 = vtanh.f32 %v3940_v61 }
 0x883   :  { %v3347_v62 = vpop.eup %3346 }
 0x884   :  { %818 = vrot.lane.b32.xlu2 %v3347_v62, %s3587_s14 }
 0x8d6   :  { %v899_v3 = vpop.permute.xlu0 %898 }
 0x8d7   :  { %v901_v60 = vmul.f32 %v899_v3, %v884_v47 }
 0x8d9   :  { %915 = vrot.lane.b32.xlu2 %v901_v60, %s3588_s27 }
 0x8de   :  { %v819_v4 = vpop.permute.xlu2 %818 }
 0x8df   :  { %v821_v7 = vmul.f32 %v819_v4, %v804_v51 }
 0x8e1   :  { %831 = vrot.lane.b32.xlu1 %v821_v7, %s3588_s27 }
 0x933   :  { %v916_v63 = vpop.permute.xlu2 %915 }
 0x934   :  { %3230 = vmatmul.msk.f32.vlgmr.msrb.gmra.mxu3 %vm280_vm1, %v916_v63 }
 0x935   :  { %1130 = vmatpush.msrb.mxu3 %v3730_v26 }
 0x937   :  { %1131 = vmatpush.msrb.mxu3 %v3739_v28 }
 0x939   :  { %1132 = vmatpush.msrb.mxu3 %v3742_v29 }
 0x93b   :  { %1133 = vmatpush.msrb.mxu3 %v3755_v32 }
 0x953   :  { %v832_v10 = vpop.permute.xlu1 %831 }
 0x954   :  { %3227 = vmatmul.msk.f32.vlgmr.msrb.gmra.mxu1 %vm280_vm1, %v832_v10  ;;  %3228 = vmatmul.msk.f32.vlgmr.msrb.gmra.mxu2 %vm280_vm1, %v832_v10 }
 0x955   :  { %1110 = vmatpush.msrb.mxu2 %v3685_v0  ;;  %1046 = vmatpush.msrb.mxu1 %v3816_v11 }
 0x957   :  { %1111 = vmatpush.msrb.mxu2 %v3687_v2  ;;  %1047 = vmatpush.msrb.mxu1 %v3821_v12 }
 0x959   :  { %1112 = vmatpush.msrb.mxu2 %v3690_v5  ;;  %1048 = vmatpush.msrb.mxu1 %v3827_v15 }
 0x95b   :  { %1113 = vmatpush.msrb.mxu2 %v3695_v6  ;;  %1049 = vmatpush.msrb.mxu1 %v3834_v16 }
 0x95c   :  { %3231 = vmatmul.msk.f32.vlgmr.msra.gmra.mxu1 %vm280_vm1, %v916_v63  ;;  %3232 = vmatmul.msk.f32.vlgmr.msra.gmra.mxu2 %vm280_vm1, %v916_v63 }
 0x95d   :  { %1150 = vmatpush.msra.mxu1 %v3758_v33  ;;  %1205 = vmatpush.msra.mxu2 %v3722_v24 }
 0x95f   :  { %1151 = vmatpush.msra.mxu1 %v3764_v34  ;;  %1206 = vmatpush.msra.mxu2 %v3727_v25 }
 0x961   :  { %1152 = vmatpush.msra.mxu1 %v3768_v35  ;;  %1207 = vmatpush.msra.mxu2 %v3736_v27 }
 0x963   :  { %1153 = vmatpush.msra.mxu1 %v3771_v36  ;;  %1208 = vmatpush.msra.mxu2 %v3748_v30 }
 0x9b7   :  { %v936_v17 = vpop.f32.mrf.mxu3 }
 0x9b8   :  { %v1060_v18 = vadd.f32 %v936_v17, %v219_v14 }
 0x9ba   :  { %3348 = vtanh.f32 %v1060_v18 }
 0x9c0   :  { %v3349_v24 = vpop.eup %3348 }
 0x9c1   :  { %1066 = vrot.lane.b32.xlu1 %v3349_v24, %s3587_s14  ;;  %v1062_v37 = vmul.f32 0.5, %v3349_v24 }
 0x9c3   :  { %v1063_v38 = vadd.f32 0.5, %v1062_v37 }
 0x9c5   :  { %v1064_v46 = vmul.f32 %v1063_v38, %v3935_v56 }
 0x9d1   :  { %v852_v19 = vpop.f32.mrf.mxu1 }
 0x9d7   :  { %v872_v25 = vpop.f32.mrf.mxu2 }
 0x9d8   :  { %v875_v20 = vadd.f32 %v872_v25, %v797_v13 }
 0x9d9   :  { %v956_v21 = vpop.f32.mrf.mxu1 }
 0x9da   :  { %v876_v27 = vadd.f32 %v875_v20, %v3872_v31  ;;  %v979_v22 = vadd.f32 %v956_v21, %v852_v19 }
 0x9dc   :  { %3229 = vst.msk [vmem:[%s4670_s11 + $0x10] sm:$0xff] %vm519_vm2, %v876_v27  ;;  %v980_v30 = vadd.f32 %v3796_v43, %v979_v22 }
 0x9de   :  { %3350 = vtanh.f32 %v980_v30  ;;  %v124_v30 = vld [vmem:[#allocation4 + $0x30] sm:$0xff] }
 0x9df   :  { %3201 = vmatmul.msk.f32.gmra.mxu0 %vm140_vm0, %v124_v30 }
 0x9e4   :  { %v3351_v23 = vpop.eup %3350 }
 0x9e5   :  { %986 = vrot.lane.b32.xlu0 %v3351_v23, %s3587_s14  ;;  %v982_v41 = vmul.f32 0.5, %v3351_v23 }
 0x9e7   :  { %v983_v42 = vadd.f32 0.5, %v982_v41 }
 0x9e9   :  { %v984_v50 = vmul.f32 %v983_v42, %v3940_v61 }
 0xa33   :  { %v1067_v39 = vpop.permute.xlu1 %1066 }
 0xa34   :  { %v1069_v40 = vmul.f32 %v1067_v39, %v1063_v38 }
 0xa36   :  { %1071 = vrot.lane.b32.xlu0 %v1069_v40, %s3588_s27 }
 0xa57   :  { %v987_v44 = vpop.permute.xlu0 %986 }
 0xa58   :  { %v989_v45 = vmul.f32 %v987_v44, %v983_v42 }
 0xa5a   :  { %991 = vrot.lane.b32.xlu2 %v989_v45, %s3588_s27 }
 0xaa8   :  { %v1072_v47 = vpop.permute.xlu0 %1071 }
 0xaa9   :  { %v3984_v48 = vadd.f32 %v1072_v47, %v1064_v46 }
 0xaab   :  { %3352 = vtanh.f32 %v3984_v48 }
 0xab1   :  { %v3353_v49 = vpop.eup %3352 }
 0xab2   :  { %1077 = vrot.lane.b32.xlu2 %v3353_v49, %s3587_s14 }
 0xab4   :  { %v992_v51 = vpop.permute.xlu2 %991 }
 0xab5   :  { %v3989_v52 = vadd.f32 %v992_v51, %v984_v50 }
 0xab7   :  { %3354 = vtanh.f32 %v3989_v52 }
 0xabd   :  { %v3355_v53 = vpop.eup %3354 }
 0xabe   :  { %997 = vrot.lane.b32.xlu1 %v3355_v53, %s3587_s14 }
 0xb0c   :  { %v1078_v54 = vpop.permute.xlu2 %1077 }
 0xb0d   :  { %v1080_v55 = vmul.f32 %v1078_v54, %v1063_v38 }
 0xb0f   :  { %1094 = vrot.lane.b32.xlu1 %v1080_v55, %s3588_s27 }
 0xb30   :  { %v998_v56 = vpop.permute.xlu1 %997 }
 0xb31   :  { %v1000_v57 = vmul.f32 %v998_v56, %v983_v42 }
 0xb33   :  { %1010 = vrot.lane.b32.xlu0 %v1000_v57, %s3588_s27 }
 0xb81   :  { %v1095_v59 = vpop.permute.xlu1 %1094 }
 0xb82   :  { %3236 = vmatmul.msk.f32.vlgmr.msrb.gmra.mxu2 %vm280_vm1, %v1095_v59 }
 0xb83   :  { %1309 = vmatpush.msrb.mxu2 %v3730_v26 }
 0xb85   :  { %1310 = vmatpush.msrb.mxu2 %v3739_v28 }
 0xb87   :  { %1311 = vmatpush.msrb.mxu2 %v3742_v29 }
 0xb89   :  { %1312 = vmatpush.msrb.mxu2 %v3755_v32 }
 0xba5   :  { %v1011_v61 = vpop.permute.xlu0 %1010 }
 0xba6   :  { %3233 = vmatmul.msk.f32.vlgmr.msra.gmra.mxu3 %vm280_vm1, %v1011_v61  ;;  %3234 = vmatmul.msk.f32.vlgmr.msrb.gmra.mxu1 %vm280_vm1, %v1011_v61 }
 0xba7   :  { %1289 = vmatpush.msrb.mxu1 %v3685_v0  ;;  %1225 = vmatpush.msra.mxu3 %v3816_v11  ;;  %v976_v0 = vpop.f32.mrf.mxu2 }
 0xba9   :  { %1290 = vmatpush.msrb.mxu1 %v3687_v2  ;;  %1226 = vmatpush.msra.mxu3 %v3821_v12  ;;  %v221_v2 = vpop.f32.mrf.mxu0 }
 0xbab   :  { %1291 = vmatpush.msrb.mxu1 %v3690_v5  ;;  %1227 = vmatpush.msra.mxu3 %v3827_v15  ;;  %v222_v5 = vadd.f32 %v3706_v8, %v221_v2 }
 0xbad   :  { %1292 = vmatpush.msrb.mxu1 %v3695_v6  ;;  %1228 = vmatpush.msra.mxu3 %v3834_v16 }
 0xbae   :  { %3237 = vmatmul.msk.f32.vlgmr.msrb.gmra.mxu3 %vm280_vm1, %v1095_v59  ;;  %3238 = vmatmul.msk.f32.vlgmr.msra.gmra.mxu1 %vm280_vm1, %v1095_v59 }
 0xbaf   :  { %1329 = vmatpush.msrb.mxu3 %v3758_v33 }
 0xbb1   :  { %1330 = vmatpush.msrb.mxu3 %v3764_v34  ;;  %v224_v41 = vpop.f32.mrf.mxu0 }
 0xbb2   :  { %v225_v42 = vadd.f32 %v3706_v8, %v224_v41 }
 0xbb3   :  { %1331 = vmatpush.msrb.mxu3 %v3768_v35 }
 0xbb5   :  { %1332 = vmatpush.msrb.mxu3 %v3771_v36 }
 0xc05   :  { %v1115_v26 = vpop.f32.mrf.mxu2 }
 0xc06   :  { %v1239_v6 = vadd.f32 %v1115_v26, %v222_v5 }
 0xc08   :  { %3356 = vtanh.f32 %v1239_v6 }
 0xc0e   :  { %v3357_v28 = vpop.eup %3356 }
 0xc0f   :  { %1245 = vrot.lane.b32.xlu0 %v3357_v28, %s3587_s14  ;;  %v1241_v60 = vmul.f32 0.5, %v3357_v28 }
 0xc11   :  { %v1242_v4 = vadd.f32 0.5, %v1241_v60  ;;  %v4080_v60 = vld [vmem:[%s4668_s9 + $0x30] sm:$0xff] }
 0xc12   :  { %1384 = vmatpush.msra.mxu1 %v4080_v60 }
 0xc13   :  { %v1243_v14 = vmul.f32 %v1242_v4, %v3984_v48 }
 0xc23   :  { %v1051_v29 = vpop.f32.mrf.mxu1 }
 0xc24   :  { %v1054_v32 = vadd.f32 %v1051_v29, %v976_v0 }
 0xc26   :  { %v1055_v33 = vadd.f32 %v1054_v32, %v3872_v31  ;;  %v4064_v32 = vld [vmem:[#allocation9 + $0x48] sm:$0xff] }
 0xc28   :  { %3235 = vst.msk [vmem:[%s4670_s11 + $0x18] sm:$0xff] %vm519_vm2, %v1055_v33  ;;  %v4066_v33 = vld [vmem:[#allocation9 + $0x30] sm:$0xff] }
 0xc29   :  { %v1031_v34 = vpop.f32.mrf.mxu3 }
 0xc2b   :  { %v1155_v40 = vpop.f32.mrf.mxu1 }
 0xc31   :  { %v1135_v35 = vpop.f32.mrf.mxu3 }
 0xc32   :  { %v1158_v36 = vadd.f32 %v1135_v35, %v1031_v34  ;;  %v4069_v34 = vld [vmem:[#allocation9 + $0x18] sm:$0xff]  ;;  %v4072_v35 = vld [vmem:[#allocation9] sm:$0xff] }
 0xc34   :  { %v1159_v62 = vadd.f32 %v3796_v43, %v1158_v36 }
 0xc36   :  { %3358 = vtanh.f32 %v1159_v62 }
 0xc3c   :  { %v3359_v3 = vpop.eup %3358 }
 0xc3d   :  { %1165 = vrot.lane.b32.xlu2 %v3359_v3, %s3587_s14  ;;  %v1161_v63 = vmul.f32 0.5, %v3359_v3  ;;  %v125_v3 = vld [vmem:[#allocation4 + $0x38] sm:$0xff] }
 0xc3e   :  { %3202 = vmatmul.msk.f32.gmra.mxu0 %vm140_vm0, %v125_v3 }
 0xc3f   :  { %v1162_v10 = vadd.f32 0.5, %v1161_v63 }
 0xc41   :  { %v1163_v19 = vmul.f32 %v1162_v10, %v3989_v52 }
 0xc81   :  { %v1246_v7 = vpop.permute.xlu0 %1245 }
 0xc82   :  { %v1248_v9 = vmul.f32 %v1246_v7, %v1242_v4  ;;  %v4092_v7 = vld [vmem:[%s4668_s9 + $0x10] sm:$0xff] }
 0xc84   :  { %1250 = vrot.lane.b32.xlu2 %v1248_v9, %s3588_s27  ;;  %v4099_v9 = vld [vmem:[%s4668_s9] sm:$0xff] }
 0xc97   :  { %v1166_v13 = vpop.permute.xlu2 %1165 }
 0xc98   :  { %v1168_v1 = vmul.f32 %v1166_v13, %v1162_v10  ;;  %v4109_v13 = vld [vmem:[#allocation9 + $0x58] sm:$0xff] }
 0xc9a   :  { %1170 = vrot.lane.b32.xlu1 %v1168_v1, %s3588_s27  ;;  %v4111_v1 = vld [vmem:[#allocation9 + $0x38] sm:$0xff] }
 0xcde   :  { %v1251_v17 = vpop.permute.xlu2 %1250 }
 0xcdf   :  { %v1253_v18 = vadd.f32 %v1251_v17, %v1243_v14  ;;  %v4115_v14 = vld [vmem:[#allocation9 + $0x40] sm:$0xff] }
 0xce0   :  { %v4117_v17 = vld [vmem:[#allocation9 + $0x20] sm:$0xff] }
 0xce1   :  { %3360 = vtanh.f32 %v1253_v18 }
 0xce7   :  { %v3361_v24 = vpop.eup %3360 }
 0xce8   :  { %1256 = vrot.lane.b32.xlu1 %v3361_v24, %s3587_s14  ;;  %v4125_v24 = vld [vmem:[#allocation9 + $0x8] sm:$0xff] }
 0xd0c   :  { %v1171_v25 = vpop.permute.xlu1 %1170 }
 0xd0d   :  { %v1173_v20 = vadd.f32 %v1171_v25, %v1163_v19  ;;  %v4127_v19 = vld [vmem:[#allocation9 + $0x10] sm:$0xff] }
 0xd0f   :  { %3362 = vtanh.f32 %v1173_v20 }
 0xd15   :  { %v3363_v21 = vpop.eup %3362 }
 0xd16   :  { %1176 = vrot.lane.b32.xlu0 %v3363_v21, %s3587_s14  ;;  %v227_v21 = vpop.f32.mrf.mxu0 }
 0xd5a   :  { %v1257_v27 = vpop.permute.xlu1 %1256 }
 0xd5b   :  { %v1259_v22 = vmul.f32 %v1257_v27, %v1242_v4  ;;  %v4085_v4 = vld [vmem:[%s4668_s9 + $0x20] sm:$0xff]  ;;  %v4155_v27 = vld [vmem:[#allocation8] ss:$0 sm:$0xff] }
 0xd5c   :  { %1385 = vmatpush.msra.mxu1 %v4085_v4 }
 0xd5d   :  { %1273 = vrot.lane.b32.xlu0 %v1259_v22, %s3588_s27  ;;  %v228_v22 = vadd.f32 %v4155_v27, %v227_v21 }
 0xd5e   :  { %1386 = vmatpush.msra.mxu1 %v4092_v7 }
 0xd60   :  { %1387 = vmatpush.msra.mxu1 %v4099_v9 }
 0xd88   :  { %v1177_v23 = vpop.permute.xlu0 %1176 }
 0xd89   :  { %v1179_v37 = vmul.f32 %v1177_v23, %v1162_v10  ;;  %v4107_v10 = vld [vmem:[#allocation9 + $0x50] sm:$0xff] }
 0xd8a   :  { %2025 = vmatpush.msrb.mxu0 %v4107_v10 }
 0xd8b   :  { %1189 = vrot.lane.b32.xlu2 %v1179_v37, %s3588_s27 }
 0xd8c   :  { %2026 = vmatpush.msrb.mxu0 %v4111_v1 }
 0xd8e   :  { %2027 = vmatpush.msrb.mxu0 %v4117_v17 }
 0xd90   :  { %2028 = vmatpush.msrb.mxu0 %v4125_v24 }
 0xd92   :  { %2184 = vmatpush.msra.mxu0 %v4064_v32 }
 0xd94   :  { %2185 = vmatpush.msra.mxu0 %v4066_v33 }
 0xd96   :  { %2186 = vmatpush.msra.mxu0 %v4069_v34 }
 0xd98   :  { %2187 = vmatpush.msra.mxu0 %v4072_v35 }
 0xdcf   :  { %v1274_v38 = vpop.permute.xlu0 %1273 }
 0xdd0   :  { %3242 = vmatmul.msk.f32.vlgmr.msrb.gmra.mxu1 %vm280_vm1, %v1274_v38 }
 0xdd1   :  { %1488 = vmatpush.msrb.mxu1 %v4107_v10 }
 0xdd3   :  { %1489 = vmatpush.msrb.mxu1 %v4111_v1 }
 0xdd5   :  { %1490 = vmatpush.msrb.mxu1 %v4117_v17 }
 0xdd7   :  { %1491 = vmatpush.msrb.mxu1 %v4125_v24 }
 0xde5   :  { %v1190_v39 = vpop.permute.xlu2 %1189 }
 0xde6   :  { %3239 = vmatmul.msk.f32.vlgmr.msra.gmra.mxu2 %vm280_vm1, %v1190_v39  ;;  %3240 = vmatmul.msk.f32.vlgmr.msra.gmra.mxu3 %vm280_vm1, %v1190_v39 }
 0xde7   :  { %1404 = vmatpush.msra.mxu2 %v3816_v11  ;;  %1468 = vmatpush.msra.mxu3 %v4064_v32 }
 0xde9   :  { %1405 = vmatpush.msra.mxu2 %v3821_v12  ;;  %1469 = vmatpush.msra.mxu3 %v4066_v33 }
 0xdeb   :  { %1406 = vmatpush.msra.mxu2 %v3827_v15  ;;  %1470 = vmatpush.msra.mxu3 %v4069_v34 }
 0xded   :  { %1407 = vmatpush.msra.mxu2 %v3834_v16  ;;  %1471 = vmatpush.msra.mxu3 %v4072_v35 }
 0xdee   :  { %3243 = vmatmul.msk.f32.vlgmr.msrb.gmra.mxu2 %vm280_vm1, %v1274_v38  ;;  %3244 = vmatmul.msk.f32.vlgmr.msrb.gmra.mxu3 %vm280_vm1, %v1274_v38 }
 0xdef   :  { %1563 = vmatpush.msrb.mxu3 %v4080_v60  ;;  %1508 = vmatpush.msrb.mxu2 %v4109_v13 }
 0xdf1   :  { %1564 = vmatpush.msrb.mxu3 %v4085_v4  ;;  %1509 = vmatpush.msrb.mxu2 %v4115_v14 }
 0xdf3   :  { %1565 = vmatpush.msrb.mxu3 %v4092_v7 }
 0xdf5   :  { %1566 = vmatpush.msrb.mxu3 %v4099_v9 }
 0xe4d   :  { %v1294_v44 = vpop.f32.mrf.mxu1 }
 0xe4e   :  { %v1418_v45 = vadd.f32 %v1294_v44, %v225_v42 }
 0xe50   :  { %3364 = vtanh.f32 %v1418_v45 }
 0xe56   :  { %v3365_v46 = vpop.eup %3364 }
 0xe57   :  { %1424 = vrot.lane.b32.xlu2 %v3365_v46, %s3587_s14  ;;  %v1420_v50 = vmul.f32 0.5, %v3365_v46 }
 0xe59   :  { %v1421_v51 = vadd.f32 0.5, %v1420_v50 }
 0xe5b   :  { %v1422_v58 = vmul.f32 %v1421_v51, %v1253_v18  ;;  %v4119_v18 = vld [vmem:[#allocation9 + $0x28] sm:$0xff] }
 0xe5c   :  { %1510 = vmatpush.msrb.mxu2 %v4119_v18 }
 0xe5e   :  { %1511 = vmatpush.msrb.mxu2 %v4127_v19 }
 0xe69   :  { %v1210_v11 = vpop.f32.mrf.mxu2  ;;  %v1230_v12 = vpop.f32.mrf.mxu3 }
 0xe6a   :  { %v1233_v47 = vadd.f32 %v1230_v12, %v1155_v40 }
 0xe6c   :  { %v1234_v15 = vadd.f32 %v1233_v47, %v3872_v31 }
 0xe6e   :  { %3241 = vst.msk [vmem:[%s4670_s11 + $0x20] sm:$0xff] %vm519_vm2, %v1234_v15 }
 0xe71   :  { %v1314_v16 = vpop.f32.mrf.mxu2 }
 0xe72   :  { %v1337_v48 = vadd.f32 %v1314_v16, %v1210_v11 }
 0xe74   :  { %v1338_v8 = vadd.f32 %v3796_v43, %v1337_v48 }
 0xe76   :  { %3366 = vtanh.f32 %v1338_v8 }
 0xe7c   :  { %v3367_v49 = vpop.eup %3366 }
 0xe7d   :  { %1344 = vrot.lane.b32.xlu1 %v3367_v49, %s3587_s14  ;;  %v1340_v54 = vmul.f32 0.5, %v3367_v49 }
 0xe7f   :  { %v1341_v55 = vadd.f32 0.5, %v1340_v54 }
 0xe81   :  { %v1342_v2 = vmul.f32 %v1341_v55, %v1173_v20  ;;  %v1334_v20 = vpop.f32.mrf.mxu3 }
 0xeb1   :  { %v1425_v52 = vpop.permute.xlu2 %1424 }
 0xeb2   :  { %v1427_v53 = vmul.f32 %v1425_v52, %v1421_v51 }
 0xeb4   :  { %1429 = vrot.lane.b32.xlu1 %v1427_v53, %s3588_s27 }
 0xeef   :  { %v1345_v56 = vpop.permute.xlu1 %1344 }
 0xef0   :  { %v1347_v57 = vmul.f32 %v1345_v56, %v1341_v55 }
 0xef2   :  { %1349 = vrot.lane.b32.xlu0 %v1347_v57, %s3588_s27 }
 0xf26   :  { %v1430_v59 = vpop.permute.xlu1 %1429 }
 0xf27   :  { %v4055_v61 = vadd.f32 %v1430_v59, %v1422_v58 }
 0xf29   :  { %3368 = vtanh.f32 %v4055_v61 }
 0xf2f   :  { %v3369_v0 = vpop.eup %3368 }
 0xf30   :  { %1435 = vrot.lane.b32.xlu0 %v3369_v0, %s3587_s14  ;;  %v126_v0 = vld [vmem:[#allocation4 + $0x40] sm:$0xff] }
 0xf31   :  { %3203 = vmatmul.msk.f32.gmra.mxu0 %vm140_vm0, %v126_v0 }
 0xf64   :  { %v1350_v5 = vpop.permute.xlu0 %1349 }
 0xf65   :  { %v4059_v26 = vadd.f32 %v1350_v5, %v1342_v2  ;;  %v4183_v2 = vld [vmem:[%s4668_s9 + $0x38] sm:$0xff]  ;;  %v4188_v5 = vld [vmem:[%s4668_s9 + $0x28] sm:$0xff] }
 0xf67   :  { %3370 = vtanh.f32 %v4059_v26 }
 0xf6d   :  { %v3371_v6 = vpop.eup %3370 }
 0xf6e   :  { %1355 = vrot.lane.b32.xlu2 %v3371_v6, %s3587_s14  ;;  %v4201_v6 = vld [vmem:[%s4668_s9 + $0x8] sm:$0xff] }
 0xfa2   :  { %v1436_v28 = vpop.permute.xlu0 %1435 }
 0xfa3   :  { %v1438_v29 = vmul.f32 %v1436_v28, %v1421_v51 }
 0xfa5   :  { %1452 = vrot.lane.b32.xlu2 %v1438_v29, %s3588_s27 }
 0xfc8   :  { %v1356_v36 = vpop.permute.xlu2 %1355 }
 0xfc9   :  { %v1358_v62 = vmul.f32 %v1356_v36, %v1341_v55 }
 0xfcb   :  { %1368 = vrot.lane.b32.xlu1 %v1358_v62, %s3588_s27  ;;  %v230_v62 = vpop.f32.mrf.mxu0 }
 0xfcc   :  { %v231_v3 = vadd.f32 %v4155_v27, %v230_v62 }
 0xfff   :  { %v1453_v63 = vpop.permute.xlu2 %1452 }
0x1000   :  { %3248 = vmatmul.msk.f32.vlgmr.msra.gmra.mxu3 %vm280_vm1, %v1453_v63 }
0x1001   :  { %1667 = vmatpush.msra.mxu3 %v4107_v10 }
0x1003   :  { %1668 = vmatpush.msra.mxu3 %v4111_v1 }
0x1005   :  { %1669 = vmatpush.msra.mxu3 %v4117_v17 }
0x1007   :  { %1670 = vmatpush.msra.mxu3 %v4125_v24 }
0x103d   :  { %v1369_v25 = vpop.permute.xlu1 %1368 }
0x103e   :  { %3245 = vmatmul.msk.f32.vlgmr.msra.gmra.mxu1 %vm280_vm1, %v1369_v25  ;;  %3246 = vmatmul.msk.f32.vlgmr.msra.gmra.mxu2 %vm280_vm1, %v1369_v25 }
0x103f   :  { %1647 = vmatpush.msra.mxu2 %v4064_v32  ;;  %1583 = vmatpush.msra.mxu1 %v4183_v2 }
0x1041   :  { %1648 = vmatpush.msra.mxu2 %v4066_v33  ;;  %1584 = vmatpush.msra.mxu1 %v4188_v5 }
0x1043   :  { %1649 = vmatpush.msra.mxu2 %v4069_v34 }
0x1045   :  { %1650 = vmatpush.msra.mxu2 %v4072_v35 }
0x1046   :  { %3249 = vmatmul.msk.f32.vlgmr.msrb.gmra.mxu1 %vm280_vm1, %v1453_v63  ;;  %3250 = vmatmul.msk.f32.vlgmr.msrb.gmra.mxu2 %vm280_vm1, %v1453_v63 }
0x1047   :  { %1742 = vmatpush.msrb.mxu2 %v4080_v60 }
0x1049   :  { %1743 = vmatpush.msrb.mxu2 %v4085_v4 }
0x104b   :  { %1744 = vmatpush.msrb.mxu2 %v4092_v7 }
0x104d   :  { %1745 = vmatpush.msrb.mxu2 %v4099_v9 }
0x1083   :  { %v1473_v30 = vpop.f32.mrf.mxu3 }
0x1084   :  { %v1597_v23 = vadd.f32 %v1473_v30, %v228_v22 }
0x1086   :  { %3372 = vtanh.f32 %v1597_v23 }
0x108c   :  { %v3373_v37 = vpop.eup %3372 }
0x108d   :  { %1603 = vrot.lane.b32.xlu1 %v3373_v37, %s3587_s14  ;;  %v1599_v11 = vmul.f32 0.5, %v3373_v37 }
0x108f   :  { %v1600_v12 = vadd.f32 0.5, %v1599_v11 }
0x1091   :  { %v1601_v50 = vmul.f32 %v1600_v12, %v4055_v61 }
0x10bb   :  { %v1389_v38 = vpop.f32.mrf.mxu1 }
0x10c1   :  { %v1409_v39 = vpop.f32.mrf.mxu2 }
0x10c2   :  { %v1412_v40 = vadd.f32 %v1409_v39, %v1334_v20  ;;  %v4241_v39 = vld [vmem:[#allocation11] ss:$0 sm:$0xff] }
0x10c3   :  { %v1493_v41 = vpop.f32.mrf.mxu1 }
0x10c4   :  { %v1413_v42 = vadd.f32 %v1412_v40, %v3872_v31  ;;  %v1516_v44 = vadd.f32 %v1493_v41, %v1389_v38 }
0x10c6   :  { %3247 = vst.msk [vmem:[%s4670_s11 + $0x28] sm:$0xff] %vm519_vm2, %v1413_v42  ;;  %v1517_v45 = vadd.f32 %v3796_v43, %v1516_v44 }
0x10c8   :  { %3374 = vtanh.f32 %v1517_v45 }
0x10c9   :  { %v1513_v36 = vpop.f32.mrf.mxu2 }
0x10ce   :  { %v3375_v46 = vpop.eup %3374 }
0x10cf   :  { %1523 = vrot.lane.b32.xlu0 %v3375_v46, %s3587_s14  ;;  %v1519_v16 = vmul.f32 0.5, %v3375_v46 }
0x10d1   :  { %v1520_v48 = vadd.f32 0.5, %v1519_v16 }
0x10d3   :  { %v1521_v53 = vmul.f32 %v1520_v48, %v4059_v26  ;;  %v4195_v26 = vld [vmem:[%s4668_s9 + $0x18] sm:$0xff] }
0x10d4   :  { %1585 = vmatpush.msra.mxu1 %v4195_v26 }
0x10d6   :  { %1586 = vmatpush.msra.mxu1 %v4201_v6 }
0x10d8   :  { %1687 = vmatpush.msrb.mxu1 %v4109_v13 }
0x10da   :  { %1688 = vmatpush.msrb.mxu1 %v4115_v14 }
0x10dc   :  { %1689 = vmatpush.msrb.mxu1 %v4119_v18 }
0x10de   :  { %1690 = vmatpush.msrb.mxu1 %v4127_v19 }
0x10ff   :  { %v1604_v47 = vpop.permute.xlu1 %1603 }
0x1100   :  { %v1606_v15 = vmul.f32 %v1604_v47, %v1600_v12 }
0x1102   :  { %1608 = vrot.lane.b32.xlu0 %v1606_v15, %s3588_s27 }
0x1141   :  { %v1524_v8 = vpop.permute.xlu0 %1523 }
0x1142   :  { %v1526_v49 = vmul.f32 %v1524_v8, %v1520_v48 }
0x1144   :  { %1528 = vrot.lane.b32.xlu2 %v1526_v49, %s3588_s27 }
0x1174   :  { %v1609_v51 = vpop.permute.xlu0 %1608 }
0x1175   :  { %v4169_v43 = vadd.f32 %v1609_v51, %v1601_v50 }
0x1177   :  { %3376 = vtanh.f32 %v4169_v43 }
0x117d   :  { %v3377_v52 = vpop.eup %3376 }
0x117e   :  { %1614 = vrot.lane.b32.xlu2 %v3377_v52, %s3587_s14 }
0x119e   :  { %v1529_v54 = vpop.permute.xlu2 %1528 }
0x119f   :  { %v4174_v55 = vadd.f32 %v1529_v54, %v1521_v53 }
0x11a1   :  { %3378 = vtanh.f32 %v4174_v55 }
0x11a7   :  { %v3379_v56 = vpop.eup %3378 }
0x11a8   :  { %1534 = vrot.lane.b32.xlu1 %v3379_v56, %s3587_s14  ;;  %v127_v56 = vld [vmem:[#allocation4 + $0x48] sm:$0xff] }
0x11a9   :  { %3204 = vmatmul.msk.f32.gmra.mxu0 %vm140_vm0, %v127_v56  ;;  %v132_v56 = vld [vmem:[#allocation4 + $0x70] sm:$0xff] }
0x11d8   :  { %v1615_v57 = vpop.permute.xlu2 %1614 }
0x11d9   :  { %v1617_v58 = vmul.f32 %v1615_v57, %v1600_v12 }
0x11db   :  { %1631 = vrot.lane.b32.xlu1 %v1617_v58, %s3588_s27 }
0x121a   :  { %v1535_v59 = vpop.permute.xlu1 %1534 }
0x121b   :  { %v1537_v61 = vmul.f32 %v1535_v59, %v1520_v48 }
0x121d   :  { %1547 = vrot.lane.b32.xlu0 %v1537_v61, %s3588_s27 }
0x1226   :  { %v233_v0 = vpop.f32.mrf.mxu0 }
0x124d   :  { %v1632_v28 = vpop.permute.xlu1 %1631 }
0x124e   :  { %3254 = vmatmul.msk.f32.vlgmr.msra.gmra.mxu2 %vm280_vm1, %v1632_v28 }
0x124f   :  { %1846 = vmatpush.msra.mxu2 %v4107_v10 }
0x1251   :  { %1847 = vmatpush.msra.mxu2 %v4111_v1 }
0x1253   :  { %1848 = vmatpush.msra.mxu2 %v4117_v17 }
0x1255   :  { %1849 = vmatpush.msra.mxu2 %v4125_v24 }
0x128f   :  { %v1548_v29 = vpop.permute.xlu0 %1547 }
0x1290   :  { %3251 = vmatmul.msk.f32.vlgmr.msrb.gmra.mxu3 %vm280_vm1, %v1548_v29  ;;  %3252 = vmatmul.msk.f32.vlgmr.msra.gmra.mxu1 %vm280_vm1, %v1548_v29 }
0x1291   :  { %1826 = vmatpush.msra.mxu1 %v4064_v32  ;;  %1762 = vmatpush.msrb.mxu3 %v4183_v2 }
0x1293   :  { %1827 = vmatpush.msra.mxu1 %v4066_v33  ;;  %1763 = vmatpush.msrb.mxu3 %v4188_v5 }
0x1295   :  { %1828 = vmatpush.msra.mxu1 %v4069_v34  ;;  %1764 = vmatpush.msrb.mxu3 %v4195_v26 }
0x1297   :  { %1829 = vmatpush.msra.mxu1 %v4072_v35  ;;  %1765 = vmatpush.msrb.mxu3 %v4201_v6 }
0x1298   :  { %3255 = vmatmul.msk.f32.vlgmr.msra.gmra.mxu3 %vm280_vm1, %v1632_v28  ;;  %3256 = vmatmul.msk.f32.vlgmr.msrb.gmra.mxu1 %vm280_vm1, %v1632_v28  ;;  %v234_v28 = vadd.f32 %v4155_v27, %v233_v0 }
0x1299   :  { %1866 = vmatpush.msra.mxu3 %v4109_v13  ;;  %1921 = vmatpush.msrb.mxu1 %v4080_v60 }
0x129b   :  { %1867 = vmatpush.msra.mxu3 %v4115_v14  ;;  %1922 = vmatpush.msrb.mxu1 %v4085_v4 }
0x129d   :  { %1868 = vmatpush.msra.mxu3 %v4119_v18  ;;  %1923 = vmatpush.msrb.mxu1 %v4092_v7 }
0x129f   :  { %1869 = vmatpush.msra.mxu3 %v4127_v19  ;;  %1924 = vmatpush.msrb.mxu1 %v4099_v9 }
0x12d1   :  { %v1652_v63 = vpop.f32.mrf.mxu2 }
0x12d2   :  { %v1776_v25 = vadd.f32 %v1652_v63, %v231_v3 }
0x12d4   :  { %3380 = vtanh.f32 %v1776_v25 }
0x12da   :  { %v3381_v20 = vpop.eup %3380 }
0x12db   :  { %1782 = vrot.lane.b32.xlu0 %v3381_v20, %s3587_s14  ;;  %v1778_v42 = vmul.f32 0.5, %v3381_v20 }
0x12dd   :  { %v1779_v44 = vadd.f32 0.5, %v1778_v42 }
0x12df   :  { %v1780_v16 = vmul.f32 %v1779_v44, %v4169_v43 }
0x130d   :  { %v1588_v21 = vpop.f32.mrf.mxu1 }
0x130e   :  { %v1591_v22 = vadd.f32 %v1588_v21, %v1513_v36 }
0x1310   :  { %v1592_v30 = vadd.f32 %v1591_v22, %v3872_v31 }
0x1312   :  { %3253 = vst.msk [vmem:[%s4670_s11 + $0x30] sm:$0xff] %vm519_vm2, %v1592_v30 }
0x1313   :  { %v1568_v23 = vpop.f32.mrf.mxu3 }
0x1315   :  { %v1692_v61 = vpop.f32.mrf.mxu1 }
0x131b   :  { %v1672_v37 = vpop.f32.mrf.mxu3 }
0x131c   :  { %v1695_v38 = vadd.f32 %v1672_v37, %v1568_v23 }
0x131e   :  { %v1696_v40 = vadd.f32 %v4241_v39, %v1695_v38 }
0x1320   :  { %3382 = vtanh.f32 %v1696_v40 }
0x1326   :  { %v3383_v41 = vpop.eup %3382 }
0x1327   :  { %1702 = vrot.lane.b32.xlu2 %v3383_v41, %s3587_s14  ;;  %v1698_v11 = vmul.f32 0.5, %v3383_v41 }
0x1329   :  { %v1699_v12 = vadd.f32 0.5, %v1698_v11 }
0x132b   :  { %v1700_v50 = vmul.f32 %v1699_v12, %v4174_v55 }
0x134d   :  { %v1783_v45 = vpop.permute.xlu0 %1782 }
0x134e   :  { %v1785_v46 = vmul.f32 %v1783_v45, %v1779_v44 }
0x1350   :  { %1787 = vrot.lane.b32.xlu2 %v1785_v46, %s3588_s27 }
0x1381   :  { %v1703_v47 = vpop.permute.xlu2 %1702 }
0x1382   :  { %v1705_v15 = vmul.f32 %v1703_v47, %v1699_v12 }
0x1384   :  { %1707 = vrot.lane.b32.xlu1 %v1705_v15, %s3588_s27 }
0x13aa   :  { %v1788_v48 = vpop.permute.xlu2 %1787 }
0x13ab   :  { %v4248_v8 = vadd.f32 %v1788_v48, %v1780_v16 }
0x13ad   :  { %3384 = vtanh.f32 %v4248_v8 }
0x13b3   :  { %v3385_v49 = vpop.eup %3384 }
0x13b4   :  { %1793 = vrot.lane.b32.xlu1 %v3385_v49, %s3587_s14 }
0x13f6   :  { %v1708_v51 = vpop.permute.xlu1 %1707 }
0x13f7   :  { %v4253_v52 = vadd.f32 %v1708_v51, %v1700_v50  ;;  %v128_v50 = vld [vmem:[#allocation4 + $0x50] sm:$0xff] }
0x13f8   :  { %3205 = vmatmul.msk.f32.gmra.mxu0 %vm140_vm0, %v128_v50 }
0x13f9   :  { %3386 = vtanh.f32 %v4253_v52 }
0x13ff   :  { %v3387_v53 = vpop.eup %3386 }
0x1400   :  { %1713 = vrot.lane.b32.xlu0 %v3387_v53, %s3587_s14  ;;  %v130_v53 = vld [vmem:[#allocation4 + $0x60] sm:$0xff] }
0x1426   :  { %v1794_v54 = vpop.permute.xlu1 %1793 }
0x1427   :  { %v1796_v43 = vmul.f32 %v1794_v54, %v1779_v44 }
0x1429   :  { %1810 = vrot.lane.b32.xlu0 %v1796_v43, %s3588_s27 }
0x1472   :  { %v1714_v57 = vpop.permute.xlu0 %1713 }
0x1473   :  { %v1716_v58 = vmul.f32 %v1714_v57, %v1699_v12  ;;  %v133_v57 = vld [vmem:[#allocation4 + $0x78] sm:$0xff] }
0x1475   :  { %1726 = vrot.lane.b32.xlu2 %v1716_v58, %s3588_s27 }
0x149b   :  { %v1811_v55 = vpop.permute.xlu0 %1810 }
0x149c   :  { %3260 = vmatmul.msk.f32.vlgmr.msra.gmra.mxu1 %vm280_vm1, %v1811_v55 }
0x149d   :  { %2045 = vmatpush.msra.mxu1 %v4109_v13 }
0x149f   :  { %2046 = vmatpush.msra.mxu1 %v4115_v14 }
0x14a1   :  { %2047 = vmatpush.msra.mxu1 %v4119_v18 }
0x14a3   :  { %2048 = vmatpush.msra.mxu1 %v4127_v19 }
0x14cf   :  { %v1727_v59 = vpop.permute.xlu2 %1726 }
0x14d0   :  { %3257 = vmatmul.msk.f32.vlgmr.msrb.gmra.mxu2 %vm280_vm1, %v1727_v59  ;;  %3258 = vmatmul.msk.f32.vlgmr.msrb.gmra.mxu3 %vm280_vm1, %v1727_v59 }
0x14d1   :  { %2005 = vmatpush.msrb.mxu3 %v4064_v32  ;;  %1941 = vmatpush.msrb.mxu2 %v4183_v2 }
0x14d3   :  { %2006 = vmatpush.msrb.mxu3 %v4066_v33  ;;  %1942 = vmatpush.msrb.mxu2 %v4188_v5 }
0x14d5   :  { %2007 = vmatpush.msrb.mxu3 %v4069_v34  ;;  %1943 = vmatpush.msrb.mxu2 %v4195_v26 }
0x14d7   :  { %2008 = vmatpush.msrb.mxu3 %v4072_v35  ;;  %1944 = vmatpush.msrb.mxu2 %v4201_v6 }
0x14d8   :  { %3261 = vmatmul.msk.f32.vlgmr.msra.gmra.mxu2 %vm280_vm1, %v1811_v55  ;;  %3262 = vmatmul.msk.f32.vlgmr.msra.gmra.mxu3 %vm280_vm1, %v1811_v55 }
0x14d9   :  { %2100 = vmatpush.msra.mxu2 %v4080_v60  ;;  %2120 = vmatpush.msra.mxu3 %v4183_v2 }
0x14db   :  { %2101 = vmatpush.msra.mxu2 %v4085_v4  ;;  %2121 = vmatpush.msra.mxu3 %v4188_v5 }
0x14dd   :  { %2102 = vmatpush.msra.mxu2 %v4092_v7  ;;  %2122 = vmatpush.msra.mxu3 %v4195_v26 }
0x14df   :  { %2103 = vmatpush.msra.mxu2 %v4099_v9  ;;  %2123 = vmatpush.msra.mxu3 %v4201_v6 }
0x1519   :  { %v1831_v29 = vpop.f32.mrf.mxu1 }
0x151a   :  { %v1955_v36 = vadd.f32 %v1831_v29, %v234_v28 }
0x151c   :  { %3388 = vtanh.f32 %v1955_v36 }
0x1522   :  { %v3389_v62 = vpop.eup %3388 }
0x1523   :  { %1961 = vrot.lane.b32.xlu2 %v3389_v62, %s3587_s14  ;;  %v1957_v37 = vmul.f32 0.5, %v3389_v62 }
0x1525   :  { %v1958_v38 = vadd.f32 0.5, %v1957_v37 }
0x1527   :  { %v1959_v11 = vmul.f32 %v1958_v38, %v4248_v8  ;;  %v129_v8 = vld [vmem:[#allocation4 + $0x58] sm:$0xff] }
0x1528   :  { %3206 = vmatmul.msk.f32.gmra.mxu0 %vm140_vm0, %v129_v8 }
0x1530   :  { %3207 = vmatmul.msk.f32.gmra.mxu0 %vm140_vm0, %v130_v53 }
0x1553   :  { %v1747_v3 = vpop.f32.mrf.mxu2  ;;  %v1767_v63 = vpop.f32.mrf.mxu3 }
0x1554   :  { %v1770_v25 = vadd.f32 %v1767_v63, %v1692_v61 }
0x1556   :  { %v1771_v20 = vadd.f32 %v1770_v25, %v3872_v31 }
0x1558   :  { %3259 = vst.msk [vmem:[%s4670_s11 + $0x38] sm:$0xff] %vm519_vm2, %v1771_v20 }
0x155b   :  { %v1851_v21 = vpop.f32.mrf.mxu2 }
0x155c   :  { %v1874_v22 = vadd.f32 %v1851_v21, %v1747_v3 }
0x155e   :  { %v1875_v30 = vadd.f32 %v4241_v39, %v1874_v22 }
0x1560   :  { %3390 = vtanh.f32 %v1875_v30 }
0x1566   :  { %v3391_v23 = vpop.eup %3390 }
0x1567   :  { %1881 = vrot.lane.b32.xlu1 %v3391_v23, %s3587_s14  ;;  %v1877_v42 = vmul.f32 0.5, %v3391_v23 }
0x1569   :  { %v1878_v44 = vadd.f32 0.5, %v1877_v42 }
0x156b   :  { %v1879_v16 = vmul.f32 %v1878_v44, %v4253_v52  ;;  %v131_v52 = vld [vmem:[#allocation4 + $0x68] sm:$0xff] }
0x156c   :  { %3208 = vmatmul.msk.f32.gmra.mxu0 %vm140_vm0, %v131_v52 }
0x1574   :  { %3209 = vmatmul.msk.f32.gmra.mxu0 %vm140_vm0, %v132_v56 }
0x157c   :  { %3210 = vmatmul.msk.f32.gmra.mxu0 %vm140_vm0, %v133_v57 }
0x157d   :  { %v1962_v40 = vpop.permute.xlu2 %1961 }
0x157e   :  { %v1964_v41 = vmul.f32 %v1962_v40, %v1958_v38 }
0x1580   :  { %1966 = vrot.lane.b32.xlu1 %v1964_v41, %s3588_s27 }
0x15d9   :  { %v1882_v45 = vpop.permute.xlu1 %1881 }
0x15da   :  { %v1884_v46 = vmul.f32 %v1882_v45, %v1878_v44 }
0x15dc   :  { %1886 = vrot.lane.b32.xlu0 %v1884_v46, %s3588_s27 }
0x15f2   :  { %v1967_v12 = vpop.permute.xlu1 %1966 }
0x15f3   :  { %v4297_v47 = vadd.f32 %v1967_v12, %v1959_v11 }
0x15f5   :  { %3392 = vtanh.f32 %v4297_v47 }
0x15fb   :  { %v3393_v15 = vpop.eup %3392 }
0x15fc   :  { %1972 = vrot.lane.b32.xlu0 %v3393_v15, %s3587_s14 }
0x164e   :  { %v1887_v48 = vpop.permute.xlu0 %1886 }
0x164f   :  { %v4302_v49 = vadd.f32 %v1887_v48, %v1879_v16 }
0x1651   :  { %3394 = vtanh.f32 %v4302_v49 }
0x1657   :  { %v3395_v51 = vpop.eup %3394 }
0x1658   :  { %1892 = vrot.lane.b32.xlu2 %v3395_v51, %s3587_s14 }
0x166e   :  { %v1973_v54 = vpop.permute.xlu0 %1972 }
0x166f   :  { %v1975_v43 = vmul.f32 %v1973_v54, %v1958_v38 }
0x1671   :  { %1989 = vrot.lane.b32.xlu2 %v1975_v43, %s3588_s27 }
0x16b2   :  { %v1893_v58 = vpop.permute.xlu2 %1892 }
0x16b3   :  { %v1895_v55 = vmul.f32 %v1893_v58, %v1878_v44 }
0x16b5   :  { %1905 = vrot.lane.b32.xlu1 %v1895_v55, %s3588_s27 }
0x16cb   :  { %v1990_v59 = vpop.permute.xlu2 %1989 }
0x16cc   :  { %3266 = vmatmul.msk.f32.vlgmr.msrb.gmra.mxu3 %vm280_vm1, %v1990_v59  ;;  %3267 = vmatmul.msk.f32.vlgmr.msrb.gmra.mxu0 %vm280_vm1, %v1990_v59 }
0x16cd   :  { %2279 = vmatpush.msrb.mxu3 %v4080_v60  ;;  %2299 = vmatpush.msrb.mxu0 %v4183_v2  ;;  %v1871_v60 = vpop.f32.mrf.mxu3 }
0x16cf   :  { %2280 = vmatpush.msrb.mxu3 %v4085_v4  ;;  %2300 = vmatpush.msrb.mxu0 %v4188_v5  ;;  %v236_v4 = vpop.f32.mrf.mxu0 }
0x16d1   :  { %2281 = vmatpush.msrb.mxu3 %v4092_v7  ;;  %2301 = vmatpush.msrb.mxu0 %v4195_v26  ;;  %v237_v7 = vadd.f32 %v4155_v27, %v236_v4 }
0x16d3   :  { %2282 = vmatpush.msrb.mxu3 %v4099_v9  ;;  %2302 = vmatpush.msrb.mxu0 %v4201_v6 }
0x16d7   :  { %v4341_v29 = vpop.f32.mrf.mxu0 }
0x16df   :  { %v4343_v36 = vpop.f32.mrf.mxu0 }
0x1727   :  { %v1906_v61 = vpop.permute.xlu1 %1905 }
0x1728   :  { %3263 = vmatmul.msk.f32.vlgmr.msrb.gmra.mxu1 %vm280_vm1, %v1906_v61  ;;  %3264 = vmatmul.msk.f32.vlgmr.msrb.gmra.mxu2 %vm280_vm1, %v1906_v61 }
0x1729   :  { %2204 = vmatpush.msrb.mxu1 %v4107_v10  ;;  %2224 = vmatpush.msrb.mxu2 %v4109_v13 }
0x172b   :  { %2205 = vmatpush.msrb.mxu1 %v4111_v1  ;;  %2225 = vmatpush.msrb.mxu2 %v4115_v14 }
0x172d   :  { %2206 = vmatpush.msrb.mxu1 %v4117_v17  ;;  %2226 = vmatpush.msrb.mxu2 %v4119_v18 }
0x172f   :  { %2207 = vmatpush.msrb.mxu1 %v4125_v24  ;;  %2227 = vmatpush.msrb.mxu2 %v4127_v19 }
0x1730   :  { %3268 = vmatmul.msk.f32.vlgmr.msra.gmra.mxu1 %vm280_vm1, %v1990_v59 }
0x1731   :  { %2363 = vmatpush.msra.mxu1 %v4064_v32  ;;  %v4345_v32 = vpop.f32.mrf.mxu0 }
0x1733   :  { %2364 = vmatpush.msra.mxu1 %v4066_v33 }
0x1735   :  { %2365 = vmatpush.msra.mxu1 %v4069_v34 }
0x1737   :  { %2366 = vmatpush.msra.mxu1 %v4072_v35 }
0x1739   :  { %v4347_v33 = vpop.f32.mrf.mxu0 }
0x1741   :  { %v4349_v34 = vpop.f32.mrf.mxu0 }
0x1749   :  { %v2030_v35 = vpop.f32.mrf.mxu0 }
0x174f   :  { %v2010_v9 = vpop.f32.mrf.mxu3 }
0x1750   :  { %v2134_v0 = vadd.f32 %v2010_v9, %v237_v7 }
0x1752   :  { %3396 = vtanh.f32 %v2134_v0 }
0x1758   :  { %v3397_v28 = vpop.eup %3396 }
0x1759   :  { %2140 = vrot.lane.b32.xlu1 %v3397_v28, %s3587_s14  ;;  %v2136_v30 = vmul.f32 0.5, %v3397_v28 }
0x175b   :  { %v2137_v23 = vadd.f32 0.5, %v2136_v30  ;;  %v243_v30 = vadd.f32 %v4155_v27, %v4343_v36 }
0x175d   :  { %v2138_v45 = vmul.f32 %v2137_v23, %v4297_v47 }
0x17a5   :  { %v1926_v62 = vpop.f32.mrf.mxu1 }
0x17a6   :  { %v2053_v3 = vadd.f32 %v2030_v35, %v1926_v62 }
0x17a8   :  { %v2054_v63 = vadd.f32 %v4241_v39, %v2053_v3 }
0x17aa   :  { %3398 = vtanh.f32 %v2054_v63 }
0x17ab   :  { %v1946_v25 = vpop.f32.mrf.mxu2 }
0x17ac   :  { %v1949_v20 = vadd.f32 %v1946_v25, %v1871_v60 }
0x17ae   :  { %v1950_v21 = vadd.f32 %v1949_v20, %v3872_v31 }
0x17b0   :  { %v3399_v22 = vpop.eup %3398  ;;  %3265 = vst.msk [vmem:[%s4670_s11 + $0x40] sm:$0xff] %vm519_vm2, %v1950_v21 }
0x17b1   :  { %2060 = vrot.lane.b32.xlu0 %v3399_v22, %s3587_s14  ;;  %v2056_v40 = vmul.f32 0.5, %v3399_v22 }
0x17b3   :  { %v2057_v41 = vadd.f32 0.5, %v2056_v40 }
0x17b5   :  { %v2058_v15 = vmul.f32 %v2057_v41, %v4302_v49 }
0x17cb   :  { %v2141_v37 = vpop.permute.xlu1 %2140 }
0x17cc   :  { %v2143_v38 = vmul.f32 %v2141_v37, %v2137_v23 }
0x17ce   :  { %2145 = vrot.lane.b32.xlu0 %v2143_v38, %s3588_s27 }
0x1823   :  { %v2061_v42 = vpop.permute.xlu0 %2060 }
0x1824   :  { %v2063_v44 = vmul.f32 %v2061_v42, %v2057_v41 }
0x1826   :  { %2065 = vrot.lane.b32.xlu2 %v2063_v44, %s3588_s27 }
0x1840   :  { %v2146_v46 = vpop.permute.xlu0 %2145 }
0x1841   :  { %v4361_v11 = vadd.f32 %v2146_v46, %v2138_v45 }
0x1843   :  { %3400 = vtanh.f32 %v4361_v11 }
0x1849   :  { %v3401_v12 = vpop.eup %3400 }
0x184a   :  { %2151 = vrot.lane.b32.xlu2 %v3401_v12, %s3587_s14 }
0x1880   :  { %v2066_v16 = vpop.permute.xlu2 %2065 }
0x1881   :  { %v4366_v48 = vadd.f32 %v2066_v16, %v2058_v15 }
0x1883   :  { %3402 = vtanh.f32 %v4366_v48 }
0x1889   :  { %v3403_v50 = vpop.eup %3402 }
0x188a   :  { %2071 = vrot.lane.b32.xlu1 %v3403_v50, %s3587_s14 }
0x18a4   :  { %v2152_v51 = vpop.permute.xlu2 %2151 }
0x18a5   :  { %v2154_v47 = vmul.f32 %v2152_v51, %v2137_v23 }
0x18a7   :  { %2168 = vrot.lane.b32.xlu1 %v2154_v47, %s3588_s27 }
0x18fc   :  { %v2072_v8 = vpop.permute.xlu1 %2071 }
0x18fd   :  { %v2074_v53 = vmul.f32 %v2072_v8, %v2057_v41 }
0x18ff   :  { %2084 = vrot.lane.b32.xlu0 %v2074_v53, %s3588_s27 }
0x1919   :  { %v2169_v54 = vpop.permute.xlu1 %2168 }
0x191a   :  { %3272 = vmatmul.msk.f32.vlgmr.msra.gmra.mxu0 %vm280_vm1, %v2169_v54  ;;  %3273 = vmatmul.msk.f32.vlgmr.msrb.gmra.mxu1 %vm280_vm1, %v2169_v54 }
0x191b   :  { %2478 = vmatpush.msrb.mxu1 %v4183_v2  ;;  %v240_v2 = vadd.f32 %v4155_v27, %v4341_v29 }
0x191d   :  { %2479 = vmatpush.msrb.mxu1 %v4188_v5 }
0x191f   :  { %2480 = vmatpush.msrb.mxu1 %v4195_v26 }
0x1921   :  { %2481 = vmatpush.msrb.mxu1 %v4201_v6 }
0x1971   :  { %v2085_v49 = vpop.permute.xlu0 %2084 }
0x1972   :  { %3269 = vmatmul.msk.f32.vlgmr.msra.gmra.mxu2 %vm280_vm1, %v2085_v49  ;;  %3270 = vmatmul.msk.f32.vlgmr.msra.gmra.mxu3 %vm280_vm1, %v2085_v49 }
0x1973   :  { %2383 = vmatpush.msra.mxu2 %v4107_v10  ;;  %2403 = vmatpush.msra.mxu3 %v4109_v13 }
0x1975   :  { %2384 = vmatpush.msra.mxu2 %v4111_v1  ;;  %2404 = vmatpush.msra.mxu3 %v4115_v14  ;;  %v2050_v1 = vpop.f32.mrf.mxu1 }
0x1977   :  { %2385 = vmatpush.msra.mxu2 %v4117_v17  ;;  %2405 = vmatpush.msra.mxu3 %v4119_v18 }
0x1979   :  { %2386 = vmatpush.msra.mxu2 %v4125_v24  ;;  %2406 = vmatpush.msra.mxu3 %v4127_v19 }
0x197a   :  { %3274 = vmatmul.msk.f32.vlgmr.msrb.gmra.mxu2 %vm280_vm1, %v2169_v54 }
0x1997   :  { %v2189_v10 = vpop.f32.mrf.mxu0  ;;  %v2209_v14 = vpop.f32.mrf.mxu1 }
0x1998   :  { %v2313_v5 = vadd.f32 %v2189_v10, %v240_v2 }
0x199a   :  { %3404 = vtanh.f32 %v2313_v5 }
0x19a0   :  { %v3405_v13 = vpop.eup %3404 }
0x19a1   :  { %2319 = vrot.lane.b32.xlu0 %v3405_v13, %s3587_s14  ;;  %v2315_v52 = vmul.f32 0.5, %v3405_v13 }
0x19a3   :  { %v2316_v56 = vadd.f32 0.5, %v2315_v52  ;;  %v4438_v52 = vld [vmem:[#allocation9 + $0x20] sm:$0xff] }
0x19a5   :  { %v2317_v4 = vmul.f32 %v2316_v56, %v4361_v11 }
0x19f5   :  { %v2105_v17 = vpop.f32.mrf.mxu2  ;;  %v2125_v26 = vpop.f32.mrf.mxu3 }
0x19f6   :  { %v2232_v18 = vadd.f32 %v2209_v14, %v2105_v17  ;;  %v2128_v6 = vadd.f32 %v2125_v26, %v2050_v1 }
0x19f8   :  { %v2233_v24 = vadd.f32 %v4241_v39, %v2232_v18  ;;  %v2129_v19 = vadd.f32 %v2128_v6, %v3872_v31  ;;  %v2522_v18 = vld [vmem:[#allocation9 + $0x48] sm:$0xff]  ;;  %v4433_v6 = vld [vmem:[#allocation9 + $0x50] sm:$0xff] }
0x19f9   :  { %2542 = vmatpush.msrb.mxu2 %v2522_v18 }
0x19fa   :  { %3406 = vtanh.f32 %v2233_v24  ;;  %3271 = vst.msk [vmem:[%s4670_s11 + $0x48] sm:$0xff] %vm519_vm2, %v2129_v19  ;;  %v2519_v24 = vld [vmem:[#allocation9 + $0x30] sm:$0xff]  ;;  %v4436_v19 = vld [vmem:[#allocation9 + $0x38] sm:$0xff] }
0x19fb   :  { %2543 = vmatpush.msrb.mxu2 %v2519_v24 }
0x19fd   :  { %v2229_v40 = vpop.f32.mrf.mxu2 }
0x1a00   :  { %v3407_v43 = vpop.eup %3406 }
0x1a01   :  { %2239 = vrot.lane.b32.xlu2 %v3407_v43, %s3587_s14  ;;  %v2235_v55 = vmul.f32 0.5, %v3407_v43  ;;  %v2516_v43 = vld [vmem:[#allocation9 + $0x18] sm:$0xff] }
0x1a02   :  { %2544 = vmatpush.msrb.mxu2 %v2516_v43 }
0x1a03   :  { %v2236_v59 = vadd.f32 0.5, %v2235_v55 }
0x1a05   :  { %v2237_v28 = vmul.f32 %v2236_v59, %v4366_v48 }
0x1a13   :  { %v2320_v57 = vpop.permute.xlu0 %2319 }
0x1a14   :  { %v2322_v58 = vmul.f32 %v2320_v57, %v2316_v56  ;;  %v4441_v57 = vld [vmem:[#allocation9 + $0x8] sm:$0xff] }
0x1a16   :  { %2324 = vrot.lane.b32.xlu2 %v2322_v58, %s3588_s27 }
0x1a5b   :  { %v2240_v61 = vpop.permute.xlu2 %2239 }
0x1a5c   :  { %v2242_v60 = vmul.f32 %v2240_v61, %v2236_v59  ;;  %v4454_v61 = vld [vmem:[%s4668_s9 + $0x20] sm:$0xff] }
0x1a5e   :  { %2244 = vrot.lane.b32.xlu1 %v2242_v60, %s3588_s27  ;;  %v4461_v60 = vld [vmem:[%s4668_s9 + $0x10] sm:$0xff] }
0x1a70   :  { %v2325_v7 = vpop.permute.xlu2 %2324 }
0x1a71   :  { %v2327_v9 = vadd.f32 %v2325_v7, %v2317_v4  ;;  %v4468_v4 = vld [vmem:[%s4668_s9] sm:$0xff] }
0x1a73   :  { %3408 = vtanh.f32 %v2327_v9 }
0x1a79   :  { %v3409_v0 = vpop.eup %3408 }
0x1a7a   :  { %2330 = vrot.lane.b32.xlu1 %v3409_v0, %s3587_s14  ;;  %v4478_v0 = vld [vmem:[#allocation9 + $0x40] sm:$0xff] }
0x1ad0   :  { %v2245_v29 = vpop.permute.xlu1 %2244 }
0x1ad1   :  { %v2247_v35 = vadd.f32 %v2245_v29, %v2237_v28  ;;  %v4481_v28 = vld [vmem:[#allocation9 + $0x28] sm:$0xff]  ;;  %v4484_v29 = vld [vmem:[#allocation9 + $0x10] sm:$0xff] }
0x1ad3   :  { %3410 = vtanh.f32 %v2247_v35 }
0x1ad9   :  { %v3411_v62 = vpop.eup %3410 }
0x1ada   :  { %2250 = vrot.lane.b32.xlu0 %v3411_v62, %s3587_s14  ;;  %v246_v62 = vadd.f32 %v4155_v27, %v4345_v32 }
0x1aec   :  { %v2331_v3 = vpop.permute.xlu1 %2330 }
0x1aed   :  { %v2333_v63 = vmul.f32 %v2331_v3, %v2316_v56  ;;  %v2513_v56 = vld [vmem:[#allocation9] sm:$0xff] }
0x1aee   :  { %2545 = vmatpush.msrb.mxu2 %v2513_v56 }
0x1aef   :  { %2347 = vrot.lane.b32.xlu0 %v2333_v63, %s3588_s27 }
0x1b4c   :  { %v2251_v25 = vpop.permute.xlu0 %2250 }
0x1b4d   :  { %v2253_v20 = vmul.f32 %v2251_v25, %v2236_v59  ;;  %v4449_v59 = vld [vmem:[%s4668_s9 + $0x30] sm:$0xff] }
0x1b4e   :  { %2458 = vmatpush.msra.mxu0 %v4449_v59 }
0x1b4f   :  { %2263 = vrot.lane.b32.xlu2 %v2253_v20, %s3588_s27 }
0x1b50   :  { %2459 = vmatpush.msra.mxu0 %v4454_v61 }
0x1b52   :  { %2460 = vmatpush.msra.mxu0 %v4461_v60 }
0x1b54   :  { %2461 = vmatpush.msra.mxu0 %v4468_v4 }
0x1b61   :  { %v2348_v21 = vpop.permute.xlu0 %2347 }
0x1b62   :  { %3278 = vmatmul.msk.f32.vlgmr.msra.gmra.mxu1 %vm280_vm1, %v2348_v21  ;;  %3279 = vmatmul.msk.f32.vlgmr.msra.gmra.mxu2 %vm280_vm1, %v2348_v21 }
0x1b63   :  { %2637 = vmatpush.msra.mxu1 %v4449_v59 }
0x1b65   :  { %2638 = vmatpush.msra.mxu1 %v4454_v61 }
0x1b67   :  { %2639 = vmatpush.msra.mxu1 %v4461_v60 }
0x1b69   :  { %2640 = vmatpush.msra.mxu1 %v4468_v4 }
0x1ba9   :  { %v2264_v22 = vpop.permute.xlu2 %2263 }
0x1baa   :  { %3275 = vmatmul.msk.f32.vlgmr.msrb.gmra.mxu3 %vm280_vm1, %v2264_v22  ;;  %3276 = vmatmul.msk.f32.vlgmr.msrb.gmra.mxu0 %vm280_vm1, %v2264_v22 }
0x1bab   :  { %2562 = vmatpush.msrb.mxu3 %v4433_v6 }
0x1bad   :  { %2563 = vmatpush.msrb.mxu3 %v4436_v19 }
0x1baf   :  { %2564 = vmatpush.msrb.mxu3 %v4438_v52 }
0x1bb1   :  { %2565 = vmatpush.msrb.mxu3 %v4441_v57 }
0x1bb2   :  { %3280 = vmatmul.msk.f32.vlgmr.msra.gmra.mxu3 %vm280_vm1, %v2348_v21 }
0x1bb3   :  { %2721 = vmatpush.msra.mxu3 %v2522_v18 }
0x1bb5   :  { %2722 = vmatpush.msra.mxu3 %v2519_v24 }
0x1bb7   :  { %2723 = vmatpush.msra.mxu3 %v2516_v43 }
0x1bb9   :  { %2724 = vmatpush.msra.mxu3 %v2513_v56 }
0x1bdf   :  { %v2368_v23 = vpop.f32.mrf.mxu1 }
0x1be0   :  { %v2492_v37 = vadd.f32 %v2368_v23, %v243_v30 }
0x1be2   :  { %3412 = vtanh.f32 %v2492_v37 }
0x1be5   :  { %v2388_v45 = vpop.f32.mrf.mxu2 }
0x1be8   :  { %v3413_v38 = vpop.eup %3412 }
0x1be9   :  { %2498 = vrot.lane.b32.xlu1 %v3413_v38, %s3587_s14  ;;  %v2494_v15 = vmul.f32 0.5, %v3413_v38 }
0x1beb   :  { %v2495_v16 = vadd.f32 0.5, %v2494_v15 }
0x1bed   :  { %v2496_v54 = vmul.f32 %v2495_v16, %v2327_v9  ;;  %v4476_v9 = vld [vmem:[#allocation9 + $0x58] sm:$0xff] }
0x1bee   :  { %2582 = vmatpush.msrb.mxu0 %v4476_v9 }
0x1bf0   :  { %2583 = vmatpush.msrb.mxu0 %v4478_v0 }
0x1bf2   :  { %2584 = vmatpush.msrb.mxu0 %v4481_v28 }
0x1bf4   :  { %2585 = vmatpush.msrb.mxu0 %v4484_v29 }
0x1c27   :  { %v2304_v41 = vpop.f32.mrf.mxu0 }
0x1c28   :  { %v2307_v42 = vadd.f32 %v2304_v41, %v2229_v40 }
0x1c2a   :  { %v2308_v44 = vadd.f32 %v2307_v42, %v3872_v31 }
0x1c2c   :  { %3277 = vst.msk [vmem:[%s4670_s11 + $0x50] sm:$0xff] %vm519_vm2, %v2308_v44 }
0x1c2d   :  { %v2284_v46 = vpop.f32.mrf.mxu3 }
0x1c2e   :  { %v2411_v11 = vadd.f32 %v2388_v45, %v2284_v46 }
0x1c30   :  { %v2412_v36 = vadd.f32 %v4241_v39, %v2411_v11 }
0x1c32   :  { %3414 = vtanh.f32 %v2412_v36 }
0x1c35   :  { %v2408_v20 = vpop.f32.mrf.mxu3 }
0x1c38   :  { %v3415_v12 = vpop.eup %3414 }
0x1c39   :  { %2418 = vrot.lane.b32.xlu2 %v3415_v12, %s3587_s14  ;;  %v2414_v51 = vmul.f32 0.5, %v3415_v12 }
0x1c3b   :  { %v2415_v47 = vadd.f32 0.5, %v2414_v51 }
0x1c3d   :  { %v2416_v5 = vmul.f32 %v2415_v47, %v2247_v35 }
0x1c5b   :  { %v2499_v48 = vpop.permute.xlu1 %2498 }
0x1c5c   :  { %v2501_v50 = vmul.f32 %v2499_v48, %v2495_v16 }
0x1c5e   :  { %2503 = vrot.lane.b32.xlu0 %v2501_v50, %s3588_s27 }
0x1c93   :  { %v2419_v8 = vpop.permute.xlu2 %2418 }
0x1c94   :  { %v2421_v53 = vmul.f32 %v2419_v8, %v2415_v47 }
0x1c96   :  { %2423 = vrot.lane.b32.xlu1 %v2421_v53, %s3588_s27 }
0x1cd0   :  { %v2504_v49 = vpop.permute.xlu0 %2503 }
0x1cd1   :  { %v4424_v2 = vadd.f32 %v2504_v49, %v2496_v54 }
0x1cd3   :  { %3416 = vtanh.f32 %v4424_v2 }
0x1cd9   :  { %v3417_v10 = vpop.eup %3416 }
0x1cda   :  { %2509 = vrot.lane.b32.xlu2 %v3417_v10, %s3587_s14  ;;  %v4526_v10 = vld [vmem:[%s4668_s9 + $0x38] sm:$0xff] }
0x1cdb   :  { %2657 = vmatpush.msra.mxu2 %v4526_v10 }
0x1d08   :  { %v2424_v13 = vpop.permute.xlu1 %2423 }
0x1d09   :  { %v4428_v1 = vadd.f32 %v2424_v13, %v2416_v5  ;;  %v4531_v5 = vld [vmem:[%s4668_s9 + $0x28] sm:$0xff]  ;;  %v4538_v13 = vld [vmem:[%s4668_s9 + $0x18] sm:$0xff] }
0x1d0a   :  { %2658 = vmatpush.msra.mxu2 %v4531_v5 }
0x1d0b   :  { %3418 = vtanh.f32 %v4428_v1 }
0x1d0c   :  { %2659 = vmatpush.msra.mxu2 %v4538_v13 }
0x1d11   :  { %v3419_v14 = vpop.eup %3418 }
0x1d12   :  { %2429 = vrot.lane.b32.xlu0 %v3419_v14, %s3587_s14 }
0x1d34   :  { %v2510_v17 = vpop.permute.xlu2 %2509 }
0x1d35   :  { %v2512_v26 = vmul.f32 %v2510_v17, %v2495_v16 }
0x1d37   :  { %2526 = vrot.lane.b32.xlu1 %v2512_v26, %s3588_s27  ;;  %v3450_v26 = vld [vmem:[#allocation8] ss:$0 sm:$0xff] }
0x1d84   :  { %v2430_v58 = vpop.permute.xlu0 %2429 }
0x1d85   :  { %v2432_v55 = vmul.f32 %v2430_v58, %v2415_v47 }
0x1d87   :  { %2442 = vrot.lane.b32.xlu2 %v2432_v55, %s3588_s27 }
0x1da9   :  { %v2527_v7 = vpop.permute.xlu1 %2526 }
0x1daa   :  { %3284 = vmatmul.msk.f32.vlgmr.msrb.gmra.mxu2 %vm280_vm1, %v2527_v7  ;;  %3285 = vmatmul.msk.f32.vlgmr.msrb.gmra.mxu3 %vm280_vm1, %v2527_v7 }
0x1dab   :  { %2836 = vmatpush.msrb.mxu3 %v4526_v10 }
0x1dad   :  { %2837 = vmatpush.msrb.mxu3 %v4531_v5 }
0x1daf   :  { %2838 = vmatpush.msrb.mxu3 %v4538_v13 }
0x1de1   :  { %v2443_v35 = vpop.permute.xlu2 %2442 }
0x1de2   :  { %3281 = vmatmul.msk.f32.vlgmr.msra.gmra.mxu0 %vm280_vm1, %v2443_v35  ;;  %3282 = vmatmul.msk.f32.vlgmr.msrb.gmra.mxu1 %vm280_vm1, %v2443_v35 }
0x1de3   :  { %2741 = vmatpush.msra.mxu0 %v4433_v6  ;;  %2761 = vmatpush.msrb.mxu1 %v4476_v9 }
0x1de5   :  { %2742 = vmatpush.msra.mxu0 %v4436_v19  ;;  %2762 = vmatpush.msrb.mxu1 %v4478_v0 }
0x1de7   :  { %2743 = vmatpush.msra.mxu0 %v4438_v52  ;;  %2763 = vmatpush.msrb.mxu1 %v4481_v28 }
0x1de9   :  { %2744 = vmatpush.msra.mxu0 %v4441_v57  ;;  %2764 = vmatpush.msrb.mxu1 %v4484_v29 }
0x1dea   :  { %3286 = vmatmul.msk.f32.vlgmr.msrb.gmra.mxu0 %vm280_vm1, %v2527_v7 }
0x1deb   :  { %2900 = vmatpush.msrb.mxu0 %v2522_v18  ;;  %v249_v18 = vadd.f32 %v3450_v26, %v4347_v33 }
0x1ded   :  { %2901 = vmatpush.msrb.mxu0 %v2519_v24 }
0x1def   :  { %2902 = vmatpush.msrb.mxu0 %v2516_v43 }
0x1df1   :  { %2903 = vmatpush.msrb.mxu0 %v2513_v56 }
0x1e2d   :  { %v2547_v3 = vpop.f32.mrf.mxu2  ;;  %v2567_v21 = vpop.f32.mrf.mxu3 }
0x1e2e   :  { %v2671_v63 = vadd.f32 %v2547_v3, %v246_v62 }
0x1e30   :  { %3420 = vtanh.f32 %v2671_v63 }
0x1e36   :  { %v3421_v25 = vpop.eup %3420 }
0x1e37   :  { %2677 = vrot.lane.b32.xlu1 %v3421_v25, %s3587_s14  ;;  %v2673_v32 = vmul.f32 0.5, %v3421_v25 }
0x1e39   :  { %v2674_v41 = vadd.f32 0.5, %v2673_v32 }
0x1e3b   :  { %v2675_v12 = vmul.f32 %v2674_v41, %v4424_v2 }
0x1e5f   :  { %v2463_v22 = vpop.f32.mrf.mxu0  ;;  %v2483_v30 = vpop.f32.mrf.mxu1 }
0x1e60   :  { %v2590_v23 = vadd.f32 %v2567_v21, %v2463_v22  ;;  %v2486_v37 = vadd.f32 %v2483_v30, %v2408_v20 }
0x1e62   :  { %v2591_v38 = vadd.f32 %v4241_v39, %v2590_v23  ;;  %v2487_v40 = vadd.f32 %v2486_v37, %v3872_v31 }
0x1e64   :  { %3422 = vtanh.f32 %v2591_v38  ;;  %3283 = vst.msk [vmem:[%s4670_s11 + $0x58] sm:$0xff] %vm519_vm2, %v2487_v40 }
0x1e67   :  { %v2587_v58 = vpop.f32.mrf.mxu0 }
0x1e6a   :  { %v3423_v27 = vpop.eup %3422 }
0x1e6b   :  { %2597 = vrot.lane.b32.xlu0 %v3423_v27, %s3587_s14  ;;  %v2593_v45 = vmul.f32 0.5, %v3423_v27 }
0x1e6d   :  { %v2594_v46 = vadd.f32 0.5, %v2593_v45  ;;  %v252_v45 = vadd.f32 %v3450_v26, %v4349_v34 }
0x1e6f   :  { %v2595_v50 = vmul.f32 %v2594_v46, %v4428_v1  ;;  %v4545_v1 = vld [vmem:[%s4668_s9 + $0x8] sm:$0xff] }
0x1e70   :  { %2660 = vmatpush.msra.mxu2 %v4545_v1  ;;  %2839 = vmatpush.msrb.mxu3 %v4545_v1 }
0x1e72   :  { %2816 = vmatpush.msrb.mxu2 %v4449_v59 }
0x1e74   :  { %2817 = vmatpush.msrb.mxu2 %v4454_v61 }
0x1e76   :  { %2818 = vmatpush.msrb.mxu2 %v4461_v60 }
0x1e78   :  { %2819 = vmatpush.msrb.mxu2 %v4468_v4 }
0x1ea9   :  { %v2678_v42 = vpop.permute.xlu1 %2677 }
0x1eaa   :  { %v2680_v44 = vmul.f32 %v2678_v42, %v2674_v41 }
0x1eac   :  { %2682 = vrot.lane.b32.xlu0 %v2680_v44, %s3588_s27 }
0x1edd   :  { %v2598_v11 = vpop.permute.xlu0 %2597 }
0x1ede   :  { %v2600_v36 = vmul.f32 %v2598_v11, %v2594_v46 }
0x1ee0   :  { %2602 = vrot.lane.b32.xlu2 %v2600_v36, %s3588_s27 }
0x1f1e   :  { %v2683_v15 = vpop.permute.xlu0 %2682 }
0x1f1f   :  { %v4512_v16 = vadd.f32 %v2683_v15, %v2675_v12 }
0x1f21   :  { %3424 = vtanh.f32 %v4512_v16 }
0x1f27   :  { %v3425_v48 = vpop.eup %3424 }
0x1f28   :  { %2688 = vrot.lane.b32.xlu2 %v3425_v48, %s3587_s14  ;;  %v3451_v48 = vld [vmem:[#allocation11] ss:$0 sm:$0xff] }
0x1f3a   :  { %v2603_v51 = vpop.permute.xlu2 %2602 }
0x1f3b   :  { %v4517_v47 = vadd.f32 %v2603_v51, %v2595_v50 }
0x1f3d   :  { %3426 = vtanh.f32 %v4517_v47 }
0x1f43   :  { %v3427_v8 = vpop.eup %3426 }
0x1f44   :  { %2608 = vrot.lane.b32.xlu1 %v3427_v8, %s3587_s14 }
0x1f82   :  { %v2689_v53 = vpop.permute.xlu2 %2688 }
0x1f83   :  { %v2691_v54 = vmul.f32 %v2689_v53, %v2674_v41 }
0x1f85   :  { %2705 = vrot.lane.b32.xlu1 %v2691_v54, %s3588_s27 }
0x1fb6   :  { %v2609_v49 = vpop.permute.xlu1 %2608 }
0x1fb7   :  { %v2611_v2 = vmul.f32 %v2609_v49, %v2594_v46 }
0x1fb9   :  { %2621 = vrot.lane.b32.xlu0 %v2611_v2, %s3588_s27 }
0x1ff7   :  { %v2706_v14 = vpop.permute.xlu1 %2705 }
0x1ff8   :  { %3290 = vmatmul.msk.f32.vlgmr.msra.gmra.mxu3 %vm280_vm1, %v2706_v14  ;;  %3291 = vmatmul.msk.f32.vlgmr.msra.gmra.mxu0 %vm280_vm1, %v2706_v14 }
0x1ff9   :  { %2995 = vmatpush.msra.mxu3 %v4449_v59  ;;  %3015 = vmatpush.msra.mxu0 %v4526_v10 }
0x1ffb   :  { %2996 = vmatpush.msra.mxu3 %v4454_v61  ;;  %3016 = vmatpush.msra.mxu0 %v4531_v5 }
0x1ffd   :  { %2997 = vmatpush.msra.mxu3 %v4461_v60  ;;  %3017 = vmatpush.msra.mxu0 %v4538_v13 }
0x1fff   :  { %2998 = vmatpush.msra.mxu3 %v4468_v4  ;;  %3018 = vmatpush.msra.mxu0 %v4545_v1 }
0x202b   :  { %v2622_v17 = vpop.permute.xlu0 %2621 }
0x202c   :  { %3287 = vmatmul.msk.f32.vlgmr.msra.gmra.mxu1 %vm280_vm1, %v2622_v17  ;;  %3288 = vmatmul.msk.f32.vlgmr.msra.gmra.mxu2 %vm280_vm1, %v2622_v17 }
0x202d   :  { %2920 = vmatpush.msra.mxu1 %v4433_v6  ;;  %2940 = vmatpush.msra.mxu2 %v4476_v9 }
0x202f   :  { %2921 = vmatpush.msra.mxu1 %v4436_v19  ;;  %2941 = vmatpush.msra.mxu2 %v4478_v0 }
0x2031   :  { %2922 = vmatpush.msra.mxu1 %v4438_v52  ;;  %2942 = vmatpush.msra.mxu2 %v4481_v28 }
0x2033   :  { %2923 = vmatpush.msra.mxu1 %v4441_v57  ;;  %2943 = vmatpush.msra.mxu2 %v4484_v29 }
0x2034   :  { %3292 = vmatmul.msk.f32.vlgmr.msrb.gmra.mxu1 %vm280_vm1, %v2706_v14 }
0x2035   :  { %3075 = vmatpush.msrb.mxu1 %v4433_v6 }
0x2037   :  { %3076 = vmatpush.msrb.mxu1 %v4436_v19 }
0x2039   :  { %3077 = vmatpush.msrb.mxu1 %v4438_v52 }
0x203b   :  { %3078 = vmatpush.msrb.mxu1 %v4441_v57 }
0x2075   :  { %v2746_v55 = vpop.f32.mrf.mxu0 }
0x207b   :  { %v2726_v24 = vpop.f32.mrf.mxu3 }
0x207c   :  { %v2850_v43 = vadd.f32 %v2726_v24, %v249_v18 }
0x207e   :  { %3428 = vtanh.f32 %v2850_v43 }
0x2084   :  { %v3429_v56 = vpop.eup %3428 }
0x2085   :  { %2856 = vrot.lane.b32.xlu0 %v3429_v56, %s3587_s14  ;;  %v2852_v33 = vmul.f32 0.5, %v3429_v56 }
0x2087   :  { %v2853_v4 = vadd.f32 0.5, %v2852_v33 }
0x2089   :  { %v2854_v25 = vmul.f32 %v2853_v4, %v4512_v16 }
0x20a9   :  { %v2642_v59 = vpop.f32.mrf.mxu1 }
0x20aa   :  { %v2769_v61 = vadd.f32 %v2746_v55, %v2642_v59 }
0x20ac   :  { %v2770_v6 = vadd.f32 %v4241_v39, %v2769_v61 }
0x20ae   :  { %3430 = vtanh.f32 %v2770_v6 }
0x20af   :  { %v2662_v19 = vpop.f32.mrf.mxu2 }
0x20b0   :  { %v2665_v52 = vadd.f32 %v2662_v19, %v2587_v58 }
0x20b2   :  { %v2666_v57 = vadd.f32 %v2665_v52, %v3872_v31 }
0x20b4   :  { %v3431_v60 = vpop.eup %3430  ;;  %3289 = vst.msk [vmem:[%s4670_s11 + $0x60] sm:$0xff] %vm519_vm2, %v2666_v57 }
0x20b5   :  { %2776 = vrot.lane.b32.xlu2 %v3431_v60, %s3587_s14  ;;  %v2772_v39 = vmul.f32 0.5, %v3431_v60 }
0x20b7   :  { %v2773_v62 = vadd.f32 0.5, %v2772_v39 }
0x20b9   :  { %v2774_v30 = vmul.f32 %v2773_v62, %v4517_v47 }
0x20f7   :  { %v2857_v7 = vpop.permute.xlu0 %2856 }
0x20f8   :  { %v2859_v35 = vmul.f32 %v2857_v7, %v2853_v4 }
0x20fa   :  { %2861 = vrot.lane.b32.xlu2 %v2859_v35, %s3588_s27 }
0x210f   :  { %v2777_v3 = vpop.permute.xlu2 %2776 }
0x2110   :  { %v2779_v63 = vmul.f32 %v2777_v3, %v2773_v62 }
0x2112   :  { %2781 = vrot.lane.b32.xlu1 %v2779_v63, %s3588_s27 }
0x2154   :  { %v2862_v20 = vpop.permute.xlu2 %2861 }
0x2155   :  { %v2864_v21 = vadd.f32 %v2862_v20, %v2854_v25 }
0x2157   :  { %3432 = vtanh.f32 %v2864_v21 }
0x215d   :  { %v3433_v22 = vpop.eup %3432 }
0x215e   :  { %2867 = vrot.lane.b32.xlu1 %v3433_v22, %s3587_s14 }
0x2184   :  { %v2782_v23 = vpop.permute.xlu1 %2781 }
0x2185   :  { %v2784_v37 = vadd.f32 %v2782_v23, %v2774_v30 }
0x2187   :  { %3434 = vtanh.f32 %v2784_v37 }
0x218d   :  { %v3435_v38 = vpop.eup %3434 }
0x218e   :  { %2787 = vrot.lane.b32.xlu0 %v3435_v38, %s3587_s14 }
0x21d0   :  { %v2868_v40 = vpop.permute.xlu1 %2867 }
0x21d1   :  { %v2870_v27 = vmul.f32 %v2868_v40, %v2853_v4 }
0x21d3   :  { %2884 = vrot.lane.b32.xlu0 %v2870_v27, %s3588_s27 }
0x2200   :  { %v2788_v32 = vpop.permute.xlu0 %2787 }
0x2201   :  { %v2790_v41 = vmul.f32 %v2788_v32, %v2773_v62 }
0x2203   :  { %2800 = vrot.lane.b32.xlu2 %v2790_v41, %s3588_s27 }
0x2245   :  { %v2885_v42 = vpop.permute.xlu0 %2884 }
0x2246   :  { %3296 = vmatmul.msk.f32.vlgmr.msrb.gmra.mxu0 %vm280_vm1, %v2885_v42  ;;  %3297 = vmatmul.msk.f32.vlgmr.msra.gmra.mxu1 %vm280_vm1, %v2885_v42 }
0x225d   :  { %v2801_v44 = vpop.permute.xlu2 %2800 }
0x225e   :  { %3293 = vmatmul.msk.f32.vlgmr.msrb.gmra.mxu2 %vm280_vm1, %v2801_v44  ;;  %3294 = vmatmul.msk.f32.vlgmr.msrb.gmra.mxu3 %vm280_vm1, %v2801_v44 }
0x225f   :  { %3095 = vmatpush.msrb.mxu2 %v4476_v9  ;;  %3146 = vmatpush.msrb.mxu3 %v4526_v10 }
0x2261   :  { %3096 = vmatpush.msrb.mxu2 %v4478_v0  ;;  %3147 = vmatpush.msrb.mxu3 %v4531_v5  ;;  %v2766_v0 = vpop.f32.mrf.mxu1 }
0x2263   :  { %3097 = vmatpush.msrb.mxu2 %v4481_v28  ;;  %3148 = vmatpush.msrb.mxu3 %v4538_v13 }
0x2265   :  { %3098 = vmatpush.msrb.mxu2 %v4484_v29  ;;  %3149 = vmatpush.msrb.mxu3 %v4545_v1 }
0x2266   :  { %3298 = vmatmul.msk.f32.vlgmr.msra.gmra.mxu2 %vm280_vm1, %v2885_v42 }
0x22c3   :  { %v2905_v46 = vpop.f32.mrf.mxu0  ;;  %v2925_v36 = vpop.f32.mrf.mxu1 }
0x22c4   :  { %v3029_v9 = vadd.f32 %v2905_v46, %v252_v45 }
0x22c6   :  { %3436 = vtanh.f32 %v3029_v9 }
0x22cc   :  { %v3437_v11 = vpop.eup %3436 }
0x22cd   :  { %3035 = vrot.lane.b32.xlu2 %v3437_v11, %s3587_s14  ;;  %v3031_v51 = vmul.f32 0.5, %v3437_v11 }
0x22cf   :  { %v3032_v47 = vadd.f32 0.5, %v3031_v51 }
0x22d1   :  { %v3033_v5 = vmul.f32 %v3032_v47, %v2864_v21 }
0x22e1   :  { %v2821_v12 = vpop.f32.mrf.mxu2  ;;  %v2841_v28 = vpop.f32.mrf.mxu3 }
0x22e2   :  { %v2948_v15 = vadd.f32 %v2925_v36, %v2821_v12  ;;  %v2844_v16 = vadd.f32 %v2841_v28, %v2766_v0 }
0x22e4   :  { %v2949_v29 = vadd.f32 %v3451_v48, %v2948_v15  ;;  %v2845_v50 = vadd.f32 %v2844_v16, %v3872_v31 }
0x22e6   :  { %3438 = vtanh.f32 %v2949_v29  ;;  %3295 = vst.msk [vmem:[%s4670_s11 + $0x68] sm:$0xff] %vm519_vm2, %v2845_v50 }
0x22e9   :  { %v2945_v6 = vpop.f32.mrf.mxu2 }
0x22ec   :  { %v3439_v34 = vpop.eup %3438 }
0x22ed   :  { %2955 = vrot.lane.b32.xlu1 %v3439_v34, %s3587_s14  ;;  %v2951_v54 = vmul.f32 0.5, %v3439_v34 }
0x22ef   :  { %v2952_v49 = vadd.f32 0.5, %v2951_v54 }
0x22f1   :  { %v2953_v17 = vmul.f32 %v2952_v49, %v2784_v37 }
0x2327   :  { %v3036_v8 = vpop.permute.xlu2 %3035 }
0x2328   :  { %v3038_v53 = vmul.f32 %v3036_v8, %v3032_v47 }
0x232a   :  { %3040 = vrot.lane.b32.xlu1 %v3038_v53, %s3588_s27 }
0x235f   :  { %v2956_v2 = vpop.permute.xlu1 %2955 }
0x2360   :  { %v2958_v10 = vmul.f32 %v2956_v2, %v2952_v49 }
0x2362   :  { %2960 = vrot.lane.b32.xlu0 %v2958_v10, %s3588_s27 }
0x239c   :  { %v3041_v13 = vpop.permute.xlu1 %3040 }
0x239d   :  { %v3043_v1 = vadd.f32 %v3041_v13, %v3033_v5 }
0x239f   :  { %3440 = vtanh.f32 %v3043_v1 }
0x23a5   :  { %v3441_v14 = vpop.eup %3440 }
0x23a6   :  { %3046 = vrot.lane.b32.xlu0 %v3441_v14, %s3587_s14 }
0x23d4   :  { %v2961_v26 = vpop.permute.xlu0 %2960 }
0x23d5   :  { %v2963_v18 = vadd.f32 %v2961_v26, %v2953_v17 }
0x23d7   :  { %3442 = vtanh.f32 %v2963_v18 }
0x23dd   :  { %v3443_v24 = vpop.eup %3442 }
0x23de   :  { %2966 = vrot.lane.b32.xlu2 %v3443_v24, %s3587_s14 }
0x2418   :  { %v3047_v43 = vpop.permute.xlu0 %3046 }
0x2419   :  { %v3049_v56 = vmul.f32 %v3047_v43, %v3032_v47 }
0x241b   :  { %3059 = vrot.lane.b32.xlu2 %v3049_v56, %s3588_s27 }
0x2438   :  { %v2967_v58 = vpop.permute.xlu2 %2966 }
0x2439   :  { %v2969_v55 = vmul.f32 %v2967_v58, %v2952_v49 }
0x243b   :  { %2979 = vrot.lane.b32.xlu1 %v2969_v55, %s3588_s27 }
0x2475   :  { %v3060_v59 = vpop.permute.xlu2 %3059 }
0x2476   :  { %3159 = vst.msk [vmem:[%s4671_s12] sm:$0xff] %vm280_vm1, %v3060_v59  ;;  %3302 = vmatmul.msk.f32.vlgmr.msrb.gmra.mxu1 %vm280_vm1, %v3060_v59  ;;  %3303 = vmatmul.msk.f32.vlgmr.msrb.gmra.mxu2 %vm280_vm1, %v3060_v59  ;;  %s3589_s12 = smov 96  }
0x24ad   :  { %v2980_v61 = vpop.permute.xlu1 %2979 }
0x24ae   :  { %3299 = vmatmul.msk.f32.vlgmr.msra.gmra.mxu3 %vm280_vm1, %v2980_v61  ;;  %3300 = vmatmul.msk.f32.vlgmr.msra.gmra.mxu0 %vm280_vm1, %v2980_v61 }
0x24f3   :  { %v3080_v60 = vpop.f32.mrf.mxu1 }
0x24f9   :  { %v3100_v27 = vpop.f32.mrf.mxu2 }
0x252b   :  { %v3020_v19 = vpop.f32.mrf.mxu0 }
0x252c   :  { %v3023_v52 = vadd.f32 %v3020_v19, %v2945_v6 }
0x252e   :  { %v3024_v57 = vadd.f32 %v3023_v52, %v3872_v31 }
0x2530   :  { %3301 = vst.msk [vmem:[%s4670_s11 + $0x70] sm:$0xff] %vm519_vm2, %v3024_v57 }
0x2531   :  { %v3000_v33 = vpop.f32.mrf.mxu3 }
0x2532   :  { %v3103_v4 = vadd.f32 %v3080_v60, %v3000_v33 }
0x2534   :  { %v3104_v7 = vadd.f32 %v3451_v48, %v3103_v4 }
0x2536   :  { %3444 = vtanh.f32 %v3104_v7 }
0x253c   :  { %v3445_v35 = vpop.eup %3444 }
0x253d   :  { %3110 = vrot.lane.b32.xlu0 %v3445_v35, %s3587_s14  ;;  %v3106_v39 = vmul.f32 0.5, %v3445_v35 }
0x253f   :  { %v3107_v62 = vadd.f32 0.5, %v3106_v39 }
0x2541   :  { %v3108_v25 = vmul.f32 %v3107_v62, %v2963_v18 }
0x25af   :  { %v3111_v3 = vpop.permute.xlu0 %3110 }
0x25b0   :  { %v3113_v63 = vmul.f32 %v3111_v3, %v3107_v62 }
0x25b2   :  { %3115 = vrot.lane.b32.xlu1 %v3113_v63, %s3588_s27 }
0x25ba   :  { %3161 = vrot.lane.b32.xlu1 %v3043_v1, %s3589_s12 }
0x2624   :  { %v3116_v20 = vpop.permute.xlu1 %3115 }
0x2625   :  { %v3118_v21 = vadd.f32 %v3116_v20, %v3108_v25 }
0x2627   :  { %3446 = vtanh.f32 %v3118_v21 }
0x262c   :  { %v3162_v22 = vpop.permute.xlu1 %3161 }
0x262d   :  { %v3447_v30 = vpop.eup %3446  ;;  %3164 = vst.msk [vmem:[%s4672_s13] sm:$0xff] %vm280_vm1, %v3162_v22 }
0x262e   :  { %3121 = vrot.lane.b32.xlu2 %v3447_v30, %s3587_s14 }
0x2636   :  { %3168 = vrot.lane.b32.xlu2 %v3118_v21, %s3589_s12 }
0x2688   :  { %v3122_v23 = vpop.permute.xlu2 %3121 }
0x2689   :  { %v3124_v37 = vmul.f32 %v3122_v23, %v3107_v62 }
0x268b   :  { %3130 = vrot.lane.b32.xlu0 %v3124_v37, %s3588_s27 }
0x2690   :  { %v3169_v38 = vpop.permute.xlu2 %3168 }
0x2691   :  { %3171 = vst.msk [vmem:[%s4674_s15] sm:$0xff] %vm280_vm1, %v3169_v38 }
0x26fd   :  { %v3131_v40 = vpop.permute.xlu0 %3130 }
0x26fe   :  { %3166 = vst.msk [vmem:[%s4676_s6] sm:$0xff] %vm280_vm1, %v3131_v40  ;;  %3304 = vmatmul.msk.f32.vlgmr.msrb.gmra.mxu3 %vm280_vm1, %v3131_v40 }
0x2781   :  { %v3151_v32 = vpop.f32.mrf.mxu3 }
0x2782   :  { %v3154_v41 = vadd.f32 %v3151_v32, %v3100_v27 }
0x2784   :  { %v3155_v42 = vadd.f32 %v3154_v41, %v3872_v31 }
0x2786   :  { %3305 = vst.msk [vmem:[%s4670_s11 + $0x78] sm:$0xff] %vm519_vm2, %v3155_v42 }
0x2787   :  { %3192 = vsyncpa [#allocation5], 1 }
0x2788   :  { %3193 = vsyncpa [#allocation7], 1 }
0x2789   :  { %3194 = vsyncpa [#allocation10], 1 }

</bundles_post_ra>
